<compile_context>
chip_gen: v6e
topology: v6e:2x2x1
jax: 0.10.0
libtpu: 0.0.40
codegen_flags: <defaults>
</compile_context>

<pallas_src>
import math

import jax
import jax.numpy as jnp
from jax.experimental import pallas as pl
from jax.experimental.pallas import tpu as pltpu

D_IN = 6
D_MODEL = 36
N_HEADS = 6
HEAD_DIM = D_MODEL // N_HEADS  # 6
D_FF = 2048
N_LAYERS = 2
LN_EPS = 1e-5
OUT_PAD = 128  # lane-dense output width


def _layer_norm(x, w, b):
  # Single-pass LN: mean and mean-of-squares are independent reductions.
  mu = jnp.mean(x, axis=-1, keepdims=True)
  ms = jnp.mean(x * x, axis=-1, keepdims=True)
  var = ms - mu * mu
  return (x - mu) * jax.lax.rsqrt(var + LN_EPS) * w + b


def my_net_kernel(x_ref, w_in_ref, b_in_ref, pos_ref, mask_ref,
                  qkv_w_ref, qkv_b_ref, out_w_ref, out_b_ref,
                  ln1_w_ref, ln1_b_ref,
                  ff1_w_ref, ff1_b_ref, ff2_w_ref, ff2_b_ref,
                  ln2_w_ref, ln2_b_ref,
                  o_ref):
  # One grid step == one batch tile.  x block: (BT, S, D_IN).
  bt, seq, _ = x_ref.shape
  m = bt * seq

  x = x_ref[...].reshape(m, D_IN)                              # (M, 6)

  # input_embedding + tanh
  h = jnp.tanh(
      jnp.dot(x, w_in_ref[...], preferred_element_type=jnp.float32)
      + b_in_ref[0])                                           # (M, 36)

  # position_encoder: same table added to every batch element
  h = (h.reshape(bt, seq, D_MODEL) + pos_ref[...][None]).reshape(m, D_MODEL)

  head_mask = mask_ref[...]                                    # (36, 36) 0/1

  for l in range(N_LAYERS):
    # ---- multi-head self attention --------------------------------------
    # Fused QKV projection (1/sqrt(head_dim) already folded into Q cols).
    qkv = jnp.dot(h, qkv_w_ref[l],
                  preferred_element_type=jnp.float32) + qkv_b_ref[l]  # (M,108)
    q = qkv[:, 0:D_MODEL].reshape(bt, seq, D_MODEL)
    k = qkv[:, D_MODEL:2 * D_MODEL].reshape(bt, seq, D_MODEL)
    v = qkv[:, 2 * D_MODEL:3 * D_MODEL].reshape(bt, seq, D_MODEL)

    # Outer product over (query, key); lane axis carries all 36 (head, dim)
    # columns, so this is pure VPU work.
    prod = q[:, :, None, :] * k[:, None, :, :]                 # (BT,Sq,Sk,36)

    # Per-head reduction over head_dim via ONE GEMM against a 0/1
    # block-diagonal mask (36x36).  Output column e holds the head-(e//6)
    # score, repeated across that head's 6 lanes.
    s = jnp.dot(prod.reshape(m * seq, D_MODEL), head_mask,
                preferred_element_type=jnp.float32)
    s = s.reshape(bt, seq, seq, D_MODEL)                       # (BT,Sq,Sk,36)

    # Softmax over the key axis (second-minor / sublane reduce).
    s = s - jnp.max(s, axis=2, keepdims=True)
    p = jnp.exp(s)
    p = p * pl.reciprocal(jnp.sum(p, axis=2, keepdims=True), approx=True)

    # Context: weighted sum of V over keys (sublane reduce); columns already
    # line up head-major, so this equals the concatenated multi-head output.
    ctx = jnp.sum(p * v[:, None, :, :], axis=2)                # (BT, Sq, 36)

    # Single out-projection GEMM.
    attn = jnp.dot(ctx.reshape(m, D_MODEL), out_w_ref[l],
                   preferred_element_type=jnp.float32) + out_b_ref[l]

    # residual + LayerNorm (post-norm, PyTorch default norm_first=False)
    h = _layer_norm(h + attn, ln1_w_ref[l], ln1_b_ref[l])

    # ---- feed-forward: bf16 MXU inputs, f32 accumulation ------------------
    ff = jnp.dot(h.astype(jnp.bfloat16), ff1_w_ref[l],
                 preferred_element_type=jnp.float32) + ff1_b_ref[l]
    ff = jnp.maximum(ff, 0.0)                                  # relu (f32)
    ff = jnp.dot(ff.astype(jnp.bfloat16), ff2_w_ref[l],
                 preferred_element_type=jnp.float32) + ff2_b_ref[l]
    h = _layer_norm(h + ff, ln2_w_ref[l], ln2_b_ref[l])

  # torch.mean(x_out, dim=1): mean over the sequence axis.
  mean = jnp.mean(h.reshape(bt, seq, D_MODEL), axis=1)         # (BT, 36)
  # Lane-dense store: pad to 128 columns; wrapper slices [:, :36].
  o_ref[...] = jnp.concatenate(
      [mean, jnp.zeros((bt, OUT_PAD - D_MODEL), mean.dtype)], axis=-1)


def _full_spec(arr):
  zeros = (0,) * arr.ndim
  return pl.BlockSpec(arr.shape, lambda i, zeros=zeros: zeros)


def my_net_forward(x, params, *, block_b=128, vmem_limit_bytes=48 * 1024 * 1024):
  B, S, _ = x.shape
  bt = min(block_b, B)
  n_blk = pl.cdiv(B, bt)
  b_pad = n_blk * bt
  if b_pad != B:
    # Pad the batch; attention never mixes batch elements, so padded rows
    # are pure garbage that gets sliced off below.
    x = jnp.concatenate(
        [x, jnp.zeros((b_pad - B, S, D_IN), x.dtype)], axis=0)

  # ---- wrapper-side weight prep (free, outside the kernel) ----------------
  scale = 1.0 / math.sqrt(HEAD_DIM)
  # Fold the attention scale into the Q columns of the fused QKV projection.
  qkv_scale = jnp.concatenate(
      [jnp.full((D_MODEL,), scale, jnp.float32),
       jnp.ones((2 * D_MODEL,), jnp.float32)])                  # (108,)
  qkv_w = params["in_w"] * qkv_scale[None, None, :]             # (L, 36, 108)
  qkv_b = params["in_b"] * qkv_scale[None, :]                   # (L, 108)

  # Block-diagonal 0/1 head mask: mask[d, e] = 1 iff d and e belong to the
  # same head.  Used inside the kernel to do the per-head score reduction
  # as one GEMM.
  d = jnp.arange(D_MODEL)
  head_mask = (d[:, None] // HEAD_DIM == d[None, :] // HEAD_DIM).astype(
      jnp.float32)                                              # (36, 36)

  ff1_w = params["ff1_w"].astype(jnp.bfloat16)                  # bf16 MXU path
  ff2_w = params["ff2_w"].astype(jnp.bfloat16)

  operands = [
      x,
      params["w_in"], params["b_in"], params["pos"], head_mask,
      qkv_w, qkv_b,
      params["out_w"], params["out_b"],
      params["ln1_w"], params["ln1_b"],
      ff1_w, params["ff1_b"], ff2_w, params["ff2_b"],
      params["ln2_w"], params["ln2_b"],
  ]

  in_specs = [pl.BlockSpec((bt, S, D_IN), lambda i: (i, 0, 0))]
  in_specs += [_full_spec(arr) for arr in operands[1:]]
  out_specs = pl.BlockSpec((bt, OUT_PAD), lambda i: (i, 0))

  out = pl.pallas_call(
      my_net_kernel,
      out_shape=jax.ShapeDtypeStruct((b_pad, OUT_PAD), jnp.float32),
      grid=(n_blk,),
      in_specs=in_specs,
      out_specs=out_specs,
      compiler_params=pltpu.CompilerParams(
          dimension_semantics=("parallel",),
          vmem_limit_bytes=vmem_limit_bytes),
  )(*operands)
  return out[:B, :D_MODEL]                                      # (B, 36)


# ----------------------------- pure-JAX reference ----------------------------
def _ln_ref(x, w, b):
  mu = x.mean(-1, keepdims=True)
  var = ((x - mu) ** 2).mean(-1, keepdims=True)
  return (x - mu) / jnp.sqrt(var + LN_EPS) * w + b


def forward_ref(x, p):
  h = jnp.tanh(x @ p["w_in"] + p["b_in"][0])
  h = h + p["pos"][None]
  B, S, _ = h.shape
  for l in range(N_LAYERS):
    qkv = h @ p["in_w"][l] + p["in_b"][l]
    q, k, v = jnp.split(qkv, 3, axis=-1)
    sh = lambda t: t.reshape(B, S, N_HEADS, HEAD_DIM).transpose(0, 2, 1, 3)
    qh, kh, vh = sh(q), sh(k), sh(v)
    s = jnp.einsum("bhqd,bhkd->bhqk", qh, kh) / math.sqrt(HEAD_DIM)
    pa = jax.nn.softmax(s, axis=-1)
    ctx = jnp.einsum("bhqk,bhkd->bhqd", pa, vh)
    ctx = ctx.transpose(0, 2, 1, 3).reshape(B, S, D_MODEL)
    attn = ctx @ p["out_w"][l] + p["out_b"][l]
    h = _ln_ref(h + attn, p["ln1_w"][l], p["ln1_b"][l])
    ff = jax.nn.relu(h @ p["ff1_w"][l] + p["ff1_b"][l])
    ff = ff @ p["ff2_w"][l] + p["ff2_b"][l]
    h = _ln_ref(h + ff, p["ln2_w"][l], p["ln2_b"][l])
  return h.mean(axis=1)


# ------------------------------- param helpers --------------------------------
def make_position_table(seq_len, d_model):
  i = jnp.arange(seq_len, dtype=jnp.float32)[:, None]
  j = jnp.arange(d_model)
  denom = jnp.power(10000.0, (j + 1).astype(jnp.float32) / d_model)
  ang = i / denom
  return jnp.where(j % 2 == 0, jnp.sin(ang), jnp.cos(ang)).astype(jnp.float32)


def init_params(key, seq_len):
  ks = jax.random.split(key, 12)
  def u(k, shape, fan_in):
    b = 1.0 / math.sqrt(fan_in)
    return jax.random.uniform(k, shape, jnp.float32, -b, b)
  return {
      "w_in":  u(ks[0], (D_IN, D_MODEL), D_IN),
      "b_in":  u(ks[1], (1, D_MODEL), D_IN),
      "pos":   make_position_table(seq_len, D_MODEL),
      "in_w":  u(ks[2], (N_LAYERS, D_MODEL, 3 * D_MODEL), D_MODEL),
      "in_b":  u(ks[3], (N_LAYERS, 3 * D_MODEL), D_MODEL),
      "out_w": u(ks[4], (N_LAYERS, D_MODEL, D_MODEL), D_MODEL),
      "out_b": u(ks[5], (N_LAYERS, D_MODEL), D_MODEL),
      "ln1_w": jnp.ones((N_LAYERS, D_MODEL), jnp.float32),
      "ln1_b": jnp.zeros((N_LAYERS, D_MODEL), jnp.float32),
      "ff1_w": u(ks[6], (N_LAYERS, D_MODEL, D_FF), D_MODEL),
      "ff1_b": u(ks[7], (N_LAYERS, D_FF), D_MODEL),
      "ff2_w": u(ks[8], (N_LAYERS, D_FF, D_MODEL), D_FF),
      "ff2_b": u(ks[9], (N_LAYERS, D_MODEL), D_FF),
      "ln2_w": jnp.ones((N_LAYERS, D_MODEL), jnp.float32),
      "ln2_b": jnp.zeros((N_LAYERS, D_MODEL), jnp.float32),
  }


if __name__ == "__main__":
  B, S = 2, 8
  key = jax.random.PRNGKey(0)
  k_x, k_p = jax.random.split(key)
  x = jax.random.normal(k_x, (B, S, D_IN), jnp.float32)
  params = init_params(k_p, S)

  out = jax.block_until_ready(my_net_forward(x, params))
  ref = jax.block_until_ready(forward_ref(x, params))

  assert out.shape == (B, D_MODEL), out.shape
  if not jnp.allclose(out, ref, atol=2e-2, rtol=2e-2):
    raise AssertionError("Pallas output does not match JAX reference")
  print("KERNEL_OK")
</pallas_src>

<mosaic_0001>
module attributes {stable_mosaic.version = 11 : i64} {
  func.func @my_net_kernel(%arg0: i32, %arg1: memref<2x8x6xf32, #tpu.memory_space<vmem>>, %arg2: memref<6x36xf32, #tpu.memory_space<vmem>>, %arg3: memref<1x36xf32, #tpu.memory_space<vmem>>, %arg4: memref<8x36xf32, #tpu.memory_space<vmem>>, %arg5: memref<36x36xf32, #tpu.memory_space<vmem>>, %arg6: memref<2x36x108xf32, #tpu.memory_space<vmem>>, %arg7: memref<2x108xf32, #tpu.memory_space<vmem>>, %arg8: memref<2x36x36xf32, #tpu.memory_space<vmem>>, %arg9: memref<2x36xf32, #tpu.memory_space<vmem>>, %arg10: memref<2x36xf32, #tpu.memory_space<vmem>>, %arg11: memref<2x36xf32, #tpu.memory_space<vmem>>, %arg12: memref<2x36x2048xbf16, #tpu.memory_space<vmem>>, %arg13: memref<2x2048xf32, #tpu.memory_space<vmem>>, %arg14: memref<2x2048x36xbf16, #tpu.memory_space<vmem>>, %arg15: memref<2x36xf32, #tpu.memory_space<vmem>>, %arg16: memref<2x36xf32, #tpu.memory_space<vmem>>, %arg17: memref<2x36xf32, #tpu.memory_space<vmem>>, %arg18: memref<2x128xf32, #tpu.memory_space<vmem>>) attributes {dimension_semantics = [#tpu.dimension_semantics<parallel>], iteration_bounds = array<i64: 1>, scalar_prefetch = 0 : i64, scratch_operands = 0 : i64, tpu.core_type = #tpu.core_type<tc>, window_params = [{transform_indices = @transform_0, window_bounds = array<i64: 2, 8, 6>}, {pipeline_mode = #tpu.pipeline_mode<synchronous>, transform_indices = @transform_1, window_bounds = array<i64: 6, 36>}, {pipeline_mode = #tpu.pipeline_mode<synchronous>, transform_indices = @transform_2, window_bounds = array<i64: 1, 36>}, {pipeline_mode = #tpu.pipeline_mode<synchronous>, transform_indices = @transform_3, window_bounds = array<i64: 8, 36>}, {pipeline_mode = #tpu.pipeline_mode<synchronous>, transform_indices = @transform_4, window_bounds = array<i64: 36, 36>}, {pipeline_mode = #tpu.pipeline_mode<synchronous>, transform_indices = @transform_5, window_bounds = array<i64: 2, 36, 108>}, {pipeline_mode = #tpu.pipeline_mode<synchronous>, transform_indices = @transform_6, window_bounds = array<i64: 2, 108>}, {pipeline_mode = #tpu.pipeline_mode<synchronous>, transform_indices = @transform_7, window_bounds = array<i64: 2, 36, 36>}, {pipeline_mode = #tpu.pipeline_mode<synchronous>, transform_indices = @transform_8, window_bounds = array<i64: 2, 36>}, {pipeline_mode = #tpu.pipeline_mode<synchronous>, transform_indices = @transform_9, window_bounds = array<i64: 2, 36>}, {pipeline_mode = #tpu.pipeline_mode<synchronous>, transform_indices = @transform_10, window_bounds = array<i64: 2, 36>}, {pipeline_mode = #tpu.pipeline_mode<synchronous>, transform_indices = @transform_11, window_bounds = array<i64: 2, 36, 2048>}, {pipeline_mode = #tpu.pipeline_mode<synchronous>, transform_indices = @transform_12, window_bounds = array<i64: 2, 2048>}, {pipeline_mode = #tpu.pipeline_mode<synchronous>, transform_indices = @transform_13, window_bounds = array<i64: 2, 2048, 36>}, {pipeline_mode = #tpu.pipeline_mode<synchronous>, transform_indices = @transform_14, window_bounds = array<i64: 2, 36>}, {pipeline_mode = #tpu.pipeline_mode<synchronous>, transform_indices = @transform_15, window_bounds = array<i64: 2, 36>}, {pipeline_mode = #tpu.pipeline_mode<synchronous>, transform_indices = @transform_16, window_bounds = array<i64: 2, 36>}, {transform_indices = @transform_17, window_bounds = array<i64: 2, 128>}]} {
    %c0 = arith.constant 0 : index
    %c0_0 = arith.constant 0 : index
    %c0_1 = arith.constant 0 : index
    %0 = vector.load %arg1[%c0, %c0_0, %c0_1] : memref<2x8x6xf32, #tpu.memory_space<vmem>>, vector<2x8x6xf32>
    %1 = vector.shape_cast %0 : vector<2x8x6xf32> to vector<16x6xf32>
    %c0_2 = arith.constant 0 : index
    %c0_3 = arith.constant 0 : index
    %2 = vector.load %arg2[%c0_2, %c0_3] : memref<6x36xf32, #tpu.memory_space<vmem>>, vector<6x36xf32>
    %cst = arith.constant dense<0.000000e+00> : vector<16x36xf32>
    %3 = tpu.matmul %1, %2, %cst {dimension_numbers = #tpu.dot_dimension_numbers<[1], [0], [0], [1], [0, 0, 1, 1], [], []>} : vector<16x6xf32>, vector<6x36xf32>, vector<16x36xf32> -> vector<16x36xf32>
    %c0_4 = arith.constant 0 : index
    %c0_5 = arith.constant 0 : index
    %4 = vector.load %arg3[%c0_4, %c0_5] : memref<1x36xf32, #tpu.memory_space<vmem>>, vector<1x36xf32>
    %5 = vector.shape_cast %4 : vector<1x36xf32> to vector<36xf32>
    %6 = vector.shape_cast %5 : vector<36xf32> to vector<1x36xf32>
    %7 = vector.broadcast %6 : vector<1x36xf32> to vector<16x36xf32>
    %8 = arith.addf %3, %7 : vector<16x36xf32>
    %9 = math.tanh %8 : vector<16x36xf32>
    %10 = vector.shape_cast %9 : vector<16x36xf32> to vector<2x8x36xf32>
    %c0_6 = arith.constant 0 : index
    %c0_7 = arith.constant 0 : index
    %11 = vector.load %arg4[%c0_6, %c0_7] : memref<8x36xf32, #tpu.memory_space<vmem>>, vector<8x36xf32>
    %12 = vector.shape_cast %11 : vector<8x36xf32> to vector<1x8x36xf32>
    %13 = vector.broadcast %12 : vector<1x8x36xf32> to vector<2x8x36xf32>
    %14 = arith.addf %10, %13 : vector<2x8x36xf32>
    %15 = vector.shape_cast %14 : vector<2x8x36xf32> to vector<16x36xf32>
    %c0_8 = arith.constant 0 : index
    %c0_9 = arith.constant 0 : index
    %16 = vector.load %arg5[%c0_8, %c0_9] : memref<36x36xf32, #tpu.memory_space<vmem>>, vector<36x36xf32>
    %c0_10 = arith.constant 0 : index
    %c0_11 = arith.constant 0 : index
    %c0_12 = arith.constant 0 : index
    %17 = vector.load %arg6[%c0_10, %c0_11, %c0_12] : memref<2x36x108xf32, #tpu.memory_space<vmem>>, vector<1x36x108xf32>
    %18 = vector.shape_cast %17 : vector<1x36x108xf32> to vector<36x108xf32>
    %cst_13 = arith.constant dense<0.000000e+00> : vector<16x108xf32>
    %19 = tpu.matmul %15, %18, %cst_13 {dimension_numbers = #tpu.dot_dimension_numbers<[1], [0], [0], [1], [0, 0, 1, 1], [], []>} : vector<16x36xf32>, vector<36x108xf32>, vector<16x108xf32> -> vector<16x108xf32>
    %c0_14 = arith.constant 0 : index
    %c0_15 = arith.constant 0 : index
    %20 = vector.load %arg7[%c0_14, %c0_15] : memref<2x108xf32, #tpu.memory_space<vmem>>, vector<1x108xf32>
    %21 = vector.shape_cast %20 : vector<1x108xf32> to vector<108xf32>
    %22 = vector.shape_cast %21 : vector<108xf32> to vector<1x108xf32>
    %23 = vector.broadcast %22 : vector<1x108xf32> to vector<16x108xf32>
    %24 = arith.addf %19, %23 : vector<16x108xf32>
    %25 = vector.extract_strided_slice %24 {offsets = [0, 0], sizes = [16, 36], strides = [1, 1]} : vector<16x108xf32> to vector<16x36xf32>
    %26 = vector.shape_cast %25 : vector<16x36xf32> to vector<2x8x36xf32>
    %27 = vector.extract_strided_slice %24 {offsets = [0, 36], sizes = [16, 36], strides = [1, 1]} : vector<16x108xf32> to vector<16x36xf32>
    %28 = vector.shape_cast %27 : vector<16x36xf32> to vector<2x8x36xf32>
    %29 = vector.extract_strided_slice %24 {offsets = [0, 72], sizes = [16, 36], strides = [1, 1]} : vector<16x108xf32> to vector<16x36xf32>
    %30 = vector.shape_cast %29 : vector<16x36xf32> to vector<2x8x36xf32>
    %31 = vector.shape_cast %26 : vector<2x8x36xf32> to vector<2x8x1x36xf32>
    %32 = vector.shape_cast %28 : vector<2x8x36xf32> to vector<2x1x8x36xf32>
    %33 = vector.broadcast %31 : vector<2x8x1x36xf32> to vector<2x8x8x36xf32>
    %34 = vector.broadcast %32 : vector<2x1x8x36xf32> to vector<2x8x8x36xf32>
    %35 = arith.mulf %33, %34 : vector<2x8x8x36xf32>
    %36 = vector.shape_cast %35 : vector<2x8x8x36xf32> to vector<128x36xf32>
    %cst_16 = arith.constant dense<0.000000e+00> : vector<128x36xf32>
    %37 = tpu.matmul %36, %16, %cst_16 {dimension_numbers = #tpu.dot_dimension_numbers<[1], [0], [0], [1], [0, 0, 1, 1], [], []>} : vector<128x36xf32>, vector<36x36xf32>, vector<128x36xf32> -> vector<128x36xf32>
    %38 = vector.shape_cast %37 : vector<128x36xf32> to vector<2x8x8x36xf32>
    %cst_17 = arith.constant dense<0xFF800000> : vector<2x8x36xf32>
    %39 = vector.multi_reduction <maximumf>, %38, %cst_17 [2] : vector<2x8x8x36xf32> to vector<2x8x36xf32>
    %40 = vector.shape_cast %39 : vector<2x8x36xf32> to vector<2x8x1x36xf32>
    %41 = vector.broadcast %40 : vector<2x8x1x36xf32> to vector<2x8x8x36xf32>
    %42 = arith.subf %38, %41 : vector<2x8x8x36xf32>
    %43 = math.exp %42 : vector<2x8x8x36xf32>
    %cst_18 = arith.constant dense<0.000000e+00> : vector<2x8x36xf32>
    %44 = vector.multi_reduction <add>, %43, %cst_18 [2] : vector<2x8x8x36xf32> to vector<2x8x36xf32>
    %45 = vector.shape_cast %44 : vector<2x8x36xf32> to vector<2x8x1x36xf32>
    %46 = tpu.reciprocal %45 {approx = true} : vector<2x8x1x36xf32> -> vector<2x8x1x36xf32>
    %47 = vector.broadcast %46 : vector<2x8x1x36xf32> to vector<2x8x8x36xf32>
    %48 = arith.mulf %43, %47 : vector<2x8x8x36xf32>
    %49 = vector.shape_cast %30 : vector<2x8x36xf32> to vector<2x1x8x36xf32>
    %50 = vector.broadcast %49 : vector<2x1x8x36xf32> to vector<2x8x8x36xf32>
    %51 = arith.mulf %48, %50 : vector<2x8x8x36xf32>
    %cst_19 = arith.constant dense<0.000000e+00> : vector<2x8x36xf32>
    %52 = vector.multi_reduction <add>, %51, %cst_19 [2] : vector<2x8x8x36xf32> to vector<2x8x36xf32>
    %53 = vector.shape_cast %52 : vector<2x8x36xf32> to vector<16x36xf32>
    %c0_20 = arith.constant 0 : index
    %c0_21 = arith.constant 0 : index
    %c0_22 = arith.constant 0 : index
    %54 = vector.load %arg8[%c0_20, %c0_21, %c0_22] : memref<2x36x36xf32, #tpu.memory_space<vmem>>, vector<1x36x36xf32>
    %55 = vector.shape_cast %54 : vector<1x36x36xf32> to vector<36x36xf32>
    %cst_23 = arith.constant dense<0.000000e+00> : vector<16x36xf32>
    %56 = tpu.matmul %53, %55, %cst_23 {dimension_numbers = #tpu.dot_dimension_numbers<[1], [0], [0], [1], [0, 0, 1, 1], [], []>} : vector<16x36xf32>, vector<36x36xf32>, vector<16x36xf32> -> vector<16x36xf32>
    %c0_24 = arith.constant 0 : index
    %c0_25 = arith.constant 0 : index
    %57 = vector.load %arg9[%c0_24, %c0_25] : memref<2x36xf32, #tpu.memory_space<vmem>>, vector<1x36xf32>
    %58 = vector.shape_cast %57 : vector<1x36xf32> to vector<36xf32>
    %59 = vector.shape_cast %58 : vector<36xf32> to vector<1x36xf32>
    %60 = vector.broadcast %59 : vector<1x36xf32> to vector<16x36xf32>
    %61 = arith.addf %56, %60 : vector<16x36xf32>
    %62 = arith.addf %15, %61 : vector<16x36xf32>
    %c0_26 = arith.constant 0 : index
    %c0_27 = arith.constant 0 : index
    %63 = vector.load %arg10[%c0_26, %c0_27] : memref<2x36xf32, #tpu.memory_space<vmem>>, vector<1x36xf32>
    %64 = vector.shape_cast %63 : vector<1x36xf32> to vector<36xf32>
    %c0_28 = arith.constant 0 : index
    %c0_29 = arith.constant 0 : index
    %65 = vector.load %arg11[%c0_28, %c0_29] : memref<2x36xf32, #tpu.memory_space<vmem>>, vector<1x36xf32>
    %66 = vector.shape_cast %65 : vector<1x36xf32> to vector<36xf32>
    %cst_30 = arith.constant dense<0.000000e+00> : vector<16xf32>
    %67 = vector.multi_reduction <add>, %62, %cst_30 [1] : vector<16x36xf32> to vector<16xf32>
    %68 = vector.shape_cast %67 : vector<16xf32> to vector<16x1xf32>
    %cst_31 = arith.constant 3.600000e+01 : f32
    %69 = vector.broadcast %cst_31 : f32 to vector<16x1xf32>
    %70 = arith.divf %68, %69 : vector<16x1xf32>
    %71 = arith.mulf %62, %62 : vector<16x36xf32>
    %cst_32 = arith.constant dense<0.000000e+00> : vector<16xf32>
    %72 = vector.multi_reduction <add>, %71, %cst_32 [1] : vector<16x36xf32> to vector<16xf32>
    %73 = vector.shape_cast %72 : vector<16xf32> to vector<16x1xf32>
    %cst_33 = arith.constant 3.600000e+01 : f32
    %74 = vector.broadcast %cst_33 : f32 to vector<16x1xf32>
    %75 = arith.divf %73, %74 : vector<16x1xf32>
    %76 = arith.mulf %70, %70 : vector<16x1xf32>
    %77 = arith.subf %75, %76 : vector<16x1xf32>
    %78 = vector.broadcast %70 : vector<16x1xf32> to vector<16x36xf32>
    %79 = arith.subf %62, %78 : vector<16x36xf32>
    %cst_34 = arith.constant 9.99999974E-6 : f32
    %80 = vector.broadcast %cst_34 : f32 to vector<16x1xf32>
    %81 = arith.addf %77, %80 : vector<16x1xf32>
    %82 = math.rsqrt %81 : vector<16x1xf32>
    %83 = vector.broadcast %82 : vector<16x1xf32> to vector<16x36xf32>
    %84 = arith.mulf %79, %83 : vector<16x36xf32>
    %85 = vector.shape_cast %64 : vector<36xf32> to vector<1x36xf32>
    %86 = vector.broadcast %85 : vector<1x36xf32> to vector<16x36xf32>
    %87 = arith.mulf %84, %86 : vector<16x36xf32>
    %88 = vector.shape_cast %66 : vector<36xf32> to vector<1x36xf32>
    %89 = vector.broadcast %88 : vector<1x36xf32> to vector<16x36xf32>
    %90 = arith.addf %87, %89 : vector<16x36xf32>
    %91 = arith.truncf %90 : vector<16x36xf32> to vector<16x36xbf16>
    %c0_35 = arith.constant 0 : index
    %c0_36 = arith.constant 0 : index
    %c0_37 = arith.constant 0 : index
    %92 = vector.load %arg12[%c0_35, %c0_36, %c0_37] : memref<2x36x2048xbf16, #tpu.memory_space<vmem>>, vector<1x36x2048xbf16>
    %93 = vector.shape_cast %92 : vector<1x36x2048xbf16> to vector<36x2048xbf16>
    %cst_38 = arith.constant dense<0.000000e+00> : vector<16x2048xf32>
    %94 = tpu.matmul %91, %93, %cst_38 {dimension_numbers = #tpu.dot_dimension_numbers<[1], [0], [0], [1], [0, 0, 1, 1], [], []>} : vector<16x36xbf16>, vector<36x2048xbf16>, vector<16x2048xf32> -> vector<16x2048xf32>
    %c0_39 = arith.constant 0 : index
    %c0_40 = arith.constant 0 : index
    %95 = vector.load %arg13[%c0_39, %c0_40] : memref<2x2048xf32, #tpu.memory_space<vmem>>, vector<1x2048xf32>
    %96 = vector.shape_cast %95 : vector<1x2048xf32> to vector<2048xf32>
    %97 = vector.shape_cast %96 : vector<2048xf32> to vector<1x2048xf32>
    %98 = vector.broadcast %97 : vector<1x2048xf32> to vector<16x2048xf32>
    %99 = arith.addf %94, %98 : vector<16x2048xf32>
    %cst_41 = arith.constant 0.000000e+00 : f32
    %100 = vector.broadcast %cst_41 : f32 to vector<16x2048xf32>
    %101 = arith.maximumf %99, %100 : vector<16x2048xf32>
    %102 = arith.truncf %101 : vector<16x2048xf32> to vector<16x2048xbf16>
    %c0_42 = arith.constant 0 : index
    %c0_43 = arith.constant 0 : index
    %c0_44 = arith.constant 0 : index
    %103 = vector.load %arg14[%c0_42, %c0_43, %c0_44] : memref<2x2048x36xbf16, #tpu.memory_space<vmem>>, vector<1x2048x36xbf16>
    %104 = vector.shape_cast %103 : vector<1x2048x36xbf16> to vector<2048x36xbf16>
    %cst_45 = arith.constant dense<0.000000e+00> : vector<16x36xf32>
    %105 = tpu.matmul %102, %104, %cst_45 {dimension_numbers = #tpu.dot_dimension_numbers<[1], [0], [0], [1], [0, 0, 1, 1], [], []>} : vector<16x2048xbf16>, vector<2048x36xbf16>, vector<16x36xf32> -> vector<16x36xf32>
    %c0_46 = arith.constant 0 : index
    %c0_47 = arith.constant 0 : index
    %106 = vector.load %arg15[%c0_46, %c0_47] : memref<2x36xf32, #tpu.memory_space<vmem>>, vector<1x36xf32>
    %107 = vector.shape_cast %106 : vector<1x36xf32> to vector<36xf32>
    %108 = vector.shape_cast %107 : vector<36xf32> to vector<1x36xf32>
    %109 = vector.broadcast %108 : vector<1x36xf32> to vector<16x36xf32>
    %110 = arith.addf %105, %109 : vector<16x36xf32>
    %111 = arith.addf %90, %110 : vector<16x36xf32>
    %c0_48 = arith.constant 0 : index
    %c0_49 = arith.constant 0 : index
    %112 = vector.load %arg16[%c0_48, %c0_49] : memref<2x36xf32, #tpu.memory_space<vmem>>, vector<1x36xf32>
    %113 = vector.shape_cast %112 : vector<1x36xf32> to vector<36xf32>
    %c0_50 = arith.constant 0 : index
    %c0_51 = arith.constant 0 : index
    %114 = vector.load %arg17[%c0_50, %c0_51] : memref<2x36xf32, #tpu.memory_space<vmem>>, vector<1x36xf32>
    %115 = vector.shape_cast %114 : vector<1x36xf32> to vector<36xf32>
    %cst_52 = arith.constant dense<0.000000e+00> : vector<16xf32>
    %116 = vector.multi_reduction <add>, %111, %cst_52 [1] : vector<16x36xf32> to vector<16xf32>
    %117 = vector.shape_cast %116 : vector<16xf32> to vector<16x1xf32>
    %cst_53 = arith.constant 3.600000e+01 : f32
    %118 = vector.broadcast %cst_53 : f32 to vector<16x1xf32>
    %119 = arith.divf %117, %118 : vector<16x1xf32>
    %120 = arith.mulf %111, %111 : vector<16x36xf32>
    %cst_54 = arith.constant dense<0.000000e+00> : vector<16xf32>
    %121 = vector.multi_reduction <add>, %120, %cst_54 [1] : vector<16x36xf32> to vector<16xf32>
    %122 = vector.shape_cast %121 : vector<16xf32> to vector<16x1xf32>
    %cst_55 = arith.constant 3.600000e+01 : f32
    %123 = vector.broadcast %cst_55 : f32 to vector<16x1xf32>
    %124 = arith.divf %122, %123 : vector<16x1xf32>
    %125 = arith.mulf %119, %119 : vector<16x1xf32>
    %126 = arith.subf %124, %125 : vector<16x1xf32>
    %127 = vector.broadcast %119 : vector<16x1xf32> to vector<16x36xf32>
    %128 = arith.subf %111, %127 : vector<16x36xf32>
    %cst_56 = arith.constant 9.99999974E-6 : f32
    %129 = vector.broadcast %cst_56 : f32 to vector<16x1xf32>
    %130 = arith.addf %126, %129 : vector<16x1xf32>
    %131 = math.rsqrt %130 : vector<16x1xf32>
    %132 = vector.broadcast %131 : vector<16x1xf32> to vector<16x36xf32>
    %133 = arith.mulf %128, %132 : vector<16x36xf32>
    %134 = vector.shape_cast %113 : vector<36xf32> to vector<1x36xf32>
    %135 = vector.broadcast %134 : vector<1x36xf32> to vector<16x36xf32>
    %136 = arith.mulf %133, %135 : vector<16x36xf32>
    %137 = vector.shape_cast %115 : vector<36xf32> to vector<1x36xf32>
    %138 = vector.broadcast %137 : vector<1x36xf32> to vector<16x36xf32>
    %139 = arith.addf %136, %138 : vector<16x36xf32>
    %c1 = arith.constant 1 : index
    %c0_57 = arith.constant 0 : index
    %c0_58 = arith.constant 0 : index
    %140 = vector.load %arg6[%c1, %c0_57, %c0_58] : memref<2x36x108xf32, #tpu.memory_space<vmem>>, vector<1x36x108xf32>
    %141 = vector.shape_cast %140 : vector<1x36x108xf32> to vector<36x108xf32>
    %cst_59 = arith.constant dense<0.000000e+00> : vector<16x108xf32>
    %142 = tpu.matmul %139, %141, %cst_59 {dimension_numbers = #tpu.dot_dimension_numbers<[1], [0], [0], [1], [0, 0, 1, 1], [], []>} : vector<16x36xf32>, vector<36x108xf32>, vector<16x108xf32> -> vector<16x108xf32>
    %c1_60 = arith.constant 1 : index
    %c0_61 = arith.constant 0 : index
    %143 = vector.load %arg7[%c1_60, %c0_61] : memref<2x108xf32, #tpu.memory_space<vmem>>, vector<1x108xf32>
    %144 = vector.shape_cast %143 : vector<1x108xf32> to vector<108xf32>
    %145 = vector.shape_cast %144 : vector<108xf32> to vector<1x108xf32>
    %146 = vector.broadcast %145 : vector<1x108xf32> to vector<16x108xf32>
    %147 = arith.addf %142, %146 : vector<16x108xf32>
    %148 = vector.extract_strided_slice %147 {offsets = [0, 0], sizes = [16, 36], strides = [1, 1]} : vector<16x108xf32> to vector<16x36xf32>
    %149 = vector.shape_cast %148 : vector<16x36xf32> to vector<2x8x36xf32>
    %150 = vector.extract_strided_slice %147 {offsets = [0, 36], sizes = [16, 36], strides = [1, 1]} : vector<16x108xf32> to vector<16x36xf32>
    %151 = vector.shape_cast %150 : vector<16x36xf32> to vector<2x8x36xf32>
    %152 = vector.extract_strided_slice %147 {offsets = [0, 72], sizes = [16, 36], strides = [1, 1]} : vector<16x108xf32> to vector<16x36xf32>
    %153 = vector.shape_cast %152 : vector<16x36xf32> to vector<2x8x36xf32>
    %154 = vector.shape_cast %149 : vector<2x8x36xf32> to vector<2x8x1x36xf32>
    %155 = vector.shape_cast %151 : vector<2x8x36xf32> to vector<2x1x8x36xf32>
    %156 = vector.broadcast %154 : vector<2x8x1x36xf32> to vector<2x8x8x36xf32>
    %157 = vector.broadcast %155 : vector<2x1x8x36xf32> to vector<2x8x8x36xf32>
    %158 = arith.mulf %156, %157 : vector<2x8x8x36xf32>
    %159 = vector.shape_cast %158 : vector<2x8x8x36xf32> to vector<128x36xf32>
    %cst_62 = arith.constant dense<0.000000e+00> : vector<128x36xf32>
    %160 = tpu.matmul %159, %16, %cst_62 {dimension_numbers = #tpu.dot_dimension_numbers<[1], [0], [0], [1], [0, 0, 1, 1], [], []>} : vector<128x36xf32>, vector<36x36xf32>, vector<128x36xf32> -> vector<128x36xf32>
    %161 = vector.shape_cast %160 : vector<128x36xf32> to vector<2x8x8x36xf32>
    %cst_63 = arith.constant dense<0xFF800000> : vector<2x8x36xf32>
    %162 = vector.multi_reduction <maximumf>, %161, %cst_63 [2] : vector<2x8x8x36xf32> to vector<2x8x36xf32>
    %163 = vector.shape_cast %162 : vector<2x8x36xf32> to vector<2x8x1x36xf32>
    %164 = vector.broadcast %163 : vector<2x8x1x36xf32> to vector<2x8x8x36xf32>
    %165 = arith.subf %161, %164 : vector<2x8x8x36xf32>
    %166 = math.exp %165 : vector<2x8x8x36xf32>
    %cst_64 = arith.constant dense<0.000000e+00> : vector<2x8x36xf32>
    %167 = vector.multi_reduction <add>, %166, %cst_64 [2] : vector<2x8x8x36xf32> to vector<2x8x36xf32>
    %168 = vector.shape_cast %167 : vector<2x8x36xf32> to vector<2x8x1x36xf32>
    %169 = tpu.reciprocal %168 {approx = true} : vector<2x8x1x36xf32> -> vector<2x8x1x36xf32>
    %170 = vector.broadcast %169 : vector<2x8x1x36xf32> to vector<2x8x8x36xf32>
    %171 = arith.mulf %166, %170 : vector<2x8x8x36xf32>
    %172 = vector.shape_cast %153 : vector<2x8x36xf32> to vector<2x1x8x36xf32>
    %173 = vector.broadcast %172 : vector<2x1x8x36xf32> to vector<2x8x8x36xf32>
    %174 = arith.mulf %171, %173 : vector<2x8x8x36xf32>
    %cst_65 = arith.constant dense<0.000000e+00> : vector<2x8x36xf32>
    %175 = vector.multi_reduction <add>, %174, %cst_65 [2] : vector<2x8x8x36xf32> to vector<2x8x36xf32>
    %176 = vector.shape_cast %175 : vector<2x8x36xf32> to vector<16x36xf32>
    %c1_66 = arith.constant 1 : index
    %c0_67 = arith.constant 0 : index
    %c0_68 = arith.constant 0 : index
    %177 = vector.load %arg8[%c1_66, %c0_67, %c0_68] : memref<2x36x36xf32, #tpu.memory_space<vmem>>, vector<1x36x36xf32>
    %178 = vector.shape_cast %177 : vector<1x36x36xf32> to vector<36x36xf32>
    %cst_69 = arith.constant dense<0.000000e+00> : vector<16x36xf32>
    %179 = tpu.matmul %176, %178, %cst_69 {dimension_numbers = #tpu.dot_dimension_numbers<[1], [0], [0], [1], [0, 0, 1, 1], [], []>} : vector<16x36xf32>, vector<36x36xf32>, vector<16x36xf32> -> vector<16x36xf32>
    %c1_70 = arith.constant 1 : index
    %c0_71 = arith.constant 0 : index
    %180 = vector.load %arg9[%c1_70, %c0_71] : memref<2x36xf32, #tpu.memory_space<vmem>>, vector<1x36xf32>
    %181 = vector.shape_cast %180 : vector<1x36xf32> to vector<36xf32>
    %182 = vector.shape_cast %181 : vector<36xf32> to vector<1x36xf32>
    %183 = vector.broadcast %182 : vector<1x36xf32> to vector<16x36xf32>
    %184 = arith.addf %179, %183 : vector<16x36xf32>
    %185 = arith.addf %139, %184 : vector<16x36xf32>
    %c1_72 = arith.constant 1 : index
    %c0_73 = arith.constant 0 : index
    %186 = vector.load %arg10[%c1_72, %c0_73] : memref<2x36xf32, #tpu.memory_space<vmem>>, vector<1x36xf32>
    %187 = vector.shape_cast %186 : vector<1x36xf32> to vector<36xf32>
    %c1_74 = arith.constant 1 : index
    %c0_75 = arith.constant 0 : index
    %188 = vector.load %arg11[%c1_74, %c0_75] : memref<2x36xf32, #tpu.memory_space<vmem>>, vector<1x36xf32>
    %189 = vector.shape_cast %188 : vector<1x36xf32> to vector<36xf32>
    %cst_76 = arith.constant dense<0.000000e+00> : vector<16xf32>
    %190 = vector.multi_reduction <add>, %185, %cst_76 [1] : vector<16x36xf32> to vector<16xf32>
    %191 = vector.shape_cast %190 : vector<16xf32> to vector<16x1xf32>
    %cst_77 = arith.constant 3.600000e+01 : f32
    %192 = vector.broadcast %cst_77 : f32 to vector<16x1xf32>
    %193 = arith.divf %191, %192 : vector<16x1xf32>
    %194 = arith.mulf %185, %185 : vector<16x36xf32>
    %cst_78 = arith.constant dense<0.000000e+00> : vector<16xf32>
    %195 = vector.multi_reduction <add>, %194, %cst_78 [1] : vector<16x36xf32> to vector<16xf32>
    %196 = vector.shape_cast %195 : vector<16xf32> to vector<16x1xf32>
    %cst_79 = arith.constant 3.600000e+01 : f32
    %197 = vector.broadcast %cst_79 : f32 to vector<16x1xf32>
    %198 = arith.divf %196, %197 : vector<16x1xf32>
    %199 = arith.mulf %193, %193 : vector<16x1xf32>
    %200 = arith.subf %198, %199 : vector<16x1xf32>
    %201 = vector.broadcast %193 : vector<16x1xf32> to vector<16x36xf32>
    %202 = arith.subf %185, %201 : vector<16x36xf32>
    %cst_80 = arith.constant 9.99999974E-6 : f32
    %203 = vector.broadcast %cst_80 : f32 to vector<16x1xf32>
    %204 = arith.addf %200, %203 : vector<16x1xf32>
    %205 = math.rsqrt %204 : vector<16x1xf32>
    %206 = vector.broadcast %205 : vector<16x1xf32> to vector<16x36xf32>
    %207 = arith.mulf %202, %206 : vector<16x36xf32>
    %208 = vector.shape_cast %187 : vector<36xf32> to vector<1x36xf32>
    %209 = vector.broadcast %208 : vector<1x36xf32> to vector<16x36xf32>
    %210 = arith.mulf %207, %209 : vector<16x36xf32>
    %211 = vector.shape_cast %189 : vector<36xf32> to vector<1x36xf32>
    %212 = vector.broadcast %211 : vector<1x36xf32> to vector<16x36xf32>
    %213 = arith.addf %210, %212 : vector<16x36xf32>
    %214 = arith.truncf %213 : vector<16x36xf32> to vector<16x36xbf16>
    %c1_81 = arith.constant 1 : index
    %c0_82 = arith.constant 0 : index
    %c0_83 = arith.constant 0 : index
    %215 = vector.load %arg12[%c1_81, %c0_82, %c0_83] : memref<2x36x2048xbf16, #tpu.memory_space<vmem>>, vector<1x36x2048xbf16>
    %216 = vector.shape_cast %215 : vector<1x36x2048xbf16> to vector<36x2048xbf16>
    %cst_84 = arith.constant dense<0.000000e+00> : vector<16x2048xf32>
    %217 = tpu.matmul %214, %216, %cst_84 {dimension_numbers = #tpu.dot_dimension_numbers<[1], [0], [0], [1], [0, 0, 1, 1], [], []>} : vector<16x36xbf16>, vector<36x2048xbf16>, vector<16x2048xf32> -> vector<16x2048xf32>
    %c1_85 = arith.constant 1 : index
    %c0_86 = arith.constant 0 : index
    %218 = vector.load %arg13[%c1_85, %c0_86] : memref<2x2048xf32, #tpu.memory_space<vmem>>, vector<1x2048xf32>
    %219 = vector.shape_cast %218 : vector<1x2048xf32> to vector<2048xf32>
    %220 = vector.shape_cast %219 : vector<2048xf32> to vector<1x2048xf32>
    %221 = vector.broadcast %220 : vector<1x2048xf32> to vector<16x2048xf32>
    %222 = arith.addf %217, %221 : vector<16x2048xf32>
    %cst_87 = arith.constant 0.000000e+00 : f32
    %223 = vector.broadcast %cst_87 : f32 to vector<16x2048xf32>
    %224 = arith.maximumf %222, %223 : vector<16x2048xf32>
    %225 = arith.truncf %224 : vector<16x2048xf32> to vector<16x2048xbf16>
    %c1_88 = arith.constant 1 : index
    %c0_89 = arith.constant 0 : index
    %c0_90 = arith.constant 0 : index
    %226 = vector.load %arg14[%c1_88, %c0_89, %c0_90] : memref<2x2048x36xbf16, #tpu.memory_space<vmem>>, vector<1x2048x36xbf16>
    %227 = vector.shape_cast %226 : vector<1x2048x36xbf16> to vector<2048x36xbf16>
    %cst_91 = arith.constant dense<0.000000e+00> : vector<16x36xf32>
    %228 = tpu.matmul %225, %227, %cst_91 {dimension_numbers = #tpu.dot_dimension_numbers<[1], [0], [0], [1], [0, 0, 1, 1], [], []>} : vector<16x2048xbf16>, vector<2048x36xbf16>, vector<16x36xf32> -> vector<16x36xf32>
    %c1_92 = arith.constant 1 : index
    %c0_93 = arith.constant 0 : index
    %229 = vector.load %arg15[%c1_92, %c0_93] : memref<2x36xf32, #tpu.memory_space<vmem>>, vector<1x36xf32>
    %230 = vector.shape_cast %229 : vector<1x36xf32> to vector<36xf32>
    %231 = vector.shape_cast %230 : vector<36xf32> to vector<1x36xf32>
    %232 = vector.broadcast %231 : vector<1x36xf32> to vector<16x36xf32>
    %233 = arith.addf %228, %232 : vector<16x36xf32>
    %234 = arith.addf %213, %233 : vector<16x36xf32>
    %c1_94 = arith.constant 1 : index
    %c0_95 = arith.constant 0 : index
    %235 = vector.load %arg16[%c1_94, %c0_95] : memref<2x36xf32, #tpu.memory_space<vmem>>, vector<1x36xf32>
    %236 = vector.shape_cast %235 : vector<1x36xf32> to vector<36xf32>
    %c1_96 = arith.constant 1 : index
    %c0_97 = arith.constant 0 : index
    %237 = vector.load %arg17[%c1_96, %c0_97] : memref<2x36xf32, #tpu.memory_space<vmem>>, vector<1x36xf32>
    %238 = vector.shape_cast %237 : vector<1x36xf32> to vector<36xf32>
    %cst_98 = arith.constant dense<0.000000e+00> : vector<16xf32>
    %239 = vector.multi_reduction <add>, %234, %cst_98 [1] : vector<16x36xf32> to vector<16xf32>
    %240 = vector.shape_cast %239 : vector<16xf32> to vector<16x1xf32>
    %cst_99 = arith.constant 3.600000e+01 : f32
    %241 = vector.broadcast %cst_99 : f32 to vector<16x1xf32>
    %242 = arith.divf %240, %241 : vector<16x1xf32>
    %243 = arith.mulf %234, %234 : vector<16x36xf32>
    %cst_100 = arith.constant dense<0.000000e+00> : vector<16xf32>
    %244 = vector.multi_reduction <add>, %243, %cst_100 [1] : vector<16x36xf32> to vector<16xf32>
    %245 = vector.shape_cast %244 : vector<16xf32> to vector<16x1xf32>
    %cst_101 = arith.constant 3.600000e+01 : f32
    %246 = vector.broadcast %cst_101 : f32 to vector<16x1xf32>
    %247 = arith.divf %245, %246 : vector<16x1xf32>
    %248 = arith.mulf %242, %242 : vector<16x1xf32>
    %249 = arith.subf %247, %248 : vector<16x1xf32>
    %250 = vector.broadcast %242 : vector<16x1xf32> to vector<16x36xf32>
    %251 = arith.subf %234, %250 : vector<16x36xf32>
    %cst_102 = arith.constant 9.99999974E-6 : f32
    %252 = vector.broadcast %cst_102 : f32 to vector<16x1xf32>
    %253 = arith.addf %249, %252 : vector<16x1xf32>
    %254 = math.rsqrt %253 : vector<16x1xf32>
    %255 = vector.broadcast %254 : vector<16x1xf32> to vector<16x36xf32>
    %256 = arith.mulf %251, %255 : vector<16x36xf32>
    %257 = vector.shape_cast %236 : vector<36xf32> to vector<1x36xf32>
    %258 = vector.broadcast %257 : vector<1x36xf32> to vector<16x36xf32>
    %259 = arith.mulf %256, %258 : vector<16x36xf32>
    %260 = vector.shape_cast %238 : vector<36xf32> to vector<1x36xf32>
    %261 = vector.broadcast %260 : vector<1x36xf32> to vector<16x36xf32>
    %262 = arith.addf %259, %261 : vector<16x36xf32>
    %263 = vector.shape_cast %262 : vector<16x36xf32> to vector<2x8x36xf32>
    %cst_103 = arith.constant dense<0.000000e+00> : vector<2x36xf32>
    %264 = vector.multi_reduction <add>, %263, %cst_103 [1] : vector<2x8x36xf32> to vector<2x36xf32>
    %cst_104 = arith.constant 8.000000e+00 : f32
    %265 = vector.broadcast %cst_104 : f32 to vector<2x36xf32>
    %266 = arith.divf %264, %265 : vector<2x36xf32>
    %cst_105 = arith.constant 0.000000e+00 : f32
    %267 = vector.broadcast %cst_105 : f32 to vector<2x92xf32>
    %268 = tpu.concatenate %266, %267 in 1 : vector<2x36xf32>, vector<2x92xf32> -> vector<2x128xf32>
    %c0_106 = arith.constant 0 : index
    %c0_107 = arith.constant 0 : index
    %269 = vector.load %arg18[%c0_106, %c0_107] : memref<2x128xf32, #tpu.memory_space<vmem>>, vector<2x128xf32>
    tpu.vector_store %arg18[%c0_106, %c0_107], %268 {strides = array<i32>} : memref<2x128xf32, #tpu.memory_space<vmem>>, vector<2x128xf32>,
    return
  }
  func.func @transform_0(%arg0: i32) -> (i32, i32, i32) {
    %c0_i32 = arith.constant 0 : i32
    %c0_i32_0 = arith.constant 0 : i32
    %c0_i32_1 = arith.constant 0 : i32
    return %arg0, %c0_i32, %c0_i32_0 : i32, i32, i32
  }
  func.func @transform_1(%arg0: i32) -> (i32, i32) {
    %c0_i32 = arith.constant 0 : i32
    %c0_i32_0 = arith.constant 0 : i32
    %c0_i32_1 = arith.constant 0 : i32
    return %c0_i32, %c0_i32_0 : i32, i32
  }
  func.func @transform_2(%arg0: i32) -> (i32, i32) {
    %c0_i32 = arith.constant 0 : i32
    %c0_i32_0 = arith.constant 0 : i32
    %c0_i32_1 = arith.constant 0 : i32
    return %c0_i32, %c0_i32_0 : i32, i32
  }
  func.func @transform_3(%arg0: i32) -> (i32, i32) {
    %c0_i32 = arith.constant 0 : i32
    %c0_i32_0 = arith.constant 0 : i32
    %c0_i32_1 = arith.constant 0 : i32
    return %c0_i32, %c0_i32_0 : i32, i32
  }
  func.func @transform_4(%arg0: i32) -> (i32, i32) {
    %c0_i32 = arith.constant 0 : i32
    %c0_i32_0 = arith.constant 0 : i32
    %c0_i32_1 = arith.constant 0 : i32
    return %c0_i32, %c0_i32_0 : i32, i32
  }
  func.func @transform_5(%arg0: i32) -> (i32, i32, i32) {
    %c0_i32 = arith.constant 0 : i32
    %c0_i32_0 = arith.constant 0 : i32
    %c0_i32_1 = arith.constant 0 : i32
    %c0_i32_2 = arith.constant 0 : i32
    return %c0_i32, %c0_i32_0, %c0_i32_1 : i32, i32, i32
  }
  func.func @transform_6(%arg0: i32) -> (i32, i32) {
    %c0_i32 = arith.constant 0 : i32
    %c0_i32_0 = arith.constant 0 : i32
    %c0_i32_1 = arith.constant 0 : i32
    return %c0_i32, %c0_i32_0 : i32, i32
  }
  func.func @transform_7(%arg0: i32) -> (i32, i32, i32) {
    %c0_i32 = arith.constant 0 : i32
    %c0_i32_0 = arith.constant 0 : i32
    %c0_i32_1 = arith.constant 0 : i32
    %c0_i32_2 = arith.constant 0 : i32
    return %c0_i32, %c0_i32_0, %c0_i32_1 : i32, i32, i32
  }
  func.func @transform_8(%arg0: i32) -> (i32, i32) {
    %c0_i32 = arith.constant 0 : i32
    %c0_i32_0 = arith.constant 0 : i32
    %c0_i32_1 = arith.constant 0 : i32
    return %c0_i32, %c0_i32_0 : i32, i32
  }
  func.func @transform_9(%arg0: i32) -> (i32, i32) {
    %c0_i32 = arith.constant 0 : i32
    %c0_i32_0 = arith.constant 0 : i32
    %c0_i32_1 = arith.constant 0 : i32
    return %c0_i32, %c0_i32_0 : i32, i32
  }
  func.func @transform_10(%arg0: i32) -> (i32, i32) {
    %c0_i32 = arith.constant 0 : i32
    %c0_i32_0 = arith.constant 0 : i32
    %c0_i32_1 = arith.constant 0 : i32
    return %c0_i32, %c0_i32_0 : i32, i32
  }
  func.func @transform_11(%arg0: i32) -> (i32, i32, i32) {
    %c0_i32 = arith.constant 0 : i32
    %c0_i32_0 = arith.constant 0 : i32
    %c0_i32_1 = arith.constant 0 : i32
    %c0_i32_2 = arith.constant 0 : i32
    return %c0_i32, %c0_i32_0, %c0_i32_1 : i32, i32, i32
  }
  func.func @transform_12(%arg0: i32) -> (i32, i32) {
    %c0_i32 = arith.constant 0 : i32
    %c0_i32_0 = arith.constant 0 : i32
    %c0_i32_1 = arith.constant 0 : i32
    return %c0_i32, %c0_i32_0 : i32, i32
  }
  func.func @transform_13(%arg0: i32) -> (i32, i32, i32) {
    %c0_i32 = arith.constant 0 : i32
    %c0_i32_0 = arith.constant 0 : i32
    %c0_i32_1 = arith.constant 0 : i32
    %c0_i32_2 = arith.constant 0 : i32
    return %c0_i32, %c0_i32_0, %c0_i32_1 : i32, i32, i32
  }
  func.func @transform_14(%arg0: i32) -> (i32, i32) {
    %c0_i32 = arith.constant 0 : i32
    %c0_i32_0 = arith.constant 0 : i32
    %c0_i32_1 = arith.constant 0 : i32
    return %c0_i32, %c0_i32_0 : i32, i32
  }
  func.func @transform_15(%arg0: i32) -> (i32, i32) {
    %c0_i32 = arith.constant 0 : i32
    %c0_i32_0 = arith.constant 0 : i32
    %c0_i32_1 = arith.constant 0 : i32
    return %c0_i32, %c0_i32_0 : i32, i32
  }
  func.func @transform_16(%arg0: i32) -> (i32, i32) {
    %c0_i32 = arith.constant 0 : i32
    %c0_i32_0 = arith.constant 0 : i32
    %c0_i32_1 = arith.constant 0 : i32
    return %c0_i32, %c0_i32_0 : i32, i32
  }
  func.func @transform_17(%arg0: i32) -> (i32, i32) {
    %c0_i32 = arith.constant 0 : i32
    %c0_i32_0 = arith.constant 0 : i32
    return %arg0, %c0_i32 : i32, i32
  }
}

</mosaic_0001>

<bundles_post_ra>
// kernel: tpu_custom_call.1
= control target key start
LH: loop header
LB: loop body
LE: loop exit
PB: predicated region body
PF: predicated region fallthrough
CT: control target
= control target key end

     0   :  { %s10643_s0 = inlined_call_operand.vmem [shape: f32[2,8,6], index: 0, kind: input, shape index: {}]   ;;  %s10644_s1 = inlined_call_operand.vmem [shape: f32[6,36], index: 1, kind: input, shape index: {}]   ;;  %s10645_s2 = inlined_call_operand.vmem [shape: f32[1,36], index: 2, kind: input, shape index: {}]   ;;  %s10646_s3 = inlined_call_operand.vmem [shape: f32[8,36], index: 3, kind: input, shape index: {}]   ;;  %s10647_s4 = inlined_call_operand.vmem [shape: f32[36,36], index: 4, kind: input, shape index: {}]   ;;  %s10648_s5 = inlined_call_operand.vmem [shape: f32[2,36,108], index: 5, kind: input, shape index: {}]   ;;  %s10649_s6 = inlined_call_operand.vmem [shape: f32[2,108], index: 6, kind: input, shape index: {}]   ;;  %s10650_s7 = inlined_call_operand.vmem [shape: f32[2,36,36], index: 7, kind: input, shape index: {}]   ;;  %s10651_s8 = inlined_call_operand.vmem [shape: f32[2,36], index: 8, kind: input, shape index: {}]   ;;  %s10652_s9 = inlined_call_operand.vmem [shape: f32[2,36], index: 9, kind: input, shape index: {}]   ;;  %s10653_s10 = inlined_call_operand.vmem [shape: f32[2,36], index: 10, kind: input, shape index: {}]   ;;  %s10654_s11 = inlined_call_operand.vmem [shape: bf16[2,36,2048], index: 11, kind: input, shape index: {}]   ;;  %s10655_s12 = inlined_call_operand.vmem [shape: f32[2,2048], index: 12, kind: input, shape index: {}]   ;;  %s10656_s13 = inlined_call_operand.vmem [shape: bf16[2,2048,36], index: 13, kind: input, shape index: {}]   ;;  %s10657_s14 = inlined_call_operand.vmem [shape: f32[2,36], index: 14, kind: input, shape index: {}]   ;;  %s10658_s15 = inlined_call_operand.vmem [shape: f32[2,36], index: 15, kind: input, shape index: {}]   ;;  %s10659_s16 = inlined_call_operand.vmem [shape: f32[2,36], index: 16, kind: input, shape index: {}]   ;;  %s10660_s17 = inlined_call_operand.hbm [shape: f32[2,128], index: 17, kind: output, shape index: {}]  }
   0x1   :  { %10662 = sst [smem:[#allocation5_spill]] %s10643_s0 }
   0x2   :  { %10663 = sst [smem:[#allocation6_spill]] %s10644_s1 }
   0x3   :  { %s10664_s26 = sld [smem:[#allocation6_spill]]  ;;  %vm75_vm0 = vcmask 1045504   ;;  %vm68_vm1 = vcmask 48128   ;;  %v168_v3 = vld [vmem:[%s10648_s5 + $0x20] sm:$0xf]  ;;  %vm181_vm2 = vcmask 1043456  }
   0x4   :  { %s10665_s29 = sld [smem:[#allocation5_spill]]  ;;  %v167_v4 = vld [vmem:[%s10648_s5 + $0x18] sm:$0xff]  ;;  %v166_v5 = vld [vmem:[%s10648_s5 + $0x10] sm:$0xff]  ;;  %v165_v6 = vld [vmem:[%s10648_s5 + $0x8] sm:$0xff] }
   0x5   :  { %v164_v7 = vld [vmem:[%s10648_s5] sm:$0xff] }
   0x9   :  { %v60_v0 = vld [vmem:[%s10664_s26] sm:$0x3f] }
   0xa   :  { %v58_v1 = vld [vmem:[%s10665_s29] sm:$0xff]  ;;  %v59_v2 = vld [vmem:[%s10665_s29 + $0x8] sm:$0xff]  ;;  %7936 = vmatprep.subr.msk.mxu1 %vm75_vm0, %v60_v0 }
   0xb   :  { %7938 = vmatprep.mubr.msk.f32.mxu1 %vm68_vm1, %v58_v1  ;;  %7937 = vmatpush3.msk.msra.mxu1 %vm75_vm0, %v60_v0 }
   0xc   :  { %7939 = vmatmul.mubr.msk.f32.vlgmr.msra.gmra.mxu1 %vm68_vm1, %v59_v2  ;;  %7941 = vmatprep.subr.msk.mxu1 %vm181_vm2, %v168_v3 }
   0xd   :  { %7942 = vmatpush3.msk.msra.mxu1 %vm181_vm2, %v168_v3 }
   0xe   :  { %7943 = vmatprep.subr.mxu1 %v167_v4 }
   0xf   :  { %7944 = vmatpush3.msra.mxu1 %v167_v4 }
  0x10   :  { %7945 = vmatprep.subr.mxu1 %v166_v5 }
  0x11   :  { %7946 = vmatpush3.msra.mxu1 %v166_v5 }
  0x12   :  { %7947 = vmatprep.subr.mxu1 %v165_v6 }
  0x13   :  { %7948 = vmatpush3.msra.mxu1 %v165_v6 }
  0x14   :  { %7949 = vmatprep.subr.mxu1 %v164_v7 }
  0x15   :  { %7950 = vmatpush3.msra.mxu1 %v164_v7 }
  0x16   :  { %22 = vsyncpa [#allocation3], 0  ;;  %v6754_v8 = vld [vmem:[%s10645_s2] ss:$0 sm:$0xff]  ;;  %vm174_vm3 = vcmask 293888   ;;  %v162_v19 = vld [vmem:[%s10647_s4 + $0x18] sm:$0xff]  ;;  %v266_v30 = vlaneseq }
  0x17   :  { %v156_v14 = vld [vmem:[%s10646_s3] sm:$0xff]  ;;  %v161_v20 = vld [vmem:[%s10647_s4 + $0x10] sm:$0xff]  ;;  %v160_v21 = vld [vmem:[%s10647_s4 + $0x8] sm:$0xff]  ;;  %s8529_s26 = smov 56   ;;  %s8530_s27 = smov 92   ;;  %vm1122_vm4 = vcmask 1041409  }
  0x18   :  { %v163_v18 = vld [vmem:[%s10647_s4 + $0x20] sm:$0xf]  ;;  %v8531_v28 = vmov 1966171168   ;;  %v8688_v32 = vshrl.u32 %v266_v30, 7  ;;  %vm1124_vm5 = vcmask 1042434  }
  0x19   :  { %7954 = vmatprep.subr.msk.mxu0 %vm181_vm2, %v163_v18  ;;  %v159_v22 = vld [vmem:[%s10647_s4] sm:$0xff]  ;;  %v264_v29 = vunpack.c.l.s4 %v8531_v28  ;;  %vm1126_vm6 = vcmask 1043459   ;;  %vm1128_vm7 = vcmask 1044484   ;;  %vm1130_vm8 = vcmask 1045509  }
  0x1a   :  { %7955 = vmatpush3.msk.msra.mxu0 %vm181_vm2, %v163_v18  ;;  %v6758_v24 = vld [vmem:[%s10649_s6] ss:$0 sm:$0xff]  ;;  %v8698_v40 = vsub.s32 0, %v8688_v32  ;;  %vm1132_vm9 = vcmask 1046534   ;;  %vm1134_vm10 = vcmask 1047559   ;;  %vm1601_vm11 = vcmask 1041408  }
  0x1b   :  { %7956 = vmatprep.subr.mxu0 %v162_v19  ;;  %v265_v31 = vunpack.c.0.s8 %v264_v29 }
  0x1c   :  { %7957 = vmatpush3.msra.mxu0 %v162_v19 }
  0x1d   :  { %7958 = vmatprep.subr.mxu0 %v161_v20  ;;  %v8691_v33 = vsub.s32 %v265_v31, %v8688_v32 }
  0x1e   :  { %7959 = vmatpush3.msra.mxu0 %v161_v20 }
  0x1f   :  { %7960 = vmatprep.subr.mxu0 %v160_v21 }
  0x20   :  { %7961 = vmatpush3.msra.mxu0 %v160_v21 }
  0x21   :  { %7962 = vmatprep.subr.mxu0 %v159_v22 }
  0x22   :  { %7963 = vmatpush3.msra.mxu0 %v159_v22 }
  0xcc   :  { %v7940_v9 = vpop.f32.mrf.mxu1 }
  0xcd   :  { %v151_v10 = vadd.f32 %v7940_v9, %v6754_v8 }
  0xce   :  { %v145_v11 = vpop.f32.mrf.mxu1 }
  0xcf   :  { %v146_v12 = vadd.f32 %v6754_v8, %v145_v11  ;;  %8354 = vtanh.f32 %v151_v10 }
  0xd1   :  { %8356 = vtanh.f32 %v146_v12 }
  0xdc   :  { %v8355_v13 = vpop.eup %8354 }
  0xdd   :  { %v8658_v17 = vadd.f32 %v8355_v13, %v156_v14 }
  0xde   :  { %v8357_v15 = vpop.eup %8356 }
  0xdf   :  { %v8656_v16 = vadd.f32 %v8357_v15, %v156_v14 }
  0xe1   :  { %7951 = vmatprep.mubr.msk.f32.mxu1 %vm174_vm3, %v8656_v16 }
  0xe2   :  { %7952 = vmatmul.mubr.msk.f32.vlgmr.msra.gmra.mxu1 %vm174_vm3, %v8658_v17 }
 0x1a2   :  { %v7953_v23 = vpop.f32.mrf.mxu1 }
 0x1a3   :  { %v257_v27 = vadd.f32 %v7953_v23, %v6758_v24 }
 0x1a4   :  { %v251_v25 = vpop.f32.mrf.mxu1 }
 0x1a5   :  { %v252_v26 = vadd.f32 %v6758_v24, %v251_v25  ;;  %v318_v52 = vrot.slane %v257_v27, %v8691_v33  ;;  %v311_v59 = vcombine.high %v257_v27, %v257_v27 }
 0x1a7   :  { %962 = vrot.lane.b32.xlu1 %v252_v26, %s8529_s26  ;;  %440 = vrot.lane.b32.xlu0 %v252_v26, %s8530_s27  ;;  %v269_v34 = vrot.slane %v252_v26, %v8691_v33  ;;  %v262_v36 = vcombine.high %v252_v26, %v252_v26  ;;  %v326_v60 = vcombine.high %v318_v52, %v318_v52 }
 0x1a8   :  { %v334_v63 = vrot.slane %v318_v52, %v8691_v33  ;;  %v325_v3 = vrot.slane %v311_v59, %v8691_v33 }
 0x1a9   :  { %v277_v35 = vcombine.high %v269_v34, %v269_v34  ;;  %v285_v37 = vrot.slane %v269_v34, %v8691_v33  ;;  %v276_v39 = vrot.slane %v262_v36, %v8691_v33  ;;  %v348_v6 = vrot.slane %v326_v60, %v8691_v33 }
 0x1aa   :  { %v395_v7 = vrot.slane %v334_v63, %v8698_v40  ;;  %v356_v8 = vcombine.high %v334_v63, %v334_v63  ;;  %v327_v11 = vcombine.high %v325_v3, %v325_v3  ;;  %v341_v15 = vrot.slane %v325_v3, %v8691_v33 }
 0x1ab   :  { %964 = vrot.lane.b32.xlu1 %v257_v27, %s8529_s26  ;;  %442 = vrot.lane.b32.xlu0 %v257_v27, %s8530_s27  ;;  %v299_v38 = vrot.slane %v277_v35, %v8691_v33  ;;  %v307_v41 = vcombine.high %v285_v37, %v285_v37  ;;  %v363_v42 = vrot.slane %v285_v37, %v8698_v40 }
 0x1ac   :  { %v278_v44 = vcombine.high %v276_v39, %v276_v39  ;;  %v292_v50 = vrot.slane %v276_v39, %v8691_v33  ;;  %v399_v12 = vrot.slane %v348_v6, %v8698_v40  ;;  %v358_v13 = vcombine.high %v348_v6, %v348_v6 }
 0x1ad   :  { %v367_v43 = vrot.slane %v299_v38, %v8698_v40  ;;  %v309_v46 = vcombine.high %v299_v38, %v299_v38  ;;  %v371_v49 = vrot.slane %v307_v41, %v8698_v40  ;;  %v403_v14 = vrot.slane %v356_v8, %v8698_v40 }
 0x1ae   :  { %v306_v54 = vrot.slane %v278_v44, %v8691_v33  ;;  %v379_v55 = vrot.slane %v292_v50, %v8698_v40  ;;  %v308_v56 = vcombine.high %v292_v50, %v292_v50  ;;  %v407_v20 = vrot.slane %v358_v13, %v8698_v40  ;;  %v1100_v50 = vld [vmem:[%s10650_s7 + $0x20] sm:$0xf] }
 0x1af   :  { %v375_v53 = vrot.slane %v309_v46, %v8698_v40  ;;  %v355_v21 = vrot.slane %v327_v11, %v8691_v33  ;;  %v411_v22 = vrot.slane %v341_v15, %v8698_v40  ;;  %v357_v23 = vcombine.high %v341_v15, %v341_v15  ;;  %7988 = vmatprep.subr.msk.mxu1 %vm181_vm2, %v1100_v50  ;;  %v1096_v11 = vld [vmem:[%s10650_s7] sm:$0xff] }
 0x1b0   :  { %v383_v61 = vrot.slane %v306_v54, %v8698_v40  ;;  %v310_v62 = vcombine.high %v306_v54, %v306_v54  ;;  %v387_v0 = vrot.slane %v308_v56, %v8698_v40  ;;  %7989 = vmatpush3.msk.msra.mxu1 %vm181_vm2, %v1100_v50 }
 0x1b1   :  { %v415_v26 = vrot.slane %v355_v21, %v8698_v40  ;;  %v359_v27 = vcombine.high %v355_v21, %v355_v21  ;;  %v419_v28 = vrot.slane %v357_v23, %v8698_v40 }
 0x1b2   :  { %v391_v5 = vrot.slane %v310_v62, %v8698_v40 }
 0x1b3   :  { %v423_v31 = vrot.slane %v359_v27, %v8698_v40 }
 0x219   :  { %v441_v45 = vpop.permute.xlu0 %440 }
 0x21a   :  { %v446_v47 = vmul.f32 %v441_v45, %v363_v42  ;;  %v447_v48 = vmul.f32 %v441_v45, %v367_v43  ;;  %v448_v51 = vmul.f32 %v441_v45, %v371_v49  ;;  %v449_v57 = vmul.f32 %v441_v45, %v375_v53 }
 0x21b   :  { %v450_v58 = vmul.f32 %v441_v45, %v379_v55  ;;  %v451_v1 = vmul.f32 %v441_v45, %v383_v61  ;;  %v452_v2 = vmul.f32 %v441_v45, %v387_v0  ;;  %v453_v9 = vmul.f32 %v441_v45, %v391_v5 }
 0x21c   :  { %7964 = vmatprep.mubr.msk.f32.mxu0 %vm174_vm3, %v446_v47 }
 0x21d   :  { %7965 = vmatmul.mubr.msk.f32.vlgmr.msra.gmra.mxu0 %vm174_vm3, %v447_v48  ;;  %v443_v4 = vpop.permute.xlu0 %442 }
 0x21e   :  { %7967 = vmatprep.mubr.msk.f32.mxu0 %vm174_vm3, %v448_v51  ;;  %v454_v10 = vmul.f32 %v443_v4, %v395_v7  ;;  %v455_v18 = vmul.f32 %v443_v4, %v399_v12  ;;  %v456_v19 = vmul.f32 %v443_v4, %v403_v14  ;;  %v457_v24 = vmul.f32 %v443_v4, %v407_v20  ;;  %v1099_v51 = vld [vmem:[%s10650_s7 + $0x18] sm:$0xff] }
 0x21f   :  { %v458_v25 = vmul.f32 %v443_v4, %v411_v22  ;;  %v459_v29 = vmul.f32 %v443_v4, %v415_v26  ;;  %v460_v30 = vmul.f32 %v443_v4, %v419_v28  ;;  %v461_v34 = vmul.f32 %v443_v4, %v423_v31  ;;  %7990 = vmatprep.subr.mxu1 %v1099_v51 }
 0x220   :  { %7991 = vmatpush3.msra.mxu1 %v1099_v51 }
 0x221   :  { %7968 = vmatmul.mubr.msk.f32.gmra.mxu0 %vm174_vm3, %v449_v57 }
 0x222   :  { %7970 = vmatprep.mubr.msk.f32.mxu0 %vm174_vm3, %v450_v58  ;;  %v1098_v58 = vld [vmem:[%s10650_s7 + $0x10] sm:$0xff] }
 0x223   :  { %7992 = vmatprep.subr.mxu1 %v1098_v58 }
 0x224   :  { %7993 = vmatpush3.msra.mxu1 %v1098_v58 }
 0x225   :  { %7971 = vmatmul.mubr.msk.f32.gmra.mxu0 %vm174_vm3, %v451_v1 }
 0x226   :  { %7973 = vmatprep.mubr.msk.f32.mxu0 %vm174_vm3, %v452_v2  ;;  %v1097_v2 = vld [vmem:[%s10650_s7 + $0x8] sm:$0xff] }
 0x227   :  { %7994 = vmatprep.subr.mxu1 %v1097_v2 }
 0x228   :  { %7995 = vmatpush3.msra.mxu1 %v1097_v2 }
 0x229   :  { %7974 = vmatmul.mubr.msk.f32.gmra.mxu0 %vm174_vm3, %v453_v9  ;;  %7996 = vmatprep.subr.mxu1 %v1096_v11 }
 0x22a   :  { %7976 = vmatprep.mubr.msk.f32.mxu0 %vm174_vm3, %v454_v10  ;;  %7997 = vmatpush3.msra.mxu1 %v1096_v11 }
 0x22d   :  { %7977 = vmatmul.mubr.msk.f32.gmra.mxu0 %vm174_vm3, %v455_v18 }
 0x22e   :  { %7979 = vmatprep.mubr.msk.f32.mxu0 %vm174_vm3, %v456_v19 }
 0x231   :  { %7980 = vmatmul.mubr.msk.f32.gmra.mxu0 %vm174_vm3, %v457_v24 }
 0x232   :  { %7982 = vmatprep.mubr.msk.f32.mxu0 %vm174_vm3, %v458_v25 }
 0x235   :  { %7983 = vmatmul.mubr.msk.f32.gmra.mxu0 %vm174_vm3, %v459_v29 }
 0x236   :  { %7985 = vmatprep.mubr.msk.f32.mxu0 %vm174_vm3, %v460_v30 }
 0x239   :  { %7986 = vmatmul.mubr.msk.f32.gmra.mxu0 %vm174_vm3, %v461_v34 }
 0x2dd   :  { %v7966_v35 = vpop.f32.mrf.mxu0 }
 0x2de   :  { %v665_v36 = vsel %vm174_vm3, %v7966_v35, -inf }
 0x2df   :  { %v666_v37 = vrot.slane %v665_v36, 4  ;;  %v8741_v38 = vpop.f32.mrf.mxu0 }
 0x2e0   :  { %v658_v39 = vsel %vm174_vm3, %v8741_v38, -inf }
 0x2e1   :  { %v667_v41 = vmax.f32 %v665_v36, %v666_v37  ;;  %v659_v42 = vrot.slane %v658_v39, 4  ;;  %v8745_v43 = vpop.f32.mrf.mxu0 }
 0x2e2   :  { %v679_v44 = vsel %vm174_vm3, %v8745_v43, -inf }
 0x2e3   :  { %v668_v45 = vrot.slane %v667_v41, 2  ;;  %v660_v46 = vmax.f32 %v658_v39, %v659_v42  ;;  %v680_v47 = vrot.slane %v679_v44, 4  ;;  %v8749_v48 = vpop.f32.mrf.mxu0 }
 0x2e4   :  { %v672_v49 = vsel %vm174_vm3, %v8749_v48, -inf }
 0x2e5   :  { %v669_v52 = vmax.f32 %v667_v41, %v668_v45  ;;  %v661_v53 = vrot.slane %v660_v46, 2  ;;  %v681_v54 = vmax.f32 %v679_v44, %v680_v47  ;;  %v673_v55 = vrot.slane %v672_v49, 4  ;;  %v8759_v56 = vpop.f32.mrf.mxu0 }
 0x2e6   :  { %v693_v57 = vsel %vm174_vm3, %v8759_v56, -inf }
 0x2e7   :  { %v670_v59 = vrot.slane %v669_v52, 1  ;;  %v662_v60 = vmax.f32 %v660_v46, %v661_v53  ;;  %v682_v61 = vrot.slane %v681_v54, 2  ;;  %v674_v62 = vmax.f32 %v672_v49, %v673_v55  ;;  %v8768_v63 = vpop.f32.mrf.mxu0 }
 0x2e8   :  { %v694_v0 = vrot.slane %v693_v57, 4  ;;  %v686_v1 = vsel %vm174_vm3, %v8768_v63, -inf }
 0x2e9   :  { %v671_v3 = vmax.f32 %v669_v52, %v670_v59  ;;  %v663_v4 = vrot.slane %v662_v60, 1  ;;  %v683_v5 = vmax.f32 %v681_v54, %v682_v61  ;;  %v675_v6 = vrot.slane %v674_v62, 2  ;;  %v8775_v7 = vpop.f32.mrf.mxu0 }
 0x2ea   :  { %v695_v8 = vmax.f32 %v693_v57, %v694_v0  ;;  %v687_v9 = vrot.slane %v686_v1, 4  ;;  %v707_v10 = vsel %vm174_vm3, %v8775_v7, -inf }
 0x2eb   :  { %v771_v12 = vsub.f32 %v7966_v35, %v671_v3  ;;  %v664_v13 = vmax.f32 %v662_v60, %v663_v4  ;;  %v684_v14 = vrot.slane %v683_v5, 1  ;;  %v676_v15 = vmax.f32 %v674_v62, %v675_v6  ;;  %v8782_v18 = vpop.f32.mrf.mxu0 }
 0x2ec   :  { %v696_v19 = vrot.slane %v695_v8, 2  ;;  %v688_v20 = vmax.f32 %v686_v1, %v687_v9  ;;  %v708_v21 = vrot.slane %v707_v10, 4  ;;  %v700_v22 = vsel %vm174_vm3, %v8782_v18, -inf }
 0x2ed   :  { %v788_v23 = vmul.f32 1.442695, %v771_v12  ;;  %v770_v24 = vsub.f32 %v8741_v38, %v664_v13  ;;  %v685_v25 = vmax.f32 %v683_v5, %v684_v14  ;;  %v677_v26 = vrot.slane %v676_v15, 1  ;;  %v8787_v27 = vpop.f32.mrf.mxu0 }
 0x2ee   :  { %v697_v28 = vmax.f32 %v695_v8, %v696_v19  ;;  %v689_v29 = vrot.slane %v688_v20, 2  ;;  %v709_v30 = vmax.f32 %v707_v10, %v708_v21  ;;  %v701_v31 = vrot.slane %v700_v22, 4 }
 0x2ef   :  { %8358 = vpow2.f32 %v788_v23  ;;  %v786_v34 = vmul.f32 1.442695, %v770_v24  ;;  %v773_v35 = vsub.f32 %v8745_v43, %v685_v25  ;;  %v678_v36 = vmax.f32 %v676_v15, %v677_v26  ;;  %v8790_v37 = vpop.f32.mrf.mxu0 }
 0x2f0   :  { %v698_v39 = vrot.slane %v697_v28, 1  ;;  %v690_v41 = vmax.f32 %v688_v20, %v689_v29  ;;  %v710_v38 = vrot.slane %v709_v30, 2  ;;  %v702_v42 = vmax.f32 %v700_v22, %v701_v31 }
 0x2f1   :  { %8360 = vpow2.f32 %v786_v34  ;;  %v792_v44 = vmul.f32 1.442695, %v773_v35  ;;  %v772_v45 = vsub.f32 %v8749_v48, %v678_v36  ;;  %v721_v46 = vsel %vm174_vm3, %v8787_v27, -inf  ;;  %v8795_v47 = vpop.f32.mrf.mxu0 }
 0x2f2   :  { %v699_v49 = vmax.f32 %v697_v28, %v698_v39  ;;  %v691_v50 = vrot.slane %v690_v41, 1  ;;  %v711_v51 = vmax.f32 %v709_v30, %v710_v38  ;;  %v703_v43 = vrot.slane %v702_v42, 2 }
 0x2f3   :  { %8362 = vpow2.f32 %v792_v44  ;;  %v790_v52 = vmul.f32 1.442695, %v772_v45  ;;  %v722_v53 = vrot.slane %v721_v46, 4  ;;  %v714_v54 = vsel %vm174_vm3, %v8790_v37, -inf  ;;  %v8799_v55 = vpop.f32.mrf.mxu0 }
 0x2f4   :  { %v775_v57 = vsub.f32 %v8759_v56, %v699_v49  ;;  %v692_v48 = vmax.f32 %v690_v41, %v691_v50  ;;  %v712_v58 = vrot.slane %v711_v51, 1  ;;  %v704_v59 = vmax.f32 %v702_v42, %v703_v43 }
 0x2f5   :  { %8364 = vpow2.f32 %v790_v52  ;;  %v723_v60 = vmax.f32 %v721_v46, %v722_v53  ;;  %v715_v61 = vrot.slane %v714_v54, 4  ;;  %v735_v62 = vsel %vm174_vm3, %v8795_v47, -inf  ;;  %v8804_v0 = vpop.f32.mrf.mxu0 }
 0x2f6   :  { %v796_v1 = vmul.f32 1.442695, %v775_v57  ;;  %v774_v2 = vsub.f32 %v8768_v63, %v692_v48  ;;  %v713_v3 = vmax.f32 %v711_v51, %v712_v58  ;;  %v705_v4 = vrot.slane %v704_v59, 1 }
 0x2f7   :  { %v724_v5 = vrot.slane %v723_v60, 2  ;;  %v716_v6 = vmax.f32 %v714_v54, %v715_v61  ;;  %v736_v8 = vrot.slane %v735_v62, 4  ;;  %v728_v56 = vsel %vm174_vm3, %v8799_v55, -inf  ;;  %v8810_v19 = vpop.f32.mrf.mxu0 }
 0x2f8   :  { %8366 = vpow2.f32 %v796_v1  ;;  %v794_v9 = vmul.f32 1.442695, %v774_v2  ;;  %v777_v10 = vsub.f32 %v8775_v7, %v713_v3  ;;  %v706_v11 = vmax.f32 %v704_v59, %v705_v4 }
 0x2f9   :  { %v725_v12 = vmax.f32 %v723_v60, %v724_v5  ;;  %v717_v13 = vrot.slane %v716_v6, 2  ;;  %v737_v14 = vmax.f32 %v735_v62, %v736_v8  ;;  %v729_v15 = vrot.slane %v728_v56, 4 }
 0x2fa   :  { %8368 = vpow2.f32 %v794_v9  ;;  %v800_v63 = vmul.f32 1.442695, %v777_v10  ;;  %v776_v20 = vsub.f32 %v8782_v18, %v706_v11  ;;  %v749_v21 = vsel %vm174_vm3, %v8804_v0, -inf }
 0x2fb   :  { %v726_v22 = vrot.slane %v725_v12, 1  ;;  %v718_v23 = vmax.f32 %v716_v6, %v717_v13  ;;  %v738_v24 = vrot.slane %v737_v14, 2  ;;  %v730_v25 = vmax.f32 %v728_v56, %v729_v15 }
 0x2fc   :  { %v8815_v26 = vpop.eup %8358  ;;  %8370 = vpow2.f32 %v800_v63  ;;  %v798_v7 = vmul.f32 1.442695, %v776_v20  ;;  %v750_v28 = vrot.slane %v749_v21, 4  ;;  %v8819_v29 = vsel %vm174_vm3, %v8810_v19, -inf }
 0x2fd   :  { %v825_v30 = vsel %vm174_vm3, %v8815_v26, 0.0  ;;  %v727_v18 = vmax.f32 %v725_v12, %v726_v22  ;;  %v719_v31 = vrot.slane %v718_v23, 1  ;;  %v739_v34 = vmax.f32 %v737_v14, %v738_v24 }
 0x2fe   :  { %v8823_v35 = vpop.eup %8360  ;;  %v826_v36 = vrot.slane %v825_v30, 4  ;;  %8372 = vpow2.f32 %v798_v7  ;;  %v731_v39 = vrot.slane %v730_v25, 2  ;;  %v751_v41 = vmax.f32 %v749_v21, %v750_v28 }
 0x2ff   :  { %v818_v38 = vsel %vm174_vm3, %v8823_v35, 0.0  ;;  %v779_v42 = vsub.f32 %v8787_v27, %v727_v18  ;;  %v720_v44 = vmax.f32 %v718_v23, %v719_v31  ;;  %v740_v45 = vrot.slane %v739_v34, 1 }
 0x300   :  { %v8828_v46 = vpop.eup %8362  ;;  %v827_v49 = vadd.f32 %v826_v36, %v825_v30  ;;  %v819_v50 = vrot.slane %v818_v38, 4  ;;  %v732_v51 = vmax.f32 %v730_v25, %v731_v39  ;;  %v752_v43 = vrot.slane %v751_v41, 2 }
 0x301   :  { %v839_v52 = vsel %vm174_vm3, %v8828_v46, 0.0  ;;  %v804_v53 = vmul.f32 1.442695, %v779_v42  ;;  %v778_v54 = vsub.f32 %v8790_v37, %v720_v44  ;;  %v741_v57 = vmax.f32 %v739_v34, %v740_v45 }
 0x302   :  { %v8833_v48 = vpop.eup %8364  ;;  %v828_v58 = vrot.slane %v827_v49, 2  ;;  %v820_v59 = vadd.f32 %v819_v50, %v818_v38  ;;  %v840_v27 = vrot.slane %v839_v52, 4  ;;  %v733_v60 = vrot.slane %v732_v51, 1 }
 0x303   :  { %v832_v61 = vsel %vm174_vm3, %v8833_v48, 0.0  ;;  %8374 = vpow2.f32 %v804_v53  ;;  %v802_v62 = vmul.f32 1.442695, %v778_v54  ;;  %v781_v1 = vsub.f32 %v8795_v47, %v741_v57 }
 0x304   :  { %v829_v2 = vadd.f32 %v828_v58, %v827_v49  ;;  %v821_v3 = vrot.slane %v820_v59, 2  ;;  %v841_v4 = vadd.f32 %v840_v27, %v839_v52  ;;  %v833_v5 = vrot.slane %v832_v61, 4 }
 0x305   :  { %v8838_v6 = vpop.eup %8366  ;;  %8376 = vpow2.f32 %v802_v62  ;;  %v808_v37 = vmul.f32 1.442695, %v781_v1  ;;  %v734_v8 = vmax.f32 %v732_v51, %v733_v60  ;;  %v753_v56 = vmax.f32 %v751_v41, %v752_v43 }
 0x306   :  { %v830_v9 = vrot.slane %v829_v2, 1  ;;  %v822_v10 = vadd.f32 %v821_v3, %v820_v59  ;;  %v842_v11 = vrot.slane %v841_v4, 2  ;;  %v834_v12 = vadd.f32 %v833_v5, %v832_v61 }
 0x307   :  { %v8840_v13 = vpop.eup %8368  ;;  %v853_v14 = vsel %vm174_vm3, %v8838_v6, 0.0  ;;  %8378 = vpow2.f32 %v808_v37  ;;  %v780_v47 = vsub.f32 %v8799_v55, %v734_v8  ;;  %v754_v15 = vrot.slane %v753_v56, 1 }
 0x308   :  { %v831_v63 = vadd.f32 %v830_v9, %v829_v2  ;;  %v823_v20 = vrot.slane %v822_v10, 1  ;;  %v843_v21 = vadd.f32 %v842_v11, %v841_v4  ;;  %v835_v22 = vrot.slane %v834_v12, 2 }
 0x309   :  { %v8845_v23 = vpop.eup %8370  ;;  %v854_v24 = vrot.slane %v853_v14, 4  ;;  %v846_v25 = vsel %vm174_vm3, %v8840_v13, 0.0  ;;  %v806_v7 = vmul.f32 1.442695, %v780_v47  ;;  %v755_v28 = vmax.f32 %v753_v56, %v754_v15  ;;  %v8868_v47 = vpop.f32.mrf.mxu0 }
 0x30a   :  { %8380 = vrcp.f32 %v831_v63  ;;  %v824_v30 = vadd.f32 %v823_v20, %v822_v10  ;;  %v844_v18 = vrot.slane %v843_v21, 1  ;;  %v836_v31 = vadd.f32 %v835_v22, %v834_v12 }
 0x30b   :  { %v8849_v34 = vpop.eup %8372  ;;  %v855_v55 = vadd.f32 %v854_v24, %v853_v14  ;;  %v847_v36 = vrot.slane %v846_v25, 4  ;;  %v867_v39 = vsel %vm174_vm3, %v8845_v23, 0.0  ;;  %8382 = vpow2.f32 %v806_v7 }
 0x30c   :  { %8384 = vrcp.f32 %v824_v30  ;;  %v845_v41 = vadd.f32 %v844_v18, %v843_v21  ;;  %v837_v38 = vrot.slane %v836_v31, 1  ;;  %v868_v42 = vrot.slane %v867_v39, 4 }
 0x30d   :  { %v856_v44 = vrot.slane %v855_v55, 2  ;;  %v848_v45 = vadd.f32 %v847_v36, %v846_v25  ;;  %v860_v49 = vsel %vm174_vm3, %v8849_v34, 0.0  ;;  %v783_v50 = vsub.f32 %v8804_v0, %v755_v28 }
 0x30e   :  { %8386 = vrcp.f32 %v845_v41  ;;  %v838_v51 = vadd.f32 %v837_v38, %v836_v31  ;;  %v869_v43 = vadd.f32 %v868_v42, %v867_v39  ;;  %v861_v52 = vrot.slane %v860_v49, 4 }
 0x30f   :  { %v857_v53 = vadd.f32 %v856_v44, %v855_v55  ;;  %v849_v54 = vrot.slane %v848_v45, 2  ;;  %v743_v57 = vrot.slane %v8819_v29, 4  ;;  %v812_v27 = vmul.f32 1.442695, %v783_v50 }
 0x310   :  { %v8857_v58 = vpop.eup %8374  ;;  %8388 = vrcp.f32 %v838_v51  ;;  %v862_v59 = vadd.f32 %v861_v52, %v860_v49  ;;  %v870_v0 = vrot.slane %v869_v43, 2  ;;  %v763_v25 = vsel %vm174_vm3, %v8868_v47, -inf  ;;  %v8882_v51 = vpop.permute.xlu1 %962 }
 0x311   :  { %v858_v60 = vrot.slane %v857_v53, 1  ;;  %v850_v61 = vadd.f32 %v849_v54, %v848_v45  ;;  %v881_v62 = vsel %vm174_vm3, %v8857_v58, 0.0  ;;  %v744_v3 = vmax.f32 %v8819_v29, %v743_v57 }
 0x312   :  { %v8861_v1 = vpop.eup %8376  ;;  %v863_v2 = vrot.slane %v862_v59, 2  ;;  %v882_v5 = vrot.slane %v881_v62, 4  ;;  %8390 = vpow2.f32 %v812_v27  ;;  %v871_v12 = vadd.f32 %v870_v0, %v869_v43 }
 0x313   :  { %v851_v4 = vrot.slane %v850_v61, 1  ;;  %v859_v8 = vadd.f32 %v858_v60, %v857_v53  ;;  %v874_v10 = vsel %vm174_vm3, %v8861_v1, 0.0  ;;  %v745_v11 = vrot.slane %v744_v3, 2 }
 0x314   :  { %v8864_v37 = vpop.eup %8378  ;;  %v864_v56 = vadd.f32 %v863_v2, %v862_v59  ;;  %v883_v63 = vadd.f32 %v882_v5, %v881_v62  ;;  %v875_v22 = vrot.slane %v874_v10, 4  ;;  %v872_v7 = vrot.slane %v871_v12, 1 }
 0x315   :  { %v852_v9 = vadd.f32 %v851_v4, %v850_v61  ;;  %v746_v29 = vmax.f32 %v744_v3, %v745_v11  ;;  %v895_v18 = vsel %vm174_vm3, %v8864_v37, 0.0  ;;  %v764_v41 = vrot.slane %v763_v25, 4 }
 0x316   :  { %v865_v14 = vrot.slane %v864_v56, 1  ;;  %v884_v30 = vrot.slane %v883_v63, 2  ;;  %v876_v39 = vadd.f32 %v875_v22, %v874_v10  ;;  %v896_v49 = vrot.slane %v895_v18, 4 }
 0x317   :  { %v8381_v15 = vpop.eup %8380  ;;  %8392 = vrcp.f32 %v852_v9  ;;  %v747_v55 = vrot.slane %v746_v29, 1  ;;  %v873_v43 = vadd.f32 %v872_v7, %v871_v12 }
 0x318   :  { %v8870_v20 = vpop.eup %8382  ;;  %8394 = vrcp.f32 %v859_v8  ;;  %v866_v21 = vadd.f32 %v865_v14, %v864_v56  ;;  %v947_v42 = vmul.f32 %v8381_v15, %v8815_v26  ;;  %v885_v52 = vadd.f32 %v884_v30, %v883_v63  ;;  %v8894_v8 = vpop.f32.mrf.mxu0 }
 0x319   :  { %v8385_v24 = vpop.eup %8384  ;;  %v888_v31 = vsel %vm174_vm3, %v8870_v20, 0.0  ;;  %v748_v53 = vmax.f32 %v746_v29, %v747_v55  ;;  %v877_v57 = vrot.slane %v876_v39, 2 }
 0x31a   :  { %8396 = vrcp.f32 %v866_v21  ;;  %v946_v36 = vmul.f32 %v8385_v24, %v8823_v35  ;;  %v889_v50 = vrot.slane %v888_v31, 4  ;;  %v765_v35 = vmax.f32 %v763_v25, %v764_v41 }
 0x31b   :  { %v8387_v28 = vpop.eup %8386  ;;  %v969_v27 = vmul.f32 %v8882_v51, %v947_v42  ;;  %8398 = vrcp.f32 %v873_v43  ;;  %v886_v61 = vrot.slane %v885_v52, 1  ;;  %v782_v62 = vsub.f32 %v8810_v19, %v748_v53 }
 0x31c   :  { %v949_v44 = vmul.f32 %v8387_v28, %v8828_v46  ;;  %v968_v54 = vmul.f32 %v8882_v51, %v946_v36  ;;  %v890_v60 = vadd.f32 %v889_v50, %v888_v31  ;;  %v878_v3 = vadd.f32 %v877_v57, %v876_v39 }
 0x31d   :  { %v8389_v38 = vpop.eup %8388  ;;  %v766_v5 = vrot.slane %v765_v35, 2  ;;  %v991_v9 = vsel %vm174_vm3, %v969_v27, 0.0  ;;  %v810_v12 = vmul.f32 1.442695, %v782_v62  ;;  %v756_v24 = vsel %vm174_vm3, %v8894_v8, -inf }
 0x31e   :  { %v948_v45 = vmul.f32 %v8389_v38, %v8833_v48  ;;  %v971_v46 = vmul.f32 %v8882_v51, %v949_v44  ;;  %v897_v48 = vadd.f32 %v896_v49, %v895_v18  ;;  %v984_v2 = vsel %vm174_vm3, %v968_v54, 0.0 }
 0x31f   :  { %v8885_v59 = vpop.eup %8390  ;;  %v891_v15 = vrot.slane %v890_v60, 2  ;;  %v767_v63 = vmax.f32 %v765_v35, %v766_v5  ;;  %v985_v21 = vrot.slane %v984_v2, 4  ;;  %8400 = vpow2.f32 %v810_v12 }
 0x320   :  { %v970_v26 = vmul.f32 %v8882_v51, %v948_v45  ;;  %v909_v4 = vsel %vm174_vm3, %v8885_v59, 0.0  ;;  %v1005_v19 = vsel %vm174_vm3, %v971_v46, 0.0  ;;  %v898_v14 = vrot.slane %v897_v48, 2 }
 0x321   :  { %v910_v22 = vrot.slane %v909_v4, 4  ;;  %v992_v25 = vrot.slane %v991_v9, 4  ;;  %v768_v30 = vrot.slane %v767_v63, 1  ;;  %v1006_v18 = vrot.slane %v1005_v19, 4 }
 0x322   :  { %v998_v10 = vsel %vm174_vm3, %v970_v26, 0.0  ;;  %v879_v31 = vrot.slane %v878_v3, 1  ;;  %v757_v55 = vrot.slane %v756_v24, 4  ;;  %v887_v39 = vadd.f32 %v886_v61, %v885_v52 }
 0x323   :  { %v999_v7 = vrot.slane %v998_v10, 4  ;;  %v892_v41 = vadd.f32 %v891_v15, %v890_v60  ;;  %v769_v38 = vmax.f32 %v767_v63, %v768_v30  ;;  %v986_v42 = vadd.f32 %v985_v21, %v984_v2 }
 0x324   :  { %v8393_v0 = vpop.eup %8392  ;;  %v899_v44 = vadd.f32 %v898_v14, %v897_v48  ;;  %v911_v45 = vadd.f32 %v910_v22, %v909_v4  ;;  %v758_v49 = vmax.f32 %v756_v24, %v757_v55  ;;  %v993_v50 = vadd.f32 %v992_v25, %v991_v9 }
 0x325   :  { %v8395_v56 = vpop.eup %8394  ;;  %v950_v11 = vmul.f32 %v8393_v0, %v8840_v13  ;;  %v1000_v43 = vadd.f32 %v999_v7, %v998_v10  ;;  %v880_v54 = vadd.f32 %v879_v31, %v878_v3  ;;  %v1007_v35 = vadd.f32 %v1006_v18, %v1005_v19 }
 0x326   :  { %v951_v28 = vmul.f32 %v8395_v56, %v8838_v6  ;;  %v785_v6 = vsub.f32 %v8868_v47, %v769_v38  ;;  %v759_v57 = vrot.slane %v758_v49, 2  ;;  %8402 = vrcp.f32 %v887_v39 }
 0x327   :  { %v8397_v29 = vpop.eup %8396  ;;  %v972_v13 = vmul.f32 %v8882_v51, %v950_v11  ;;  %v987_v46 = vrot.slane %v986_v42, 2  ;;  %v912_v48 = vrot.slane %v911_v45, 2  ;;  %v994_v0 = vrot.slane %v993_v50, 2 }
 0x328   :  { %v952_v36 = vmul.f32 %v8397_v29, %v8849_v34  ;;  %v973_v53 = vmul.f32 %v8882_v51, %v951_v28  ;;  %v893_v34 = vrot.slane %v892_v41, 1  ;;  %v816_v52 = vmul.f32 1.442695, %v785_v6  ;;  %v8399_v62 = vpop.eup %8398 }
 0x329   :  { %v1012_v27 = vsel %vm174_vm3, %v972_v13, 0.0  ;;  %v760_v60 = vmax.f32 %v758_v49, %v759_v57  ;;  %v1001_v2 = vrot.slane %v1000_v43, 2  ;;  %v900_v3 = vrot.slane %v899_v44, 1 }
 0x32a   :  { %v974_v26 = vmul.f32 %v8882_v51, %v952_v36  ;;  %v1013_v61 = vrot.slane %v1012_v27, 4  ;;  %8404 = vpow2.f32 %v816_v52  ;;  %v1019_v47 = vsel %vm174_vm3, %v973_v53, 0.0 }
 0x32b   :  { %8406 = vrcp.f32 %v880_v54  ;;  %v761_v4 = vrot.slane %v760_v60, 1  ;;  %v1008_v5 = vrot.slane %v1007_v35, 2  ;;  %v894_v56 = vadd.f32 %v893_v34, %v892_v41 }
 0x32c   :  { %v1014_v9 = vadd.f32 %v1013_v61, %v1012_v27  ;;  %v1020_v10 = vrot.slane %v1019_v47, 4  ;;  %v1026_v11 = vsel %vm174_vm3, %v974_v26, 0.0  ;;  %v953_v12 = vmul.f32 %v8399_v62, %v8845_v23  ;;  %v8912_v63 = vpop.eup %8400 }
 0x32d   :  { %v913_v19 = vadd.f32 %v912_v48, %v911_v45  ;;  %v762_v14 = vmax.f32 %v760_v60, %v761_v4  ;;  %v988_v15 = vadd.f32 %v987_v46, %v986_v42  ;;  %v995_v29 = vadd.f32 %v994_v0, %v993_v50 }
 0x32e   :  { %v1002_v21 = vadd.f32 %v1001_v2, %v1000_v43  ;;  %v1015_v22 = vrot.slane %v1014_v9, 2  ;;  %v1021_v24 = vadd.f32 %v1020_v10, %v1019_v47  ;;  %v902_v25 = vsel %vm174_vm3, %v8912_v63, 0.0 }
 0x32f   :  { %v784_v7 = vsub.f32 %v8894_v8, %v762_v14  ;;  %v1009_v28 = vadd.f32 %v1008_v5, %v1007_v35  ;;  %v1027_v30 = vrot.slane %v1026_v11, 4  ;;  %v901_v18 = vadd.f32 %v900_v3, %v899_v44 }
 0x330   :  { %8408 = vrcp.f32 %v894_v56  ;;  %v903_v23 = vrot.slane %v902_v25, 4  ;;  %v975_v31 = vmul.f32 %v8882_v51, %v953_v12  ;;  %v989_v55 = vrot.slane %v988_v15, 1 }
 0x331   :  { %v814_v13 = vmul.f32 1.442695, %v784_v7  ;;  %v1016_v36 = vadd.f32 %v1015_v22, %v1014_v9  ;;  %v914_v39 = vrot.slane %v913_v19, 1  ;;  %v1003_v38 = vrot.slane %v1002_v21, 1 }
 0x332   :  { %v904_v41 = vadd.f32 %v903_v23, %v902_v25  ;;  %v1022_v42 = vrot.slane %v1021_v24, 2  ;;  %v996_v45 = vrot.slane %v995_v29, 1  ;;  %v1010_v49 = vrot.slane %v1009_v28, 1 }
 0x333   :  { %8410 = vpow2.f32 %v814_v13  ;;  %v1028_v50 = vadd.f32 %v1027_v30, %v1026_v11  ;;  %v1017_v43 = vrot.slane %v1016_v36, 1  ;;  %v8403_v44 = vpop.eup %8402  ;;  %v990_v6 = vadd.f32 %v989_v55, %v988_v15 }
 0x334   :  { %v905_v8 = vrot.slane %v904_v41, 2  ;;  %v1023_v53 = vadd.f32 %v1022_v42, %v1021_v24  ;;  %v1033_v57 = vsel %vm174_vm3, %v975_v31, 0.0  ;;  %8412 = vrcp.f32 %v901_v18 }
 0x335   :  { %v1029_v54 = vrot.slane %v1028_v50, 2  ;;  %v1004_v35 = vadd.f32 %v1003_v38, %v1002_v21  ;;  %v1034_v27 = vrot.slane %v1033_v57, 4  ;;  %v915_v52 = vadd.f32 %v914_v39, %v913_v19 }
 0x336   :  { %v906_v51 = vadd.f32 %v905_v8, %v904_v41  ;;  %v997_v26 = vadd.f32 %v996_v45, %v995_v29  ;;  %v1011_v46 = vadd.f32 %v1010_v49, %v1009_v28  ;;  %v1018_v0 = vadd.f32 %v1017_v43, %v1016_v36  ;;  %v965_v45 = vpop.permute.xlu1 %964 }
 0x337   :  { %v8919_v34 = vpop.eup %8404  ;;  %v1030_v48 = vadd.f32 %v1029_v54, %v1028_v50  ;;  %v1024_v2 = vrot.slane %v1023_v53, 1  ;;  %v1035_v4 = vadd.f32 %v1034_v27, %v1033_v57  ;;  %8414 = vrcp.f32 %v915_v52 }
 0x338   :  { %v8407_v60 = vpop.eup %8406  ;;  %v907_v61 = vrot.slane %v906_v51, 1  ;;  %v923_v62 = vsel %vm174_vm3, %v8919_v34, 0.0  ;;  %v1123_v5 = vsel %vm1122_vm4, %v997_v26, %v990_v6  ;;  %v955_v41 = vmul.f32 %v8403_v44, %v8857_v58 }
 0x339   :  { %v924_v47 = vrot.slane %v923_v62, 4  ;;  %v1031_v3 = vrot.slane %v1030_v48, 1  ;;  %v1125_v9 = vsel %vm1124_vm5, %v1004_v35, %v1123_v5  ;;  %v1036_v11 = vrot.slane %v1035_v4, 2 }
 0x33a   :  { %v908_v56 = vadd.f32 %v907_v61, %v906_v51  ;;  %v1127_v12 = vsel %vm1126_vm6, %v1011_v46, %v1125_v9  ;;  %v1025_v21 = vadd.f32 %v1024_v2, %v1023_v53  ;;  %v954_v18 = vmul.f32 %v8407_v60, %v8861_v1 }
 0x33b   :  { %v925_v10 = vadd.f32 %v924_v47, %v923_v62  ;;  %v1032_v19 = vadd.f32 %v1031_v3, %v1030_v48  ;;  %v1129_v14 = vsel %vm1128_vm7, %v1018_v0, %v1127_v12  ;;  %v1037_v22 = vadd.f32 %v1036_v11, %v1035_v4 }
 0x33c   :  { %8416 = vrcp.f32 %v908_v56  ;;  %v1131_v7 = vsel %vm1130_vm8, %v1025_v21, %v1129_v14  ;;  %v976_v50 = vmul.f32 %v965_v45, %v954_v18  ;;  %v977_v43 = vmul.f32 %v965_v45, %v955_v41 }
 0x33d   :  { %v8409_v15 = vpop.eup %8408  ;;  %v926_v29 = vrot.slane %v925_v10, 2  ;;  %v1038_v25 = vrot.slane %v1037_v22, 1  ;;  %v1133_v30 = vsel %vm1132_vm9, %v1032_v19, %v1131_v7 }
 0x33e   :  { %v956_v55 = vmul.f32 %v8409_v15, %v8870_v20  ;;  %v1040_v57 = vsel %vm174_vm3, %v976_v50, 0.0  ;;  %v1047_v35 = vsel %vm174_vm3, %v977_v43, 0.0 }
 0x33f   :  { %v927_v24 = vadd.f32 %v926_v29, %v925_v10  ;;  %v1039_v31 = vadd.f32 %v1038_v25, %v1037_v22  ;;  %v1041_v26 = vrot.slane %v1040_v57, 4 }
 0x340   :  { %v8928_v28 = vpop.eup %8410  ;;  %v978_v1 = vmul.f32 %v965_v45, %v956_v55 }
 0x341   :  { %v928_v23 = vrot.slane %v927_v24, 1  ;;  %v916_v13 = vsel %vm174_vm3, %v8928_v28, 0.0  ;;  %v8413_v39 = vpop.eup %8412  ;;  %v1135_v42 = vsel %vm1134_vm10, %v1039_v31, %v1133_v30  ;;  %v1042_v2 = vadd.f32 %v1041_v26, %v1040_v57 }
 0x342   :  { %v917_v36 = vrot.slane %v916_v13, 4  ;;  %7998 = vmatprep.mubr.msk.f32.mxu1 %vm174_vm3, %v1135_v42  ;;  %v957_v53 = vmul.f32 %v8413_v39, %v8864_v37  ;;  %v1054_v58 = vsel %vm174_vm3, %v978_v1, 0.0  ;;  %v1048_v37 = vrot.slane %v1047_v35, 4 }
 0x343   :  { %v929_v38 = vadd.f32 %v928_v23, %v927_v24  ;;  %v1055_v60 = vrot.slane %v1054_v58, 4  ;;  %v1043_v9 = vrot.slane %v1042_v2, 2 }
 0x344   :  { %v918_v49 = vadd.f32 %v917_v36, %v916_v13  ;;  %v8415_v6 = vpop.eup %8414  ;;  %v979_v27 = vmul.f32 %v965_v45, %v957_v53  ;;  %v1049_v4 = vadd.f32 %v1048_v37, %v1047_v35 }
 0x345   :  { %8418 = vrcp.f32 %v929_v38  ;;  %v959_v52 = vmul.f32 %v8415_v6, %v8885_v59  ;;  %v1056_v47 = vadd.f32 %v1055_v60, %v1054_v58  ;;  %v1044_v21 = vadd.f32 %v1043_v9, %v1042_v2 }
 0x346   :  { %v919_v8 = vrot.slane %v918_v49, 2  ;;  %v1061_v62 = vsel %vm174_vm3, %v979_v27, 0.0  ;;  %v1050_v19 = vrot.slane %v1049_v4, 2 }
 0x347   :  { %v981_v0 = vmul.f32 %v965_v45, %v959_v52  ;;  %v1062_v5 = vrot.slane %v1061_v62, 4  ;;  %v1057_v10 = vrot.slane %v1056_v47, 2  ;;  %v1045_v13 = vrot.slane %v1044_v21, 1 }
 0x348   :  { %v920_v20 = vadd.f32 %v919_v8, %v918_v49  ;;  %v1051_v7 = vadd.f32 %v1050_v19, %v1049_v4 }
 0x349   :  { %v8417_v54 = vpop.eup %8416  ;;  %v1075_v59 = vsel %vm174_vm3, %v981_v0, 0.0  ;;  %v1063_v14 = vadd.f32 %v1062_v5, %v1061_v62  ;;  %v1058_v24 = vadd.f32 %v1057_v10, %v1056_v47  ;;  %v1046_v49 = vadd.f32 %v1045_v13, %v1044_v21  ;;  %v1297_v13 = vld [vmem:[%s10654_s11 + $0xc0] sm:$0xff] }
 0x34a   :  { %v958_v44 = vmul.f32 %v8417_v54, %v8912_v63  ;;  %v921_v51 = vrot.slane %v920_v20, 1  ;;  %v1076_v15 = vrot.slane %v1075_v59, 4  ;;  %v1052_v41 = vrot.slane %v1051_v7, 1 }
 0x34b   :  { %v1064_v30 = vrot.slane %v1063_v14, 2  ;;  %v1059_v55 = vrot.slane %v1058_v24, 1 }
 0x34c   :  { %v980_v46 = vmul.f32 %v965_v45, %v958_v44  ;;  %v922_v48 = vadd.f32 %v921_v51, %v920_v20  ;;  %v1077_v18 = vadd.f32 %v1076_v15, %v1075_v59  ;;  %v1053_v6 = vadd.f32 %v1052_v41, %v1051_v7  ;;  %v1305_v15 = vld [vmem:[%s10654_s11 + $0x100] sm:$0x33]  ;;  %v1282_v41 = vld [vmem:[%s10654_s11 + $0x48] sm:$0xff] }
 0x34d   :  { %v1065_v38 = vadd.f32 %v1064_v30, %v1063_v14  ;;  %v1060_v8 = vadd.f32 %v1059_v55, %v1058_v24  ;;  %v1306_v14 = vld [vmem:[%s10654_s11 + $0x108] sm:$0x33]  ;;  %v6818_v24 = vcombine.low %v1305_v15, %v1305_v15 }
 0x34e   :  { %v1068_v61 = vsel %vm174_vm3, %v980_v46, 0.0  ;;  %8420 = vrcp.f32 %v922_v48  ;;  %v1078_v42 = vrot.slane %v1077_v18, 2  ;;  %v1136_v58 = vsel %vm1122_vm4, %v1053_v6, %v1046_v49  ;;  %v1290_v30 = vld [vmem:[%s10654_s11 + $0x88] sm:$0xff]  ;;  %v1281_v49 = vld [vmem:[%s10654_s11 + $0x40] sm:$0xff] }
 0x34f   :  { %v1069_v63 = vrot.slane %v1068_v61, 4  ;;  %v1066_v20 = vrot.slane %v1065_v38, 1  ;;  %v6820_v21 = vcombine.low %v1306_v14, %v1306_v14  ;;  %v1603_v7 = vsel %vm1601_vm11, %v6818_v24, 0  ;;  %v1275_v24 = vld [vmem:[%s10654_s11 + $0x10] sm:$0xff] }
 0x350   :  { %v1079_v54 = vadd.f32 %v1078_v42, %v1077_v18  ;;  %v1298_v18 = vld [vmem:[%s10654_s11 + $0xc8] sm:$0xff] }
 0x351   :  { %v1070_v12 = vadd.f32 %v1069_v63, %v1068_v61  ;;  %v1067_v35 = vadd.f32 %v1066_v20, %v1065_v38  ;;  %v6779_v63 = vld [vmem:[%s10651_s8] ss:$0 sm:$0xff] }
 0x352   :  { %v8419_v3 = vpop.eup %8418  ;;  %v1080_v27 = vrot.slane %v1079_v54, 1  ;;  %v1273_v38 = vld [vmem:[%s10654_s11] sm:$0xff] }
 0x353   :  { %v961_v56 = vmul.f32 %v8419_v3, %v8919_v34  ;;  %v1071_v25 = vrot.slane %v1070_v12, 2 }
 0x354   :  { %v1081_v37 = vadd.f32 %v1080_v27, %v1079_v54  ;;  %v8532_v54 = vmov 0  }
 0x355   :  { %v983_v11 = vmul.f32 %v965_v45, %v961_v56  ;;  %v1072_v36 = vadd.f32 %v1071_v25, %v1070_v12  ;;  %v1609_v25 = vsel %vm1601_vm11, %v6820_v21, 0  ;;  %1725 = vmatprep.mubr.bf16.mxu0 %v8532_v54 }
 0x357   :  { %v1089_v29 = vsel %vm174_vm3, %v983_v11, 0.0  ;;  %v1073_v43 = vrot.slane %v1072_v36, 1 }
 0x358   :  { %v1090_v22 = vrot.slane %v1089_v29, 4 }
 0x359   :  { %v1074_v44 = vadd.f32 %v1073_v43, %v1072_v36  ;;  %v1307_v43 = vld [vmem:[%s10654_s11 + $0x110] sm:$0x33] }
 0x35a   :  { %v1091_v31 = vadd.f32 %v1090_v22, %v1089_v29  ;;  %v6821_v29 = vcombine.high %v1306_v14, %v1306_v14  ;;  %v6819_v22 = vcombine.high %v1305_v15, %v1305_v15  ;;  %v6823_v6 = vcombine.high %v1307_v43, %v1307_v43 }
 0x35b   :  { %v8421_v23 = vpop.eup %8420 }
 0x35c   :  { %v960_v34 = vmul.f32 %v8421_v23, %v8928_v28  ;;  %v1092_v1 = vrot.slane %v1091_v31, 2  ;;  %6836 = vmatprep.subr.msk.bf16.mxu0 %vm1601_vm11, %v6821_v29  ;;  %6834 = vmatprep.subr.msk.bf16.mxu1 %vm1601_vm11, %v6819_v22  ;;  %v1289_v23 = vld [vmem:[%s10654_s11 + $0x80] sm:$0xff] }
 0x35d   :  { %1704 = vmatpush1.bf16.msra.mxu0 %v1609_v25  ;;  %v6802_v55 = vcombine.low %v1289_v23, %v1297_v13  ;;  %v6803_v36 = vcombine.high %v1289_v23, %v1297_v13  ;;  %v1283_v25 = vld [vmem:[%s10654_s11 + $0x50] sm:$0xff] }
 0x35e   :  { %v982_v39 = vmul.f32 %v965_v45, %v960_v34  ;;  %v1093_v28 = vadd.f32 %v1092_v1, %v1091_v31  ;;  %v1137_v45 = vsel %vm1124_vm5, %v1060_v8, %v1136_v58  ;;  %v6805_v34 = vcombine.high %v1290_v30, %v1298_v18 }
 0x35f   :  { %v1138_v46 = vsel %vm1126_vm6, %v1067_v35, %v1137_v45  ;;  %v6804_v31 = vcombine.low %v1290_v30, %v1298_v18  ;;  %v6786_v1 = vcombine.low %v1273_v38, %v1281_v49  ;;  %v6787_v8 = vcombine.high %v1273_v38, %v1281_v49  ;;  %v1284_v30 = vld [vmem:[%s10654_s11 + $0x58] sm:$0xff] }
 0x360   :  { %v1082_v50 = vsel %vm174_vm3, %v982_v39, 0.0  ;;  %v1094_v26 = vrot.slane %v1093_v28, 1  ;;  %v1139_v60 = vsel %vm1128_vm7, %v1074_v44, %v1138_v46  ;;  %1705 = vmatprep.subr.bf16.mxu0 %v6805_v34  ;;  %v1274_v39 = vld [vmem:[%s10654_s11 + $0x8] sm:$0xff]  ;;  %v6791_v34 = vcombine.high %v1275_v24, %v1283_v25 }
 0x361   :  { %v1083_v53 = vrot.slane %v1082_v50, 4  ;;  %v1140_v0 = vsel %vm1130_vm8, %v1081_v37, %v1139_v60  ;;  %1706 = vmatpush1.bf16.msra.mxu0 %v6804_v31  ;;  %v6789_v42 = vcombine.high %v1274_v39, %v1282_v41  ;;  %v1309_v31 = vld [vmem:[%s10654_s11 + $0x120] sm:$0x33] }
 0x362   :  { %v1095_v62 = vadd.f32 %v1094_v26, %v1093_v28 }
 0x363   :  { %v1084_v57 = vadd.f32 %v1083_v53, %v1082_v50  ;;  %v6788_v50 = vcombine.low %v1274_v39, %v1282_v41  ;;  %1707 = vmatprep.subr.bf16.mxu0 %v6789_v42  ;;  %v1308_v53 = vld [vmem:[%s10654_s11 + $0x118] sm:$0x33]  ;;  %v6827_v41 = vcombine.high %v1309_v31, %v1309_v31  ;;  %v6826_v42 = vcombine.low %v1309_v31, %v1309_v31  ;;  %v8089_v31 = vld [vmem:[%s10656_s13 + $0xb0] sm:$0xff]  }
 0x364   :  { %v6825_v20 = vcombine.high %v1308_v53, %v1308_v53 }
 0x365   :  { %v1085_v51 = vrot.slane %v1084_v57, 2  ;;  %1708 = vmatpush1.bf16.msra.mxu0 %v6788_v50  ;;  %v1293_v50 = vld [vmem:[%s10654_s11 + $0xa0] sm:$0xff] }
 0x366   :  { %6840 = vmatprep.subr.msk.bf16.mxu0 %vm1601_vm11, %v6825_v20 }
 0x367   :  { %v1086_v52 = vadd.f32 %v1085_v51, %v1084_v57 }
 0x369   :  { %v1087_v48 = vrot.slane %v1086_v52, 1 }
 0x36b   :  { %v1088_v61 = vadd.f32 %v1087_v48, %v1086_v52 }
 0x36d   :  { %v1141_v2 = vsel %vm1132_vm9, %v1088_v61, %v1140_v0 }
 0x36e   :  { %v1142_v47 = vsel %vm1134_vm10, %v1095_v62, %v1141_v2  ;;  %v6783_v2 = vld [vmem:[%s10652_s9] ss:$0 sm:$0xff] }
 0x36f   :  { %7999 = vmatmul.mubr.msk.f32.vlgmr.msra.gmra.mxu1 %vm174_vm3, %v1142_v47 }
 0x370   :  { %1661 = vmatpush1.bf16.msra.mxu1 %v1603_v7  ;;  %1682 = vmatprep.mubr.bf16.mxu1 %v8532_v54  ;;  %v1276_v7 = vld [vmem:[%s10654_s11 + $0x18] sm:$0xff] }
 0x371   :  { %1662 = vmatprep.subr.bf16.mxu1 %v6803_v36  ;;  %v6793_v13 = vcombine.high %v1276_v7, %v1284_v30  ;;  %v6790_v36 = vcombine.low %v1275_v24, %v1283_v25  ;;  %v6792_v39 = vcombine.low %v1276_v7, %v1284_v30  ;;  %v8082_v25 = vld [vmem:[%s10656_s13 + $0x78] sm:$0xff]  }
 0x372   :  { %v8083_v7 = vld [vmem:[%s10656_s13 + $0xf8] sm:$0xff]  }
 0x373   :  { %v8084_v30 = vld [vmem:[%s10656_s13 + $0x38] sm:$0xff]  }
 0x374   :  { %1663 = vmatpush1.bf16.msra.mxu1 %v6802_v55  ;;  %v1310_v55 = vld [vmem:[%s10654_s11 + $0x128] sm:$0x33] }
 0x375   :  { %1664 = vmatprep.subr.bf16.mxu1 %v6787_v8  ;;  %v6829_v38 = vcombine.high %v1310_v55, %v1310_v55  ;;  %v6828_v49 = vcombine.low %v1310_v55, %v1310_v55  ;;  %v1294_v8 = vld [vmem:[%s10654_s11 + $0xa8] sm:$0xff] }
 0x376   :  { %v8090_v55 = vld [vmem:[%s10656_s13 + $0x68] sm:$0xff]  }
 0x378   :  { %1665 = vmatpush1.bf16.msra.mxu1 %v6786_v1  ;;  %v1301_v1 = vld [vmem:[%s10654_s11 + $0xe0] sm:$0xff] }
 0x379   :  { %6838 = vmatprep.subr.msk.bf16.mxu1 %vm1601_vm11, %v6823_v6  ;;  %v1633_v6 = vsel %vm1601_vm11, %v6828_v49, 0  ;;  %v6811_v20 = vcombine.high %v1293_v50, %v1301_v1  ;;  %v8097_v49 = vld [vmem:[%s10656_s13 + $0xa0] sm:$0xff]  }
 0x42f   :  { %v8000_v3 = vpop.f32.mrf.mxu1 }
 0x430   :  { %v1222_v4 = vadd.f32 %v8000_v3, %v6779_v63 }
 0x431   :  { %v1216_v5 = vpop.f32.mrf.mxu1 }
 0x432   :  { %v8963_v56 = vadd.f32 %v1222_v4, %v8658_v17  ;;  %v1217_v59 = vadd.f32 %v6779_v63, %v1216_v5  ;;  %v6784_v5 = vld [vmem:[%s10653_s10] ss:$0 sm:$0xff] }
 0x434   :  { %v8966_v9 = vadd.f32 %v1217_v59, %v8656_v16  ;;  %v1232_v10 = vsel %vm174_vm3, %v8963_v56, 0.0  ;;  %v1239_v17 = vmul.f32 %v8963_v56, %v8963_v56  ;;  %v6822_v59 = vcombine.low %v1307_v43, %v1307_v43  ;;  %v1302_v43 = vld [vmem:[%s10654_s11 + $0xe8] sm:$0xff] }
 0x435   :  { %1233 = vadd.xlane.f32.xlu1 %v1232_v10 }
 0x436   :  { %v1229_v11 = vsel %vm174_vm3, %v8966_v9, 0.0  ;;  %v1238_v12 = vmul.f32 %v8966_v9, %v8966_v9  ;;  %v1243_v16 = vsel %vm174_vm3, %v1239_v17, 0.0  ;;  %v1615_v14 = vsel %vm1601_vm11, %v6822_v59, 0 }
 0x437   :  { %1230 = vadd.xlane.f32.xlu0 %v1229_v11  ;;  %v6824_v11 = vcombine.low %v1308_v53, %v1308_v53  ;;  %v1627_v53 = vsel %vm1601_vm11, %v6826_v42, 0  ;;  %v8096_v42 = vld [vmem:[%s10656_s13 + $0x20] sm:$0xff]  }
 0x438   :  { %v1240_v19 = vsel %vm174_vm3, %v1238_v12, 0.0  ;;  %v1299_v12 = vld [vmem:[%s10654_s11 + $0xd0] sm:$0xff] }
 0x439   :  { %v1621_v29 = vsel %vm1601_vm11, %v6824_v11, 0  ;;  %v1279_v11 = vld [vmem:[%s10654_s11 + $0x30] sm:$0xff] }
 0x43b   :  { %1241 = vadd.xlane.f32.xlu0 %v1240_v19  ;;  %v1300_v19 = vld [vmem:[%s10654_s11 + $0xd8] sm:$0xff] }
 0x43f   :  { %1244 = vadd.xlane.f32.xlu0 %v1243_v16 }
 0x4be   :  { %v1234_v58 = vpop.xlane.xlu1 %1233 }
 0x4bf   :  { %v1237_v51 = vmul.f32 0.027777778, %v1234_v58  ;;  %v1285_v58 = vld [vmem:[%s10654_s11 + $0x60] sm:$0xff] }
 0x4c0   :  { %v1231_v57 = vpop.xlane.xlu0 %1230 }
 0x4c1   :  { %v1236_v28 = vmul.f32 0.027777778, %v1231_v57  ;;  %v1249_v26 = vmul.f32 %v1237_v51, %v1237_v51  ;;  %v1253_v47 = vsub.f32 %v8963_v56, %v1237_v51  ;;  %v1292_v56 = vld [vmem:[%s10654_s11 + $0x98] sm:$0xff]  ;;  %v6813_v57 = vcombine.high %v1294_v8, %v1302_v43  ;;  %v1286_v51 = vld [vmem:[%s10654_s11 + $0x68] sm:$0xff] }
 0x4c2   :  { %v6809_v22 = vcombine.high %v1292_v56, %v1300_v19  ;;  %v6808_v23 = vcombine.low %v1292_v56, %v1300_v19  ;;  %v1288_v56 = vld [vmem:[%s10654_s11 + $0x78] sm:$0xff] }
 0x4c3   :  { %v1248_v45 = vmul.f32 %v1236_v28, %v1236_v28  ;;  %v1252_v61 = vsub.f32 %v8966_v9, %v1236_v28  ;;  %v1291_v9 = vld [vmem:[%s10654_s11 + $0x90] sm:$0xff]  ;;  %v1277_v28 = vld [vmem:[%s10654_s11 + $0x20] sm:$0xff] }
 0x4c4   :  { %v1242_v44 = vpop.xlane.xlu0 %1241  ;;  %v6807_v21 = vcombine.high %v1291_v9, %v1299_v12  ;;  %v6806_v18 = vcombine.low %v1291_v9, %v1299_v12  ;;  %v1287_v9 = vld [vmem:[%s10654_s11 + $0x70] sm:$0xff]  ;;  %v1280_v12 = vld [vmem:[%s10654_s11 + $0x38] sm:$0xff] }
 0x4c5   :  { %v1246_v35 = vmul.f32 0.027777778, %v1242_v44  ;;  %v1278_v44 = vld [vmem:[%s10654_s11 + $0x28] sm:$0xff]  ;;  %v6800_v24 = vcombine.low %v1280_v12, %v1288_v56 }
 0x4c7   :  { %v1250_v27 = vsub.f32 %v1246_v35, %v1248_v45  ;;  %v6810_v45 = vcombine.low %v1293_v50, %v1301_v1  ;;  %v6812_v35 = vcombine.low %v1294_v8, %v1302_v43  ;;  %v8098_v50 = vld [vmem:[%s10656_s13 + $0x58] sm:$0xff]  }
 0x4c8   :  { %v1245_v52 = vpop.xlane.xlu0 %1244  ;;  %v8099_v1 = vld [vmem:[%s10656_s13 + $0xd8] sm:$0xff]  }
 0x4c9   :  { %v1254_v46 = vadd.f32 1e-05, %v1250_v27  ;;  %v1247_v48 = vmul.f32 0.027777778, %v1245_v52  ;;  %v6795_v27 = vcombine.high %v1277_v28, %v1285_v58  ;;  %v6797_v52 = vcombine.high %v1278_v44, %v1286_v51  ;;  %v8100_v8 = vld [vmem:[%s10656_s13 + $0x18] sm:$0xff]  }
 0x4ca   :  { %v8101_v43 = vld [vmem:[%s10656_s13 + $0x98] sm:$0xff]  }
 0x4cb   :  { %8422 = vrsqrt.f32 %v1254_v46  ;;  %v1251_v60 = vsub.f32 %v1247_v48, %v1249_v26  ;;  %v1311_v26 = vld [vmem:[%s10654_s11 + $0x130] sm:$0x33]  ;;  %v1312_v46 = vld [vmem:[%s10654_s11 + $0x138] sm:$0x33]  ;;  %v6794_v48 = vcombine.low %v1277_v28, %v1285_v58  ;;  %v8106_v28 = vld [vmem:[%s10656_s13 + $0x48] sm:$0xff]  }
 0x4cc   :  { %v8107_v58 = vld [vmem:[%s10656_s13 + $0xc8] sm:$0xff]  }
 0x4cd   :  { %v1255_v37 = vadd.f32 1e-05, %v1251_v60  ;;  %v6796_v60 = vcombine.low %v1278_v44, %v1286_v51  ;;  %v8108_v44 = vld [vmem:[%s10656_s13 + $0x8] sm:$0xff]  }
 0x4ce   :  { %v8109_v51 = vld [vmem:[%s10656_s13 + $0x88] sm:$0xff]  }
 0x4cf   :  { %8424 = vrsqrt.f32 %v1255_v37  ;;  %v6831_v37 = vcombine.high %v1311_v26, %v1311_v26 }
 0x4d8   :  { %v8423_v62 = vpop.eup %8422 }
 0x4d9   :  { %v1258_v0 = vmul.f32 %v8423_v62, %v1252_v61  ;;  %v6833_v61 = vcombine.high %v1312_v46, %v1312_v46  ;;  %v6830_v62 = vcombine.low %v1311_v26, %v1311_v26  ;;  %v8114_v26 = vld [vmem:[%s10656_s13 + $0x178] sm:$0xff]  }
 0x4db   :  { %v1264_v3 = vmul.f32 %v6783_v2, %v1258_v0  ;;  %v6832_v0 = vcombine.low %v1312_v46, %v1312_v46  ;;  %v8115_v46 = vld [vmem:[%s10656_s13 + $0x1f8] sm:$0xff]  }
 0x4dc   :  { %v8425_v63 = vpop.eup %8424 }
 0x4dd   :  { %v1259_v4 = vmul.f32 %v8425_v63, %v1253_v47  ;;  %v9042_v17 = vadd.f32 %v6784_v5, %v1264_v3  ;;  %v1303_v47 = vld [vmem:[%s10654_s11 + $0xf0] sm:$0xff]  ;;  %v1296_v63 = vld [vmem:[%s10654_s11 + $0xb8] sm:$0xff] }
 0x4de   :  { %v1304_v3 = vld [vmem:[%s10654_s11 + $0xf8] sm:$0xff] }
 0x4df   :  { %v1265_v10 = vmul.f32 %v6783_v2, %v1259_v4  ;;  %v1295_v2 = vld [vmem:[%s10654_s11 + $0xb0] sm:$0xff]  ;;  %v1639_v4 = vsel %vm1601_vm11, %v6830_v62, 0 }
 0x4e0   :  { %v6815_v59 = vcombine.high %v1295_v2, %v1303_v47  ;;  %v6814_v19 = vcombine.low %v1295_v2, %v1303_v47 }
 0x4e1   :  { %v9044_v16 = vadd.f32 %v6784_v5, %v1265_v10  ;;  %v1645_v5 = vsel %vm1601_vm11, %v6832_v0, 0  ;;  %v6817_v10 = vcombine.high %v1296_v63, %v1304_v3 }
 0x4e3   :  { %v9049_v15 = vpack.c.bf16 %v9044_v16, %v9042_v17 }
 0x4e5   :  { %6835 = vmatmul.mubr.msk.bf16.vlgmr.msra.gmra.mxu1 %vm174_vm3, %v9049_v15  ;;  %6837 = vmatmul.mubr.msk.bf16.vlgmr.msra.gmra.mxu0 %vm174_vm3, %v9049_v15 }
 0x4e6   :  { %1747 = vmatpush1.bf16.msra.mxu1 %v1615_v14  ;;  %1790 = vmatpush1.bf16.msra.mxu0 %v1621_v29  ;;  %v6816_v14 = vcombine.low %v1296_v63, %v1304_v3  ;;  %v6799_v29 = vcombine.high %v1279_v11, %v1287_v9 }
 0x4e7   :  { %1748 = vmatprep.subr.bf16.mxu1 %v6807_v21  ;;  %1791 = vmatprep.subr.bf16.mxu0 %v6809_v22  ;;  %v6801_v21 = vcombine.high %v1280_v12, %v1288_v56  ;;  %v6798_v22 = vcombine.low %v1279_v11, %v1287_v9 }
 0x4e8   :  { %1768 = vmatprep.mubr.bf16.mxu1 %v8532_v54  ;;  %1811 = vmatprep.mubr.bf16.mxu0 %v8532_v54 }
 0x4ea   :  { %1749 = vmatpush1.bf16.msra.mxu1 %v6806_v18  ;;  %1792 = vmatpush1.bf16.msra.mxu0 %v6808_v23  ;;  %v8085_v18 = vld [vmem:[%s10656_s13 + $0xb8] sm:$0xff]   ;;  %v8086_v23 = vld [vmem:[%s10656_s13 + $0x70] sm:$0xff]  }
 0x4eb   :  { %1750 = vmatprep.subr.bf16.mxu1 %v6791_v34  ;;  %1793 = vmatprep.subr.bf16.mxu0 %v6793_v13  ;;  %v8087_v34 = vld [vmem:[%s10656_s13 + $0xf0] sm:$0xff]  }
 0x4ec   :  { %v8088_v13 = vld [vmem:[%s10656_s13 + $0x30] sm:$0xff]  }
 0x4ee   :  { %1751 = vmatpush1.bf16.msra.mxu1 %v6790_v36  ;;  %1794 = vmatpush1.bf16.msra.mxu0 %v6792_v39  ;;  %v8092_v36 = vld [vmem:[%s10656_s13 + $0x28] sm:$0xff]  }
 0x4ef   :  { %6842 = vmatprep.subr.msk.bf16.mxu1 %vm1601_vm11, %v6827_v41  ;;  %6844 = vmatprep.subr.msk.bf16.mxu0 %vm1601_vm11, %v6829_v38  ;;  %v8093_v39 = vld [vmem:[%s10656_s13 + $0xa8] sm:$0xff]   ;;  %v8094_v41 = vld [vmem:[%s10656_s13 + $0x60] sm:$0xff]  }
 0x4f0   :  { %v8095_v38 = vld [vmem:[%s10656_s13 + $0xe0] sm:$0xff]  }
 0x4f1   :  { %6839 = vmatmul.mubr.msk.bf16.vlgmr.msra.gmra.mxu1 %vm174_vm3, %v9049_v15  ;;  %6841 = vmatmul.mubr.msk.bf16.vlgmr.msra.gmra.mxu0 %vm174_vm3, %v9049_v15 }
 0x4f2   :  { %1833 = vmatpush1.bf16.msra.mxu1 %v1627_v53  ;;  %1876 = vmatpush1.bf16.msra.mxu0 %v1633_v6  ;;  %v8102_v53 = vld [vmem:[%s10656_s13 + $0x50] sm:$0xff]  }
 0x4f3   :  { %1834 = vmatprep.subr.bf16.mxu1 %v6811_v20  ;;  %1877 = vmatprep.subr.bf16.mxu0 %v6813_v57  ;;  %v8103_v6 = vld [vmem:[%s10656_s13 + $0xd0] sm:$0xff]  }
 0x4f4   :  { %1854 = vmatprep.mubr.bf16.mxu1 %v8532_v54  ;;  %1897 = vmatprep.mubr.bf16.mxu0 %v8532_v54  ;;  %v8104_v20 = vld [vmem:[%s10656_s13 + $0x10] sm:$0xff]  }
 0x4f5   :  { %v8105_v57 = vld [vmem:[%s10656_s13 + $0x90] sm:$0xff]  }
 0x4f6   :  { %1835 = vmatpush1.bf16.msra.mxu1 %v6810_v45  ;;  %1878 = vmatpush1.bf16.msra.mxu0 %v6812_v35  ;;  %v8110_v45 = vld [vmem:[%s10656_s13 + $0x40] sm:$0xff]  }
 0x4f7   :  { %1836 = vmatprep.subr.bf16.mxu1 %v6795_v27  ;;  %1879 = vmatprep.subr.bf16.mxu0 %v6797_v52  ;;  %v8111_v35 = vld [vmem:[%s10656_s13 + $0xc0] sm:$0xff]  }
 0x4f8   :  { %v8112_v27 = vld [vmem:[%s10656_s13] sm:$0xff]  }
 0x4f9   :  { %v8113_v52 = vld [vmem:[%s10656_s13 + $0x80] sm:$0xff]  }
 0x4fa   :  { %1837 = vmatpush1.bf16.msra.mxu1 %v6794_v48  ;;  %1880 = vmatpush1.bf16.msra.mxu0 %v6796_v60  ;;  %v9257_v48 = vsub.s32 1, %v8688_v32  ;;  %v9260_v60 = vsub.s32 3, %v8688_v32 }
 0x4fb   :  { %6846 = vmatprep.subr.msk.bf16.mxu1 %vm1601_vm11, %v6831_v37  ;;  %6848 = vmatprep.subr.msk.bf16.mxu0 %vm1601_vm11, %v6833_v61  ;;  %v9263_v37 = vsub.s32 2, %v8688_v32  ;;  %v9268_v61 = vld [vmem:[%s10655_s12] ss:$2 sm:$0xff] }
 0x4fc   :  { %v1325_v2 = vrot.slane %v9268_v61, %v9257_v48  ;;  %v1333_v47 = vrot.slane %v9268_v61, %v9260_v60  ;;  %v1321_v63 = vrot.slane %v9268_v61, %v8698_v40 }
 0x4fd   :  { %6843 = vmatmul.mubr.msk.bf16.vlgmr.msra.gmra.mxu1 %vm174_vm3, %v9049_v15  ;;  %6845 = vmatmul.mubr.msk.bf16.vlgmr.msra.gmra.mxu0 %vm174_vm3, %v9049_v15  ;;  %v1329_v3 = vrot.slane %v9268_v61, %v9263_v37 }
 0x4fe   :  { %1919 = vmatpush1.bf16.msra.mxu1 %v1639_v4  ;;  %1962 = vmatpush1.bf16.msra.mxu0 %v1645_v5 }
 0x4ff   :  { %1920 = vmatprep.subr.bf16.mxu1 %v6815_v59  ;;  %1963 = vmatprep.subr.bf16.mxu0 %v6817_v10 }
 0x500   :  { %1940 = vmatprep.mubr.bf16.mxu1 %v8532_v54  ;;  %1983 = vmatprep.mubr.bf16.mxu0 %v8532_v54 }
 0x502   :  { %1921 = vmatpush1.bf16.msra.mxu1 %v6814_v19  ;;  %1964 = vmatpush1.bf16.msra.mxu0 %v6816_v14 }
 0x503   :  { %1922 = vmatprep.subr.bf16.mxu1 %v6799_v29  ;;  %1965 = vmatprep.subr.bf16.mxu0 %v6801_v21 }
 0x506   :  { %1923 = vmatpush1.bf16.msra.mxu1 %v6798_v22  ;;  %1966 = vmatpush1.bf16.msra.mxu0 %v6800_v24 }
 0x507   :  { %7549 = vmatprep.subr.bf16.mxu1 %v8082_v25  ;;  %7571 = vmatprep.subr.bf16.mxu0 %v8083_v7 }
 0x509   :  { %6847 = vmatmul.mubr.msk.bf16.vlgmr.msra.gmra.mxu1 %vm174_vm3, %v9049_v15  ;;  %6849 = vmatmul.mubr.msk.bf16.vlgmr.msra.gmra.mxu0 %vm174_vm3, %v9049_v15  ;;  %v8091_v15 = vld [vmem:[%s10656_s13 + $0xe8] sm:$0xff]  }
 0x50a   :  { %7550 = vmatpush3.bf16.msra.mxu1 %v8084_v30  ;;  %7572 = vmatpush3.bf16.msra.mxu0 %v8085_v18  ;;  %v9279_v30 = vsub.s32 5, %v8688_v32  ;;  %v9282_v18 = vsub.s32 7, %v8688_v32 }
 0x50b   :  { %7551 = vmatprep.subr.bf16.mxu1 %v8086_v23  ;;  %7573 = vmatprep.subr.bf16.mxu0 %v8087_v34 }
 0x50e   :  { %7552 = vmatpush3.bf16.msra.mxu1 %v8088_v13  ;;  %7574 = vmatpush3.bf16.msra.mxu0 %v8089_v31 }
 0x50f   :  { %7553 = vmatprep.subr.bf16.mxu1 %v8090_v55  ;;  %7575 = vmatprep.subr.bf16.mxu0 %v8091_v15 }
 0x512   :  { %7554 = vmatpush3.bf16.msra.mxu1 %v8092_v36  ;;  %7576 = vmatpush3.bf16.msra.mxu0 %v8093_v39 }
 0x513   :  { %7555 = vmatprep.subr.bf16.mxu1 %v8094_v41  ;;  %7577 = vmatprep.subr.bf16.mxu0 %v8095_v38  ;;  %v8116_v41 = vld [vmem:[%s10656_s13 + $0x138] sm:$0xff]  }
 0x514   :  { %v8117_v38 = vld [vmem:[%s10656_s13 + $0x1b8] sm:$0xff]  }
 0x516   :  { %7556 = vmatpush3.bf16.msra.mxu1 %v8096_v42  ;;  %7578 = vmatpush3.bf16.msra.mxu0 %v8097_v49 }
 0x517   :  { %7557 = vmatprep.subr.bf16.mxu1 %v8098_v50  ;;  %7579 = vmatprep.subr.bf16.mxu0 %v8099_v1 }
 0x51a   :  { %7558 = vmatpush3.bf16.msra.mxu1 %v8100_v8  ;;  %7580 = vmatpush3.bf16.msra.mxu0 %v8101_v43  ;;  %v8118_v8 = vld [vmem:[%s10656_s13 + $0x170] sm:$0xff]  }
 0x51b   :  { %7559 = vmatprep.subr.bf16.mxu1 %v8102_v53  ;;  %7581 = vmatprep.subr.bf16.mxu0 %v8103_v6  ;;  %v8119_v43 = vld [vmem:[%s10656_s13 + $0x1f0] sm:$0xff]   ;;  %v1341_v53 = vrot.slane %v9268_v61, %v9279_v30  ;;  %v1349_v6 = vrot.slane %v9268_v61, %v9282_v18 }
 0x51e   :  { %7560 = vmatpush3.bf16.msra.mxu1 %v8104_v20  ;;  %7582 = vmatpush3.bf16.msra.mxu0 %v8105_v57 }
 0x51f   :  { %7561 = vmatprep.subr.bf16.mxu1 %v8106_v28  ;;  %7583 = vmatprep.subr.bf16.mxu0 %v8107_v58  ;;  %v8120_v28 = vld [vmem:[%s10656_s13 + $0x130] sm:$0xff]  }
 0x520   :  { %v8121_v58 = vld [vmem:[%s10656_s13 + $0x1b0] sm:$0xff]  }
 0x522   :  { %7562 = vmatpush3.bf16.msra.mxu1 %v8108_v44  ;;  %7584 = vmatpush3.bf16.msra.mxu0 %v8109_v51 }
 0x523   :  { %7563 = vmatprep.subr.bf16.mxu1 %v8110_v45  ;;  %7585 = vmatprep.subr.bf16.mxu0 %v8111_v35  ;;  %v8122_v45 = vld [vmem:[%s10656_s13 + $0x168] sm:$0xff]  }
 0x524   :  { %v8123_v35 = vld [vmem:[%s10656_s13 + $0x1e8] sm:$0xff]  }
 0x526   :  { %7564 = vmatpush3.bf16.msra.mxu1 %v8112_v27  ;;  %7586 = vmatpush3.bf16.msra.mxu0 %v8113_v52 }
 0x527   :  { %7593 = vmatprep.subr.bf16.mxu1 %v8114_v26  ;;  %7615 = vmatprep.subr.bf16.mxu0 %v8115_v46 }
 0x5a5   :  { %v1684_v62 = vpop.f32.mrf.mxu1  ;;  %v1727_v0 = vpop.f32.mrf.mxu0 }
 0x5a6   :  { %v1685_v19 = vadd.f32 %v1684_v62, %v1321_v63  ;;  %v1728_v14 = vadd.f32 %v1727_v0, %v1329_v3 }
 0x5a7   :  { %v1686_v4 = vpop.f32.mrf.mxu1  ;;  %v1729_v5 = vpop.f32.mrf.mxu0 }
 0x5a8   :  { %v1687_v11 = vadd.f32 %v1686_v4, %v1325_v2  ;;  %v1730_v9 = vadd.f32 %v1729_v5, %v1333_v47  ;;  %v1994_v55 = vmax.f32 %v1685_v19, 0.0  ;;  %v1996_v15 = vmax.f32 %v1728_v14, 0.0 }
 0x5a9   :  { %v1688_v59 = vpop.f32.mrf.mxu1  ;;  %v1731_v10 = vpop.f32.mrf.mxu0 }
 0x5aa   :  { %v1689_v12 = vadd.f32 %v1688_v59, %v1321_v63  ;;  %v1732_v56 = vadd.f32 %v1731_v10, %v1329_v3  ;;  %v1995_v23 = vmax.f32 %v1687_v11, 0.0  ;;  %v1997_v34 = vmax.f32 %v1730_v9, 0.0  ;;  %v8126_v63 = vld [vmem:[%s10656_s13 + $0x160] sm:$0xff]  }
 0x5ab   :  { %v1690_v29 = vpop.f32.mrf.mxu1  ;;  %v1733_v21 = vpop.f32.mrf.mxu0  ;;  %v8127_v3 = vld [vmem:[%s10656_s13 + $0x1e0] sm:$0xff]  }
 0x5ac   :  { %v1691_v22 = vadd.f32 %v1690_v29, %v1325_v2  ;;  %v1734_v24 = vadd.f32 %v1733_v21, %v1333_v47  ;;  %v2010_v25 = vmax.f32 %v1689_v12, 0.0  ;;  %v2012_v7 = vmax.f32 %v1732_v56, 0.0  ;;  %v8124_v2 = vld [vmem:[%s10656_s13 + $0x128] sm:$0xff]   ;;  %v8128_v12 = vld [vmem:[%s10656_s13 + $0x120] sm:$0xff]   ;;  %v8130_v29 = vld [vmem:[%s10656_s13 + $0x158] sm:$0xff]  }
 0x5ad   :  { %v8125_v47 = vld [vmem:[%s10656_s13 + $0x1a8] sm:$0xff]   ;;  %v8129_v56 = vld [vmem:[%s10656_s13 + $0x1a0] sm:$0xff]   ;;  %v8131_v21 = vld [vmem:[%s10656_s13 + $0x1d8] sm:$0xff]  }
 0x5ae   :  { %v2011_v13 = vmax.f32 %v1691_v22, 0.0  ;;  %v2013_v31 = vmax.f32 %v1734_v24, 0.0  ;;  %v2026_v42 = vpack.c.bf16 %v2010_v25, %v1994_v55  ;;  %v2028_v49 = vpack.c.bf16 %v2012_v7, %v1996_v15  ;;  %v8132_v25 = vld [vmem:[%s10656_s13 + $0x118] sm:$0xff]  }
 0x5af   :  { %v8133_v7 = vld [vmem:[%s10656_s13 + $0x198] sm:$0xff]  }
 0x5b0   :  { %v2027_v36 = vpack.c.bf16 %v2011_v13, %v1995_v23  ;;  %v2029_v39 = vpack.c.bf16 %v2013_v31, %v1997_v34  ;;  %v8134_v23 = vld [vmem:[%s10656_s13 + $0x150] sm:$0xff]   ;;  %v9361_v13 = vsub.s32 4, %v8688_v32  ;;  %v9364_v31 = vsub.s32 6, %v8688_v32  ;;  %v8138_v32 = vld [vmem:[%s10656_s13 + $0x148] sm:$0xff]  }
 0x5b1   :  { %v9290_v50 = vpop.f32.mrf.mxu1  ;;  %v9292_v1 = vpop.f32.mrf.mxu0  ;;  %v8135_v34 = vld [vmem:[%s10656_s13 + $0x1d0] sm:$0xff]  }
 0x5b2   :  { %3103 = vmatprep.mubr.bf16.mxu1 %v2027_v36  ;;  %3144 = vmatprep.mubr.bf16.mxu0 %v2029_v39  ;;  %v8136_v36 = vld [vmem:[%s10656_s13 + $0x110] sm:$0xff]  }
 0x5b3   :  { %v1772_v20 = vpop.f32.mrf.mxu1  ;;  %v1815_v57 = vpop.f32.mrf.mxu0  ;;  %3104 = vmatmul.mubr.bf16.vlgmr.msra.gmra.mxu1 %v2026_v42  ;;  %3145 = vmatmul.mubr.bf16.vlgmr.msra.gmra.mxu0 %v2028_v49  ;;  %v8137_v39 = vld [vmem:[%s10656_s13 + $0x190] sm:$0xff]   ;;  %v1345_v42 = vrot.slane %v9268_v61, %v9364_v31 }
 0x5b4   :  { %7594 = vmatpush3.bf16.msra.mxu1 %v8116_v41  ;;  %7616 = vmatpush3.bf16.msra.mxu0 %v8117_v38  ;;  %v1773_v27 = vadd.f32 %v1772_v20, %v1341_v53  ;;  %v1816_v52 = vadd.f32 %v1815_v57, %v1349_v6  ;;  %v8139_v41 = vld [vmem:[%s10656_s13 + $0x1c8] sm:$0xff]   ;;  %v1337_v38 = vrot.slane %v9268_v61, %v9361_v13  ;;  %v9389_v49 = vld [vmem:[%s10655_s12 + $0x10] ss:$2 sm:$0xff] }
 0x5b5   :  { %v9310_v44 = vpop.f32.mrf.mxu1  ;;  %v9312_v51 = vpop.f32.mrf.mxu0  ;;  %7595 = vmatprep.subr.bf16.mxu1 %v8118_v8  ;;  %7617 = vmatprep.subr.bf16.mxu0 %v8119_v43  ;;  %v1357_v43 = vrot.slane %v9389_v49, %v9257_v48  ;;  %v8141_v61 = vld [vmem:[%s10656_s13 + $0x188] sm:$0xff]  }
 0x5b6   :  { %v1999_v4 = vmax.f32 %v1773_v27, 0.0  ;;  %v2001_v5 = vmax.f32 %v1816_v52, 0.0  ;;  %v1775_v20 = vadd.f32 %v9310_v44, %v1337_v38  ;;  %v1818_v57 = vadd.f32 %v9312_v51, %v1345_v42 }
 0x5b7   :  { %v1776_v26 = vpop.f32.mrf.mxu1  ;;  %v1819_v46 = vpop.f32.mrf.mxu0  ;;  %v1771_v27 = vadd.f32 %v9290_v50, %v1337_v38  ;;  %v1814_v44 = vadd.f32 %v9292_v1, %v1345_v42  ;;  %v8146_v50 = vld [vmem:[%s10656_s13 + $0x278] sm:$0xff]   ;;  %v8160_v38 = vld [vmem:[%s10656_s13 + $0x220] sm:$0xff]  }
 0x5b8   :  { %v1777_v62 = vadd.f32 %v1776_v26, %v1341_v53  ;;  %v1820_v0 = vadd.f32 %v1819_v46, %v1349_v6  ;;  %7596 = vmatpush3.bf16.msra.mxu1 %v8120_v28  ;;  %7618 = vmatpush3.bf16.msra.mxu0 %v8121_v58  ;;  %v8140_v6 = vld [vmem:[%s10656_s13 + $0x108] sm:$0xff]   ;;  %v1365_v28 = vrot.slane %v9389_v49, %v9260_v60  ;;  %v8142_v58 = vld [vmem:[%s10656_s13 + $0x140] sm:$0xff]   ;;  %v8147_v1 = vld [vmem:[%s10656_s13 + $0x2f8] sm:$0xff]  }
 0x5b9   :  { %7597 = vmatprep.subr.bf16.mxu1 %v8122_v45  ;;  %7619 = vmatprep.subr.bf16.mxu0 %v8123_v35  ;;  %v8143_v45 = vld [vmem:[%s10656_s13 + $0x1c0] sm:$0xff]  }
 0x5ba   :  { %v2015_v59 = vmax.f32 %v1777_v62, 0.0  ;;  %v2017_v10 = vmax.f32 %v1820_v0, 0.0  ;;  %v8144_v26 = vld [vmem:[%s10656_s13 + $0x100] sm:$0xff]   ;;  %v2014_v62 = vmax.f32 %v1775_v20, 0.0  ;;  %v2016_v0 = vmax.f32 %v1818_v57, 0.0  ;;  %v8165_v57 = vld [vmem:[%s10656_s13 + $0x298] sm:$0xff]  }
 0x5bb   :  { %v8145_v46 = vld [vmem:[%s10656_s13 + $0x180] sm:$0xff]  }
 0x5bc   :  { %v2031_v11 = vpack.c.bf16 %v2015_v59, %v1999_v4  ;;  %v2033_v9 = vpack.c.bf16 %v2017_v10, %v2001_v5  ;;  %7598 = vmatpush3.bf16.msra.mxu1 %v8124_v2  ;;  %7620 = vmatpush3.bf16.msra.mxu0 %v8125_v47  ;;  %v8148_v59 = vld [vmem:[%s10656_s13 + $0x238] sm:$0xff]  }
 0x5bd   :  { %v9338_v19 = vpop.f32.mrf.mxu1  ;;  %v9340_v14 = vpop.f32.mrf.mxu0  ;;  %7599 = vmatprep.subr.bf16.mxu1 %v8126_v63  ;;  %7621 = vmatprep.subr.bf16.mxu0 %v8127_v3  ;;  %v1998_v63 = vmax.f32 %v1771_v27, 0.0  ;;  %v2000_v3 = vmax.f32 %v1814_v44, 0.0  ;;  %v8169_v44 = vld [vmem:[%s10656_s13 + $0x290] sm:$0xff]  }
 0x5be   :  { %3185 = vmatprep.mubr.bf16.mxu1 %v2031_v11  ;;  %3226 = vmatprep.mubr.bf16.mxu0 %v2033_v9 }
 0x5bf   :  { %v1858_v22 = vpop.f32.mrf.mxu1  ;;  %v1901_v24 = vpop.f32.mrf.mxu0  ;;  %v2030_v10 = vpack.c.bf16 %v2014_v62, %v1998_v63  ;;  %v2032_v11 = vpack.c.bf16 %v2016_v0, %v2000_v3  ;;  %v8172_v0 = vld [vmem:[%s10656_s13 + $0x208] sm:$0xff]   ;;  %v8174_v63 = vld [vmem:[%s10656_s13 + $0x240] sm:$0xff]  }
 0x5c0   :  { %7600 = vmatpush3.bf16.msra.mxu1 %v8128_v12  ;;  %7622 = vmatpush3.bf16.msra.mxu0 %v8129_v56  ;;  %v1859_v51 = vadd.f32 %v1858_v22, %v1357_v43  ;;  %v1902_v2 = vadd.f32 %v1901_v24, %v1365_v28  ;;  %v8149_v12 = vld [vmem:[%s10656_s13 + $0x2b8] sm:$0xff]   ;;  %v8152_v24 = vld [vmem:[%s10656_s13 + $0x230] sm:$0xff]  }
 0x5c1   :  { %7601 = vmatprep.subr.bf16.mxu1 %v8130_v29  ;;  %7623 = vmatprep.subr.bf16.mxu0 %v8131_v21  ;;  %v9366_v55 = vpop.f32.mrf.mxu1  ;;  %v9368_v15 = vpop.f32.mrf.mxu0  ;;  %v8150_v29 = vld [vmem:[%s10656_s13 + $0x270] sm:$0xff]  }
 0x5c2   :  { %v2003_v5 = vmax.f32 %v1859_v51, 0.0  ;;  %v2005_v9 = vmax.f32 %v1902_v2, 0.0  ;;  %v8151_v21 = vld [vmem:[%s10656_s13 + $0x2f0] sm:$0xff]   ;;  %v8171_v51 = vld [vmem:[%s10656_s13 + $0x2c8] sm:$0xff]  }
 0x5c3   :  { %v1862_v8 = vpop.f32.mrf.mxu1  ;;  %v1905_v53 = vpop.f32.mrf.mxu0 }
 0x5c4   :  { %7602 = vmatpush3.bf16.msra.mxu1 %v8132_v25  ;;  %7624 = vmatpush3.bf16.msra.mxu0 %v8133_v7  ;;  %v1863_v35 = vadd.f32 %v1862_v8, %v1357_v43  ;;  %v1906_v52 = vadd.f32 %v1905_v53, %v1365_v28  ;;  %v8153_v25 = vld [vmem:[%s10656_s13 + $0x2b0] sm:$0xff]   ;;  %v8154_v7 = vld [vmem:[%s10656_s13 + $0x268] sm:$0xff]   ;;  %v8161_v8 = vld [vmem:[%s10656_s13 + $0x2a0] sm:$0xff]  }
 0x5c5   :  { %7603 = vmatprep.subr.bf16.mxu1 %v8134_v23  ;;  %7625 = vmatprep.subr.bf16.mxu0 %v8135_v34  ;;  %v8155_v23 = vld [vmem:[%s10656_s13 + $0x2e8] sm:$0xff]   ;;  %v8162_v43 = vld [vmem:[%s10656_s13 + $0x258] sm:$0xff]   ;;  %v8166_v28 = vld [vmem:[%s10656_s13 + $0x250] sm:$0xff]  }
 0x5c6   :  { %v2019_v47 = vmax.f32 %v1863_v35, 0.0  ;;  %v2021_v4 = vmax.f32 %v1906_v52, 0.0  ;;  %v8156_v34 = vld [vmem:[%s10656_s13 + $0x228] sm:$0xff]   ;;  %v8163_v53 = vld [vmem:[%s10656_s13 + $0x2d8] sm:$0xff]   ;;  %v8168_v35 = vld [vmem:[%s10656_s13 + $0x210] sm:$0xff]  }
 0x5c7   :  { %v8170_v52 = vld [vmem:[%s10656_s13 + $0x248] sm:$0xff]  }
 0x5c8   :  { %7604 = vmatpush3.bf16.msra.mxu1 %v8136_v36  ;;  %7626 = vmatpush3.bf16.msra.mxu0 %v8137_v39  ;;  %v2035_v56 = vpack.c.bf16 %v2019_v47, %v2003_v5  ;;  %v2037_v22 = vpack.c.bf16 %v2021_v4, %v2005_v9  ;;  %v8157_v36 = vld [vmem:[%s10656_s13 + $0x2a8] sm:$0xff]   ;;  %v8158_v39 = vld [vmem:[%s10656_s13 + $0x260] sm:$0xff]   ;;  %v1381_v4 = vrot.slane %v9389_v49, %v9282_v18 }
 0x5c9   :  { %7605 = vmatprep.subr.bf16.mxu1 %v8138_v32  ;;  %7627 = vmatprep.subr.bf16.mxu0 %v8139_v41  ;;  %v8159_v32 = vld [vmem:[%s10656_s13 + $0x2e0] sm:$0xff]   ;;  %v9459_v41 = vpop.f32.mrf.mxu1  ;;  %v9464_v42 = vpop.f32.mrf.mxu0  ;;  %v8173_v47 = vld [vmem:[%s10656_s13 + $0x288] sm:$0xff]  }
 0x5ca   :  { %v8176_v9 = vld [vmem:[%s10656_s13 + $0x200] sm:$0xff]  }
 0x5cb   :  { %v1987_v20 = vpop.f32.mrf.mxu0 }
 0x5cc   :  { %7606 = vmatpush3.bf16.msra.mxu1 %v8140_v6  ;;  %7628 = vmatpush3.bf16.msra.mxu0 %v8141_v61  ;;  %v1944_v6 = vpop.f32.mrf.mxu1  ;;  %v8164_v61 = vld [vmem:[%s10656_s13 + $0x218] sm:$0xff]  }
 0x5cd   :  { %7607 = vmatprep.subr.bf16.mxu1 %v8142_v58  ;;  %7629 = vmatprep.subr.bf16.mxu0 %v8143_v45  ;;  %v8167_v58 = vld [vmem:[%s10656_s13 + $0x2d0] sm:$0xff]   ;;  %v9492_v27 = vpop.f32.mrf.mxu0 }
 0x5ce   :  { %v9487_v45 = vpop.f32.mrf.mxu1 }
 0x5d0   :  { %7608 = vmatpush3.bf16.msra.mxu1 %v8144_v26  ;;  %7630 = vmatpush3.bf16.msra.mxu0 %v8145_v46  ;;  %v1353_v26 = vrot.slane %v9389_v49, %v8698_v40  ;;  %v1361_v46 = vrot.slane %v9389_v49, %v9263_v37  ;;  %v1948_v62 = vpop.f32.mrf.mxu1 }
 0x5d1   :  { %7637 = vmatprep.subr.bf16.mxu1 %v8146_v50  ;;  %7659 = vmatprep.subr.bf16.mxu0 %v8147_v1  ;;  %v1373_v50 = vrot.slane %v9389_v49, %v9279_v30  ;;  %v1991_v1 = vpop.f32.mrf.mxu0 }
 0x5d2   :  { %v1861_v2 = vadd.f32 %v9366_v55, %v1353_v26  ;;  %v1904_v3 = vadd.f32 %v9368_v15, %v1361_v46  ;;  %v8175_v55 = vld [vmem:[%s10656_s13 + $0x2c0] sm:$0xff]   ;;  %v1857_v5 = vadd.f32 %v9338_v19, %v1353_v26  ;;  %v8178_v19 = vld [vmem:[%s10656_s13 + $0x378] sm:$0xff]  }
 0x5d3   :  { %3186 = vmatmul.mubr.bf16.vlgmr.msra.gmra.mxu1 %v2030_v10  ;;  %3227 = vmatmul.mubr.bf16.vlgmr.msra.gmra.mxu0 %v2032_v11  ;;  %v1900_v10 = vadd.f32 %v9340_v14, %v1361_v46  ;;  %v1992_v11 = vadd.f32 %v1991_v1, %v1381_v4  ;;  %v1988_v14 = vadd.f32 %v1987_v20, %v1381_v4  ;;  %v8185_v20 = vld [vmem:[%s10656_s13 + $0x3b0] sm:$0xff]   ;;  %v8193_v26 = vld [vmem:[%s10656_s13 + $0x3a0] sm:$0xff]   ;;  %v8194_v46 = vld [vmem:[%s10656_s13 + $0x358] sm:$0xff]  }
 0x5d4   :  { %7638 = vmatpush3.bf16.msra.mxu1 %v8148_v59  ;;  %3267 = vmatprep.mubr.bf16.mxu1 %v2035_v56  ;;  %v1949_v59 = vadd.f32 %v1948_v62, %v1373_v50  ;;  %v2018_v15 = vmax.f32 %v1861_v2, 0.0  ;;  %v8177_v56 = vld [vmem:[%s10656_s13 + $0x280] sm:$0xff]   ;;  %v8195_v62 = vld [vmem:[%s10656_s13 + $0x3d8] sm:$0xff]   ;;  %v8199_v1 = vld [vmem:[%s10656_s13 + $0x3d0] sm:$0xff]  }
 0x5d5   :  { %7660 = vmatpush3.bf16.msra.mxu0 %v8149_v12  ;;  %3308 = vmatprep.mubr.bf16.mxu0 %v2037_v22  ;;  %v1945_v12 = vadd.f32 %v1944_v6, %v1373_v50  ;;  %v2002_v22 = vmax.f32 %v1857_v5, 0.0  ;;  %v8197_v2 = vld [vmem:[%s10656_s13 + $0x398] sm:$0xff]   ;;  %v8198_v50 = vld [vmem:[%s10656_s13 + $0x350] sm:$0xff]   ;;  %v8203_v4 = vld [vmem:[%s10656_s13 + $0x3c8] sm:$0xff]   ;;  %v1377_v5 = vrot.slane %v9389_v49, %v9364_v31 }
 0x5d6   :  { %7639 = vmatprep.subr.bf16.mxu1 %v8150_v29  ;;  %7661 = vmatprep.subr.bf16.mxu0 %v8151_v21  ;;  %v2020_v29 = vmax.f32 %v1904_v3, 0.0  ;;  %v8179_v21 = vld [vmem:[%s10656_s13 + $0x3f8] sm:$0xff]   ;;  %v8202_v3 = vld [vmem:[%s10656_s13 + $0x348] sm:$0xff]  }
 0x5d8   :  { %7640 = vmatpush3.bf16.msra.mxu1 %v8152_v24  ;;  %v2023_v24 = vmax.f32 %v1949_v59, 0.0  ;;  %v8204_v59 = vld [vmem:[%s10656_s13 + $0x308] sm:$0xff]  }
 0x5d9   :  { %7662 = vmatpush3.bf16.msra.mxu0 %v8153_v25  ;;  %7641 = vmatprep.subr.bf16.mxu1 %v8154_v7  ;;  %v2004_v25 = vmax.f32 %v1900_v10, 0.0  ;;  %v2025_v7 = vmax.f32 %v1992_v11, 0.0  ;;  %v8205_v11 = vld [vmem:[%s10656_s13 + $0x388] sm:$0xff]  }
 0x5da   :  { %7663 = vmatprep.subr.bf16.mxu0 %v8155_v23  ;;  %v8180_v23 = vld [vmem:[%s10656_s13 + $0x338] sm:$0xff]  }
 0x5dc   :  { %7642 = vmatpush3.bf16.msra.mxu1 %v8156_v34  ;;  %v2034_v34 = vpack.c.bf16 %v2018_v15, %v2002_v22  ;;  %v1990_v15 = vadd.f32 %v9492_v27, %v1377_v5  ;;  %v8209_v27 = vld [vmem:[%s10656_s13 + $0x380] sm:$0xff]  }
 0x5dd   :  { %7664 = vmatpush3.bf16.msra.mxu0 %v8157_v36  ;;  %7643 = vmatprep.subr.bf16.mxu1 %v8158_v39  ;;  %v2007_v36 = vmax.f32 %v1945_v12, 0.0  ;;  %v8181_v39 = vld [vmem:[%s10656_s13 + $0x3b8] sm:$0xff]  }
 0x5de   :  { %7665 = vmatprep.subr.bf16.mxu0 %v8159_v32  ;;  %v2036_v32 = vpack.c.bf16 %v2020_v29, %v2004_v25  ;;  %v2024_v29 = vmax.f32 %v1990_v15, 0.0 }
 0x5e0   :  { %7644 = vmatpush3.bf16.msra.mxu1 %v8160_v38  ;;  %v2009_v38 = vmax.f32 %v1988_v14, 0.0 }
 0x5e1   :  { %7666 = vmatpush3.bf16.msra.mxu0 %v8161_v8  ;;  %7645 = vmatprep.subr.bf16.mxu1 %v8162_v43  ;;  %v8182_v8 = vld [vmem:[%s10656_s13 + $0x370] sm:$0xff]   ;;  %v2039_v43 = vpack.c.bf16 %v2023_v24, %v2007_v36 }
 0x5e2   :  { %7667 = vmatprep.subr.bf16.mxu0 %v8163_v53  ;;  %v8183_v53 = vld [vmem:[%s10656_s13 + $0x3f0] sm:$0xff]   ;;  %v2041_v6 = vpack.c.bf16 %v2025_v7, %v2009_v38 }
 0x5e4   :  { %7646 = vmatpush3.bf16.msra.mxu1 %v8164_v61  ;;  %v8184_v61 = vld [vmem:[%s10656_s13 + $0x330] sm:$0xff]  }
 0x5e5   :  { %7668 = vmatpush3.bf16.msra.mxu0 %v8165_v57  ;;  %7647 = vmatprep.subr.bf16.mxu1 %v8166_v28  ;;  %v8186_v57 = vld [vmem:[%s10656_s13 + $0x368] sm:$0xff]  }
 0x5e6   :  { %7669 = vmatprep.subr.bf16.mxu0 %v8167_v58  ;;  %v8187_v28 = vld [vmem:[%s10656_s13 + $0x3e8] sm:$0xff]  }
 0x5e7   :  { %v8188_v58 = vld [vmem:[%s10656_s13 + $0x328] sm:$0xff]  }
 0x5e8   :  { %7648 = vmatpush3.bf16.msra.mxu1 %v8168_v35  ;;  %v8189_v35 = vld [vmem:[%s10656_s13 + $0x3a8] sm:$0xff]  }
 0x5e9   :  { %7670 = vmatpush3.bf16.msra.mxu0 %v8169_v44  ;;  %7649 = vmatprep.subr.bf16.mxu1 %v8170_v52  ;;  %v8190_v44 = vld [vmem:[%s10656_s13 + $0x360] sm:$0xff]  }
 0x5ea   :  { %7671 = vmatprep.subr.bf16.mxu0 %v8171_v51  ;;  %v8191_v52 = vld [vmem:[%s10656_s13 + $0x3e0] sm:$0xff]  }
 0x5eb   :  { %v8192_v51 = vld [vmem:[%s10656_s13 + $0x320] sm:$0xff]  }
 0x5ec   :  { %7650 = vmatpush3.bf16.msra.mxu1 %v8172_v0  ;;  %v8196_v0 = vld [vmem:[%s10656_s13 + $0x318] sm:$0xff]  }
 0x5ed   :  { %7672 = vmatpush3.bf16.msra.mxu0 %v8173_v47  ;;  %7651 = vmatprep.subr.bf16.mxu1 %v8174_v63  ;;  %v8200_v47 = vld [vmem:[%s10656_s13 + $0x310] sm:$0xff]  }
 0x5ee   :  { %7673 = vmatprep.subr.bf16.mxu0 %v8175_v55  ;;  %v8201_v63 = vld [vmem:[%s10656_s13 + $0x390] sm:$0xff]   ;;  %v1369_v55 = vrot.slane %v9389_v49, %v9361_v13  ;;  %v8207_v49 = vld [vmem:[%s10656_s13 + $0x3c0] sm:$0xff]  }
 0x5f0   :  { %7652 = vmatpush3.bf16.msra.mxu1 %v8176_v9  ;;  %v1947_v10 = vadd.f32 %v9487_v45, %v1369_v55  ;;  %v8206_v9 = vld [vmem:[%s10656_s13 + $0x340] sm:$0xff]   ;;  %v1943_v12 = vadd.f32 %v9459_v41, %v1369_v55  ;;  %v1986_v45 = vadd.f32 %v9464_v42, %v1377_v5 }
 0x5f1   :  { %7674 = vmatpush3.bf16.msra.mxu0 %v8177_v56  ;;  %7681 = vmatprep.subr.bf16.mxu1 %v8178_v19  ;;  %v8208_v56 = vld [vmem:[%s10656_s13 + $0x300] sm:$0xff]  }
 0x5f2   :  { %7703 = vmatprep.subr.bf16.mxu0 %v8179_v21  ;;  %v2022_v19 = vmax.f32 %v1947_v10, 0.0  ;;  %v2006_v14 = vmax.f32 %v1943_v12, 0.0  ;;  %v2008_v21 = vmax.f32 %v1986_v45, 0.0 }
 0x5f3   :  { %3268 = vmatmul.mubr.bf16.vlgmr.msra.gmra.mxu1 %v2034_v34 }
 0x5f4   :  { %3309 = vmatmul.mubr.bf16.vlgmr.msra.gmra.mxu0 %v2036_v32  ;;  %7682 = vmatpush3.bf16.msra.mxu1 %v8180_v23  ;;  %v2038_v41 = vpack.c.bf16 %v2022_v19, %v2006_v14  ;;  %v2040_v42 = vpack.c.bf16 %v2024_v29, %v2008_v21 }
 0x5f5   :  { %3349 = vmatprep.mubr.bf16.mxu1 %v2039_v43  ;;  %7704 = vmatpush3.bf16.msra.mxu0 %v8181_v39 }
 0x5f6   :  { %3390 = vmatprep.mubr.bf16.mxu0 %v2041_v6  ;;  %7683 = vmatprep.subr.bf16.mxu1 %v8182_v8 }
 0x5f7   :  { %7705 = vmatprep.subr.bf16.mxu0 %v8183_v53 }
 0x5f8   :  { %7684 = vmatpush3.bf16.msra.mxu1 %v8184_v61 }
 0x5f9   :  { %7706 = vmatpush3.bf16.msra.mxu0 %v8185_v20  ;;  %7685 = vmatprep.subr.bf16.mxu1 %v8186_v57  ;;  %v6850_v57 = vld [vmem:[%s10657_s14] ss:$0 sm:$0xff] }
 0x5fa   :  { %7707 = vmatprep.subr.bf16.mxu0 %v8187_v28 }
 0x5fc   :  { %7686 = vmatpush3.bf16.msra.mxu1 %v8188_v58 }
 0x5fd   :  { %7708 = vmatpush3.bf16.msra.mxu0 %v8189_v35  ;;  %7687 = vmatprep.subr.bf16.mxu1 %v8190_v44 }
 0x5fe   :  { %7709 = vmatprep.subr.bf16.mxu0 %v8191_v52 }
 0x600   :  { %7688 = vmatpush3.bf16.msra.mxu1 %v8192_v51 }
 0x601   :  { %7710 = vmatpush3.bf16.msra.mxu0 %v8193_v26  ;;  %7689 = vmatprep.subr.bf16.mxu1 %v8194_v46 }
 0x602   :  { %7711 = vmatprep.subr.bf16.mxu0 %v8195_v62 }
 0x604   :  { %7690 = vmatpush3.bf16.msra.mxu1 %v8196_v0 }
 0x605   :  { %7712 = vmatpush3.bf16.msra.mxu0 %v8197_v2  ;;  %7691 = vmatprep.subr.bf16.mxu1 %v8198_v50 }
 0x606   :  { %7713 = vmatprep.subr.bf16.mxu0 %v8199_v1 }
 0x608   :  { %7692 = vmatpush3.bf16.msra.mxu1 %v8200_v47 }
 0x609   :  { %7714 = vmatpush3.bf16.msra.mxu0 %v8201_v63  ;;  %7693 = vmatprep.subr.bf16.mxu1 %v8202_v3 }
 0x60a   :  { %7715 = vmatprep.subr.bf16.mxu0 %v8203_v4 }
 0x60c   :  { %7694 = vmatpush3.bf16.msra.mxu1 %v8204_v59 }
 0x60d   :  { %7716 = vmatpush3.bf16.msra.mxu0 %v8205_v11  ;;  %7695 = vmatprep.subr.bf16.mxu1 %v8206_v9 }
 0x60e   :  { %7717 = vmatprep.subr.bf16.mxu0 %v8207_v49 }
 0x610   :  { %7696 = vmatpush3.bf16.msra.mxu1 %v8208_v56 }
 0x611   :  { %7718 = vmatpush3.bf16.msra.mxu0 %v8209_v27 }
 0x613   :  { %3350 = vmatmul.mubr.bf16.vlgmr.msra.gmra.mxu1 %v2038_v41 }
 0x614   :  { %3391 = vmatmul.mubr.bf16.vlgmr.msra.gmra.mxu0 %v2040_v42 }
 0x673   :  { %v7565_v22 = vpop.f32.mrf.mxu1  ;;  %v7587_v24 = vpop.f32.mrf.mxu0 }
 0x675   :  { %v7566_v25 = vpop.f32.mrf.mxu1  ;;  %v7588_v7 = vpop.f32.mrf.mxu0 }
 0x676   :  { %v7567_v20 = vadd.f32 %v7566_v25, %v7565_v22  ;;  %v7589_v26 = vadd.f32 %v7588_v7, %v7587_v24 }
 0x677   :  { %v7568_v23 = vpop.f32.mrf.mxu1  ;;  %v7590_v34 = vpop.f32.mrf.mxu0 }
 0x678   :  { %v3106_v35 = vadd.f32 %v7567_v20, %v6850_v57 }
 0x679   :  { %v7569_v36 = vpop.f32.mrf.mxu1  ;;  %v7591_v32 = vpop.f32.mrf.mxu0 }
 0x67a   :  { %v7570_v44 = vadd.f32 %v7569_v36, %v7568_v23  ;;  %v3147_v62 = vadd.f32 %v7589_v26, %v3106_v35  ;;  %v7592_v1 = vadd.f32 %v7591_v32, %v7590_v34  ;;  %v6981_v26 = vld [vmem:[%s10648_s5 + $0x28] sm:$0xff] }
 0x67c   :  { %v3109_v0 = vadd.f32 %v7570_v44, %v6850_v57 }
 0x67e   :  { %v3150_v3 = vadd.f32 %v7592_v1, %v3109_v0 }
 0x693   :  { %v7609_v39 = vpop.f32.mrf.mxu1  ;;  %v7631_v38 = vpop.f32.mrf.mxu0 }
 0x695   :  { %v7610_v8 = vpop.f32.mrf.mxu1  ;;  %v7632_v43 = vpop.f32.mrf.mxu0 }
 0x696   :  { %v7611_v46 = vadd.f32 %v7610_v8, %v7609_v39  ;;  %v7633_v4 = vadd.f32 %v7632_v43, %v7631_v38 }
 0x697   :  { %v7612_v53 = vpop.f32.mrf.mxu1  ;;  %v7634_v6 = vpop.f32.mrf.mxu0 }
 0x698   :  { %v3188_v47 = vadd.f32 %v7611_v46, %v3147_v62  ;;  %v8502_v46 = vld [vmem:[%s10647_s4 + $0x20] sm:$0xf] }
 0x699   :  { %v7613_v61 = vpop.f32.mrf.mxu1  ;;  %v7635_v58 = vpop.f32.mrf.mxu0 }
 0x69a   :  { %v7614_v63 = vadd.f32 %v7613_v61, %v7612_v53  ;;  %v3229_v10 = vadd.f32 %v7633_v4, %v3188_v47  ;;  %v7636_v9 = vadd.f32 %v7635_v58, %v7634_v6 }
 0x69c   :  { %v3191_v11 = vadd.f32 %v7614_v63, %v3150_v3 }
 0x69e   :  { %v3232_v56 = vadd.f32 %v7636_v9, %v3191_v11 }
 0x6b3   :  { %v7653_v28 = vpop.f32.mrf.mxu1 }
 0x6b4   :  { %v7675_v52 = vpop.f32.mrf.mxu0 }
 0x6b5   :  { %v7654_v51 = vpop.f32.mrf.mxu1 }
 0x6b6   :  { %v7676_v2 = vpop.f32.mrf.mxu0  ;;  %v7655_v55 = vadd.f32 %v7654_v51, %v7653_v28  ;;  %v6982_v51 = vld [vmem:[%s10648_s5 + $0x30] sm:$0xff] }
 0x6b7   :  { %v7656_v50 = vpop.f32.mrf.mxu1  ;;  %v7677_v19 = vadd.f32 %v7676_v2, %v7675_v52  ;;  %v6984_v52 = vld [vmem:[%s10648_s5 + $0x40] sm:$0xff] }
 0x6b8   :  { %v7678_v5 = vpop.f32.mrf.mxu0  ;;  %v3270_v15 = vadd.f32 %v7655_v55, %v3229_v10 }
 0x6b9   :  { %v7657_v59 = vpop.f32.mrf.mxu1 }
 0x6ba   :  { %v7658_v49 = vadd.f32 %v7657_v59, %v7656_v50  ;;  %v7679_v12 = vpop.f32.mrf.mxu0  ;;  %v3311_v14 = vadd.f32 %v7677_v19, %v3270_v15 }
 0x6bb   :  { %v7680_v24 = vadd.f32 %v7679_v12, %v7678_v5 }
 0x6bc   :  { %v3273_v21 = vadd.f32 %v7658_v49, %v3232_v56  ;;  %v6979_v49 = vld [vmem:[%s10658_s15] ss:$0 sm:$0xff] }
 0x6be   :  { %v3314_v36 = vadd.f32 %v7680_v24, %v3273_v21  ;;  %v8505_v24 = vld [vmem:[%s10647_s4 + $0x8] sm:$0xff] }
 0x6d3   :  { %v7697_v45 = vpop.f32.mrf.mxu1 }
 0x6d4   :  { %v7719_v27 = vpop.f32.mrf.mxu0 }
 0x6d5   :  { %v7698_v29 = vpop.f32.mrf.mxu1 }
 0x6d6   :  { %v7699_v41 = vadd.f32 %v7698_v29, %v7697_v45  ;;  %v7720_v42 = vpop.f32.mrf.mxu0  ;;  %v6980_v45 = vld [vmem:[%s10659_s16] ss:$0 sm:$0xff] }
 0x6d7   :  { %v7700_v22 = vpop.f32.mrf.mxu1  ;;  %v7721_v7 = vadd.f32 %v7720_v42, %v7719_v27  ;;  %v8503_v42 = vld [vmem:[%s10647_s4 + $0x18] sm:$0xff] }
 0x6d8   :  { %v3352_v25 = vadd.f32 %v7699_v41, %v3311_v14  ;;  %v7722_v23 = vpop.f32.mrf.mxu0 }
 0x6d9   :  { %v7701_v34 = vpop.f32.mrf.mxu1 }
 0x6da   :  { %v3393_v39 = vadd.f32 %v7721_v7, %v3352_v25  ;;  %v7702_v32 = vadd.f32 %v7701_v34, %v7700_v22  ;;  %v7723_v38 = vpop.f32.mrf.mxu0  ;;  %v8504_v22 = vld [vmem:[%s10647_s4 + $0x10] sm:$0xff]  ;;  %v8506_v25 = vld [vmem:[%s10647_s4] sm:$0xff] }
 0x6db   :  { %v7724_v53 = vadd.f32 %v7723_v38, %v7722_v23  ;;  %v6986_v7 = vld [vmem:[%s10649_s6 + $0x1] ss:$0 sm:$0xff] }
 0x6dc   :  { %v3399_v8 = vadd.f32 %v3393_v39, %v9042_v17  ;;  %v3355_v43 = vadd.f32 %v7702_v32, %v3314_v36  ;;  %v6985_v17 = vld [vmem:[%s10648_s5 + $0x48] sm:$0xf] }
 0x6dd   :  { %8001 = vmatprep.subr.msk.mxu1 %vm181_vm2, %v6985_v17 }
 0x6de   :  { %v3396_v6 = vadd.f32 %v7724_v53, %v3355_v43  ;;  %v3403_v61 = vsel %vm174_vm3, %v3399_v8, 0.0  ;;  %v3411_v20 = vmul.f32 %v3399_v8, %v3399_v8  ;;  %8002 = vmatpush3.msk.msra.mxu1 %vm181_vm2, %v6985_v17 }
 0x6df   :  { %3404 = vadd.xlane.f32.xlu1 %v3403_v61  ;;  %8003 = vmatprep.subr.mxu1 %v6984_v52 }
 0x6e0   :  { %v3400_v57 = vadd.f32 %v3396_v6, %v9044_v16  ;;  %v3413_v58 = vsel %vm174_vm3, %v3411_v20, 0.0  ;;  %v6983_v16 = vld [vmem:[%s10648_s5 + $0x38] sm:$0xff]  ;;  %8004 = vmatpush3.msra.mxu1 %v6984_v52 }
 0x6e1   :  { %8005 = vmatprep.subr.mxu1 %v6983_v16 }
 0x6e2   :  { %v3406_v28 = vsel %vm174_vm3, %v3400_v57, 0.0  ;;  %v3412_v35 = vmul.f32 %v3400_v57, %v3400_v57  ;;  %8006 = vmatpush3.msra.mxu1 %v6983_v16 }
 0x6e3   :  { %3407 = vadd.xlane.f32.xlu0 %v3406_v28  ;;  %3414 = vadd.xlane.f32.xlu1 %v3413_v58 }
 0x6e4   :  { %v3416_v44 = vsel %vm174_vm3, %v3412_v35, 0.0  ;;  %8007 = vmatprep.subr.mxu1 %v6982_v51 }
 0x6e5   :  { %8008 = vmatpush3.msra.mxu1 %v6982_v51 }
 0x6e6   :  { %8009 = vmatprep.subr.mxu1 %v6981_v26 }
 0x6e7   :  { %3417 = vadd.xlane.f32.xlu0 %v3416_v44  ;;  %8010 = vmatpush3.msra.mxu1 %v6981_v26 }
 0x6e8   :  { %8014 = vmatprep.subr.msk.mxu1 %vm181_vm2, %v8502_v46 }
 0x768   :  { %v3405_v62 = vpop.xlane.xlu1 %3404 }
 0x769   :  { %v3409_v0 = vmul.f32 0.027777778, %v3405_v62 }
 0x76b   :  { %v3421_v1 = vmul.f32 %v3409_v0, %v3409_v0  ;;  %v3425_v9 = vsub.f32 %v3399_v8, %v3409_v0 }
 0x76c   :  { %v3408_v2 = vpop.xlane.xlu0 %3407  ;;  %v3415_v50 = vpop.xlane.xlu1 %3414 }
 0x76d   :  { %v3410_v47 = vmul.f32 0.027777778, %v3408_v2  ;;  %v3419_v63 = vmul.f32 0.027777778, %v3415_v50 }
 0x76f   :  { %v3423_v3 = vsub.f32 %v3419_v63, %v3421_v1  ;;  %v3422_v55 = vmul.f32 %v3410_v47, %v3410_v47  ;;  %v3426_v56 = vsub.f32 %v3400_v57, %v3410_v47 }
 0x770   :  { %v3418_v4 = vpop.xlane.xlu0 %3417 }
 0x771   :  { %v3427_v5 = vadd.f32 1e-05, %v3423_v3  ;;  %v3420_v59 = vmul.f32 0.027777778, %v3418_v4 }
 0x773   :  { %8426 = vrsqrt.f32 %v3427_v5  ;;  %v3424_v10 = vsub.f32 %v3420_v59, %v3422_v55 }
 0x775   :  { %v3428_v11 = vadd.f32 1e-05, %v3424_v10 }
 0x777   :  { %8428 = vrsqrt.f32 %v3428_v11 }
 0x780   :  { %v8427_v15 = vpop.eup %8426 }
 0x781   :  { %v3431_v12 = vmul.f32 %v8427_v15, %v3425_v9 }
 0x783   :  { %v3437_v19 = vmul.f32 %v6979_v49, %v3431_v12 }
 0x784   :  { %v8429_v27 = vpop.eup %8428 }
 0x785   :  { %v3432_v29 = vmul.f32 %v8429_v27, %v3426_v56  ;;  %v9673_v14 = vadd.f32 %v6980_v45, %v3437_v19 }
 0x787   :  { %v3438_v21 = vmul.f32 %v6979_v49, %v3432_v29  ;;  %8011 = vmatprep.mubr.msk.f32.mxu1 %vm174_vm3, %v9673_v14 }
 0x789   :  { %v9677_v41 = vadd.f32 %v6980_v45, %v3438_v21 }
 0x78b   :  { %8012 = vmatmul.mubr.msk.f32.vlgmr.msra.gmra.mxu1 %vm174_vm3, %v9677_v41 }
 0x78c   :  { %8015 = vmatpush3.msk.msra.mxu1 %vm181_vm2, %v8502_v46 }
 0x78d   :  { %8016 = vmatprep.subr.mxu1 %v8503_v42 }
 0x78e   :  { %8017 = vmatpush3.msra.mxu1 %v8503_v42 }
 0x78f   :  { %8018 = vmatprep.subr.mxu1 %v8504_v22 }
 0x790   :  { %8019 = vmatpush3.msra.mxu1 %v8504_v22 }
 0x791   :  { %8020 = vmatprep.subr.mxu1 %v8505_v24 }
 0x792   :  { %8021 = vmatpush3.msra.mxu1 %v8505_v24 }
 0x793   :  { %8022 = vmatprep.subr.mxu1 %v8506_v25 }
 0x794   :  { %8023 = vmatpush3.msra.mxu1 %v8506_v25 }
 0x84b   :  { %v8013_v23 = vpop.f32.mrf.mxu1 }
 0x84c   :  { %v3537_v34 = vadd.f32 %v8013_v23, %v6986_v7 }
 0x84d   :  { %v3531_v36 = vpop.f32.mrf.mxu1 }
 0x84e   :  { %v3532_v39 = vadd.f32 %v6986_v7, %v3531_v36  ;;  %3722 = vrot.lane.b32.xlu0 %v3537_v34, %s8530_s27  ;;  %v3598_v26 = vrot.slane %v3537_v34, %v8691_v33  ;;  %v3591_v47 = vcombine.high %v3537_v34, %v3537_v34 }
 0x850   :  { %3720 = vrot.lane.b32.xlu1 %v3532_v39, %s8530_s27  ;;  %v3549_v32 = vrot.slane %v3532_v39, %v8691_v33  ;;  %v3542_v8 = vcombine.high %v3532_v39, %v3532_v39  ;;  %v3606_v63 = vcombine.high %v3598_v26, %v3598_v26  ;;  %v3614_v55 = vrot.slane %v3598_v26, %v8691_v33 }
 0x851   :  { %v3605_v11 = vrot.slane %v3591_v47, %v8691_v33 }
 0x852   :  { %v3557_v38 = vcombine.high %v3549_v32, %v3549_v32  ;;  %v3565_v43 = vrot.slane %v3549_v32, %v8691_v33  ;;  %v3556_v6 = vrot.slane %v3542_v8, %v8691_v33  ;;  %v3628_v49 = vrot.slane %v3606_v63, %v8691_v33 }
 0x853   :  { %v3675_v12 = vrot.slane %v3614_v55, %v8698_v40  ;;  %v3636_v45 = vcombine.high %v3614_v55, %v3614_v55  ;;  %v3607_v27 = vcombine.high %v3605_v11, %v3605_v11  ;;  %v3621_v22 = vrot.slane %v3605_v11, %v8691_v33 }
 0x854   :  { %4239 = vrot.lane.b32.xlu1 %v3532_v39, %s8529_s26  ;;  %v3579_v53 = vrot.slane %v3557_v38, %v8691_v33  ;;  %v3587_v61 = vcombine.high %v3565_v43, %v3565_v43  ;;  %v3643_v20 = vrot.slane %v3565_v43, %v8698_v40  ;;  %v3558_v28 = vcombine.high %v3556_v6, %v3556_v6 }
 0x855   :  { %v3572_v16 = vrot.slane %v3556_v6, %v8691_v33  ;;  %v3679_v29 = vrot.slane %v3628_v49, %v8698_v40  ;;  %v3638_v21 = vcombine.high %v3628_v49, %v3628_v49  ;;  %v3683_v42 = vrot.slane %v3636_v45, %v8698_v40  ;;  %v7008_v45 = vld [vmem:[%s10650_s7 + $0x30] sm:$0xff] }
 0x856   :  { %v3647_v57 = vrot.slane %v3579_v53, %v8698_v40  ;;  %v3589_v35 = vcombine.high %v3579_v53, %v3579_v53  ;;  %v3651_v52 = vrot.slane %v3587_v61, %v8698_v40  ;;  %v3586_v62 = vrot.slane %v3558_v28, %v8691_v33 }
 0x857   :  { %v3659_v0 = vrot.slane %v3572_v16, %v8698_v40  ;;  %v3588_v2 = vcombine.high %v3572_v16, %v3572_v16  ;;  %v3687_v7 = vrot.slane %v3638_v21, %v8698_v40  ;;  %v3635_v23 = vrot.slane %v3607_v27, %v8691_v33 }
 0x858   :  { %4241 = vrot.lane.b32.xlu1 %v3537_v34, %s8529_s26  ;;  %v3655_v46 = vrot.slane %v3589_v35, %v8698_v40  ;;  %v3663_v3 = vrot.slane %v3586_v62, %v8698_v40  ;;  %v3590_v4 = vcombine.high %v3586_v62, %v3586_v62  ;;  %v3691_v34 = vrot.slane %v3621_v22, %v8698_v40 }
 0x859   :  { %v3667_v5 = vrot.slane %v3588_v2, %v8698_v40  ;;  %v3637_v36 = vcombine.high %v3621_v22, %v3621_v22  ;;  %v3695_v38 = vrot.slane %v3635_v23, %v8698_v40  ;;  %v3639_v8 = vcombine.high %v3635_v23, %v3635_v23  ;;  %v7011_v2 = vld [vmem:[%s10650_s7 + $0x48] sm:$0xf] }
 0x85a   :  { %v3671_v15 = vrot.slane %v3590_v4, %v8698_v40  ;;  %8048 = vmatprep.subr.msk.mxu0 %vm181_vm2, %v7011_v2 }
 0x85b   :  { %v3699_v43 = vrot.slane %v3637_v36, %v8698_v40  ;;  %v3703_v33 = vrot.slane %v3639_v8, %v8698_v40  ;;  %8049 = vmatpush3.msk.msra.mxu0 %vm181_vm2, %v7011_v2 }
 0x8c0   :  { %v3723_v9 = vpop.permute.xlu0 %3722 }
 0x8c1   :  { %v3734_v19 = vmul.f32 %v3723_v9, %v3675_v12  ;;  %v3735_v24 = vmul.f32 %v3723_v9, %v3679_v29  ;;  %v3736_v25 = vmul.f32 %v3723_v9, %v3683_v42  ;;  %v3737_v39 = vmul.f32 %v3723_v9, %v3687_v7 }
 0x8c2   :  { %v3721_v58 = vpop.permute.xlu1 %3720  ;;  %v3738_v32 = vmul.f32 %v3723_v9, %v3691_v34  ;;  %v3739_v53 = vmul.f32 %v3723_v9, %v3695_v38  ;;  %v3740_v6 = vmul.f32 %v3723_v9, %v3699_v43  ;;  %v3741_v61 = vmul.f32 %v3723_v9, %v3703_v33 }
 0x8c3   :  { %v3726_v44 = vmul.f32 %v3721_v58, %v3643_v20  ;;  %v3727_v17 = vmul.f32 %v3721_v58, %v3647_v57  ;;  %v3728_v51 = vmul.f32 %v3721_v58, %v3651_v52  ;;  %v3729_v50 = vmul.f32 %v3721_v58, %v3655_v46 }
 0x8c4   :  { %v3730_v1 = vmul.f32 %v3721_v58, %v3659_v0  ;;  %v3731_v59 = vmul.f32 %v3721_v58, %v3663_v3  ;;  %v3732_v10 = vmul.f32 %v3721_v58, %v3667_v5  ;;  %v3733_v56 = vmul.f32 %v3721_v58, %v3671_v15  ;;  %v7009_v5 = vld [vmem:[%s10650_s7 + $0x38] sm:$0xff] }
 0x8c5   :  { %8024 = vmatprep.mubr.msk.f32.mxu1 %vm174_vm3, %v3726_v44 }
 0x8c6   :  { %8025 = vmatmul.mubr.msk.f32.vlgmr.msra.gmra.mxu1 %vm174_vm3, %v3727_v17 }
 0x8c7   :  { %8027 = vmatprep.mubr.msk.f32.mxu1 %vm174_vm3, %v3728_v51 }
 0x8ca   :  { %8028 = vmatmul.mubr.msk.f32.gmra.mxu1 %vm174_vm3, %v3729_v50  ;;  %v7010_v50 = vld [vmem:[%s10650_s7 + $0x40] sm:$0xff] }
 0x8cb   :  { %8030 = vmatprep.mubr.msk.f32.mxu1 %vm174_vm3, %v3730_v1  ;;  %8050 = vmatprep.subr.mxu0 %v7010_v50 }
 0x8cc   :  { %8051 = vmatpush3.msra.mxu0 %v7010_v50 }
 0x8cd   :  { %8052 = vmatprep.subr.mxu0 %v7009_v5 }
 0x8ce   :  { %8031 = vmatmul.mubr.msk.f32.gmra.mxu1 %vm174_vm3, %v3731_v59  ;;  %8053 = vmatpush3.msra.mxu0 %v7009_v5 }
 0x8cf   :  { %8033 = vmatprep.mubr.msk.f32.mxu1 %vm174_vm3, %v3732_v10  ;;  %8054 = vmatprep.subr.mxu0 %v7008_v45 }
 0x8d0   :  { %8055 = vmatpush3.msra.mxu0 %v7008_v45 }
 0x8d2   :  { %8034 = vmatmul.mubr.msk.f32.gmra.mxu1 %vm174_vm3, %v3733_v56 }
 0x8d3   :  { %8036 = vmatprep.mubr.msk.f32.mxu1 %vm174_vm3, %v3734_v19 }
 0x8d6   :  { %8037 = vmatmul.mubr.msk.f32.gmra.mxu1 %vm174_vm3, %v3735_v24 }
 0x8d7   :  { %8039 = vmatprep.mubr.msk.f32.mxu1 %vm174_vm3, %v3736_v25  ;;  %v7007_v25 = vld [vmem:[%s10650_s7 + $0x28] sm:$0xff] }
 0x8d8   :  { %8056 = vmatprep.subr.mxu0 %v7007_v25 }
 0x8d9   :  { %8057 = vmatpush3.msra.mxu0 %v7007_v25 }
 0x8da   :  { %8040 = vmatmul.mubr.msk.f32.gmra.mxu1 %vm174_vm3, %v3737_v39 }
 0x8db   :  { %8042 = vmatprep.mubr.msk.f32.mxu1 %vm174_vm3, %v3738_v32 }
 0x8de   :  { %8043 = vmatmul.mubr.msk.f32.gmra.mxu1 %vm174_vm3, %v3739_v53 }
 0x8df   :  { %8045 = vmatprep.mubr.msk.f32.mxu1 %vm174_vm3, %v3740_v6 }
 0x8e2   :  { %8046 = vmatmul.mubr.msk.f32.gmra.mxu1 %vm174_vm3, %v3741_v61 }
 0x8e3   :  { %5039 = vmatprep.mubr.bf16.mxu1 %v8532_v54 }
 0x986   :  { %v8026_v20 = vpop.f32.mrf.mxu1 }
 0x987   :  { %v3942_v57 = vsel %vm174_vm3, %v8026_v20, -inf }
 0x988   :  { %v3943_v28 = vrot.slane %v3942_v57, 4  ;;  %v9747_v58 = vpop.f32.mrf.mxu1 }
 0x989   :  { %v3935_v35 = vsel %vm174_vm3, %v9747_v58, -inf }
 0x98a   :  { %v3944_v44 = vmax.f32 %v3942_v57, %v3943_v28  ;;  %v3936_v17 = vrot.slane %v3935_v35, 4  ;;  %v9751_v52 = vpop.f32.mrf.mxu1 }
 0x98b   :  { %v3956_v16 = vsel %vm174_vm3, %v9751_v52, -inf }
 0x98c   :  { %v3945_v51 = vrot.slane %v3944_v44, 2  ;;  %v3937_v26 = vmax.f32 %v3935_v35, %v3936_v17  ;;  %v3957_v46 = vrot.slane %v3956_v16, 4  ;;  %v9755_v62 = vpop.f32.mrf.mxu1 }
 0x98d   :  { %v3949_v0 = vsel %vm174_vm3, %v9755_v62, -inf }
 0x98e   :  { %v3946_v1 = vmax.f32 %v3944_v44, %v3945_v51  ;;  %v3938_v47 = vrot.slane %v3937_v26, 2  ;;  %v3958_v63 = vmax.f32 %v3956_v16, %v3957_v46  ;;  %v3950_v3 = vrot.slane %v3949_v0, 4  ;;  %v9765_v4 = vpop.f32.mrf.mxu1 }
 0x98f   :  { %v3970_v55 = vsel %vm174_vm3, %v9765_v4, -inf }
 0x990   :  { %v3947_v59 = vrot.slane %v3946_v1, 1  ;;  %v3939_v10 = vmax.f32 %v3937_v26, %v3938_v47  ;;  %v3959_v11 = vrot.slane %v3958_v63, 2  ;;  %v3951_v9 = vmax.f32 %v3949_v0, %v3950_v3  ;;  %v9774_v15 = vpop.f32.mrf.mxu1 }
 0x991   :  { %v3971_v49 = vrot.slane %v3970_v55, 4  ;;  %v3963_v12 = vsel %vm174_vm3, %v9774_v15, -inf }
 0x992   :  { %v3948_v56 = vmax.f32 %v3946_v1, %v3947_v59  ;;  %v3940_v19 = vrot.slane %v3939_v10, 1  ;;  %v3960_v27 = vmax.f32 %v3958_v63, %v3959_v11  ;;  %v3952_v29 = vrot.slane %v3951_v9, 2  ;;  %v9781_v21 = vpop.f32.mrf.mxu1 }
 0x993   :  { %v3972_v42 = vmax.f32 %v3970_v55, %v3971_v49  ;;  %v3964_v22 = vrot.slane %v3963_v12, 4  ;;  %v3984_v24 = vsel %vm174_vm3, %v9781_v21, -inf }
 0x994   :  { %v4048_v7 = vsub.f32 %v8026_v20, %v3948_v56  ;;  %v3941_v23 = vmax.f32 %v3939_v10, %v3940_v19  ;;  %v3961_v34 = vrot.slane %v3960_v27, 1  ;;  %v3953_v36 = vmax.f32 %v3951_v9, %v3952_v29  ;;  %v9788_v39 = vpop.f32.mrf.mxu1 }
 0x995   :  { %v3973_v32 = vrot.slane %v3972_v42, 2  ;;  %v3965_v38 = vmax.f32 %v3963_v12, %v3964_v22  ;;  %v3985_v8 = vrot.slane %v3984_v24, 4  ;;  %v3977_v43 = vsel %vm174_vm3, %v9788_v39, -inf }
 0x996   :  { %v4065_v53 = vmul.f32 1.442695, %v4048_v7  ;;  %v4047_v6 = vsub.f32 %v9747_v58, %v3941_v23  ;;  %v3962_v33 = vmax.f32 %v3960_v27, %v3961_v34  ;;  %v3954_v61 = vrot.slane %v3953_v36, 1  ;;  %v9793_v57 = vpop.f32.mrf.mxu1 }
 0x997   :  { %v3974_v20 = vmax.f32 %v3972_v42, %v3973_v32  ;;  %v3966_v28 = vrot.slane %v3965_v38, 2  ;;  %v3986_v35 = vmax.f32 %v3984_v24, %v3985_v8  ;;  %v3978_v44 = vrot.slane %v3977_v43, 4 }
 0x998   :  { %8430 = vpow2.f32 %v4065_v53  ;;  %v4063_v17 = vmul.f32 1.442695, %v4047_v6  ;;  %v4050_v16 = vsub.f32 %v9751_v52, %v3962_v33  ;;  %v3955_v51 = vmax.f32 %v3953_v36, %v3954_v61  ;;  %v9796_v26 = vpop.f32.mrf.mxu1 }
 0x999   :  { %v3975_v46 = vrot.slane %v3974_v20, 1  ;;  %v3967_v0 = vmax.f32 %v3965_v38, %v3966_v28  ;;  %v3987_v58 = vrot.slane %v3986_v35, 2  ;;  %v3979_v2 = vmax.f32 %v3977_v43, %v3978_v44 }
 0x99a   :  { %8432 = vpow2.f32 %v4063_v17  ;;  %v4069_v50 = vmul.f32 1.442695, %v4050_v16  ;;  %v4049_v1 = vsub.f32 %v9755_v62, %v3955_v51  ;;  %v3998_v47 = vsel %vm174_vm3, %v9793_v57, -inf  ;;  %v9801_v63 = vpop.f32.mrf.mxu1 }
 0x99b   :  { %v3976_v3 = vmax.f32 %v3974_v20, %v3975_v46  ;;  %v3968_v55 = vrot.slane %v3967_v0, 1  ;;  %v3988_v5 = vmax.f32 %v3986_v35, %v3987_v58  ;;  %v3980_v52 = vrot.slane %v3979_v2, 2 }
 0x99c   :  { %8434 = vpow2.f32 %v4069_v50  ;;  %v4067_v59 = vmul.f32 1.442695, %v4049_v1  ;;  %v3999_v10 = vrot.slane %v3998_v47, 4  ;;  %v3991_v11 = vsel %vm174_vm3, %v9796_v26, -inf  ;;  %v9805_v9 = vpop.f32.mrf.mxu1 }
 0x99d   :  { %v4052_v49 = vsub.f32 %v9765_v4, %v3976_v3  ;;  %v3969_v62 = vmax.f32 %v3967_v0, %v3968_v55  ;;  %v3989_v12 = vrot.slane %v3988_v5, 1  ;;  %v3981_v45 = vmax.f32 %v3979_v2, %v3980_v52 }
 0x99e   :  { %8436 = vpow2.f32 %v4067_v59  ;;  %v4000_v56 = vmax.f32 %v3998_v47, %v3999_v10  ;;  %v3992_v19 = vrot.slane %v3991_v11, 4  ;;  %v4012_v27 = vsel %vm174_vm3, %v9801_v63, -inf  ;;  %v9810_v29 = vpop.f32.mrf.mxu1 }
 0x99f   :  { %v4073_v42 = vmul.f32 1.442695, %v4052_v49  ;;  %v4051_v22 = vsub.f32 %v9774_v15, %v3969_v62  ;;  %v3990_v24 = vmax.f32 %v3988_v5, %v3989_v12  ;;  %v3982_v25 = vrot.slane %v3981_v45, 1 }
 0x9a0   :  { %v4001_v7 = vrot.slane %v4000_v56, 2  ;;  %v3993_v23 = vmax.f32 %v3991_v11, %v3992_v19  ;;  %v4013_v34 = vrot.slane %v4012_v27, 4  ;;  %v4005_v4 = vsel %vm174_vm3, %v9805_v9, -inf  ;;  %v9816_v33 = vpop.f32.mrf.mxu1 }
 0x9a1   :  { %8438 = vpow2.f32 %v4073_v42  ;;  %v4071_v36 = vmul.f32 1.442695, %v4051_v22  ;;  %v4054_v32 = vsub.f32 %v9781_v21, %v3990_v24  ;;  %v3983_v38 = vmax.f32 %v3981_v45, %v3982_v25 }
 0x9a2   :  { %v4002_v8 = vmax.f32 %v4000_v56, %v4001_v7  ;;  %v3994_v43 = vrot.slane %v3993_v23, 2  ;;  %v4014_v53 = vmax.f32 %v4012_v27, %v4013_v34  ;;  %v4006_v6 = vrot.slane %v4005_v4, 4 }
 0x9a3   :  { %8440 = vpow2.f32 %v4071_v36  ;;  %v4077_v15 = vmul.f32 1.442695, %v4054_v32  ;;  %v4053_v61 = vsub.f32 %v9788_v39, %v3983_v38  ;;  %v4026_v20 = vsel %vm174_vm3, %v9810_v29, -inf }
 0x9a4   :  { %v4003_v28 = vrot.slane %v4002_v8, 1  ;;  %v3995_v35 = vmax.f32 %v3993_v23, %v3994_v43  ;;  %v4015_v44 = vrot.slane %v4014_v53, 2  ;;  %v4007_v17 = vmax.f32 %v4005_v4, %v4006_v6 }
 0x9a5   :  { %v9821_v16 = vpop.eup %8430  ;;  %8442 = vpow2.f32 %v4077_v15  ;;  %v4075_v21 = vmul.f32 1.442695, %v4053_v61  ;;  %v4027_v51 = vrot.slane %v4026_v20, 4  ;;  %v9825_v46 = vsel %vm174_vm3, %v9816_v33, -inf }
 0x9a6   :  { %v4102_v0 = vsel %vm174_vm3, %v9821_v16, 0.0  ;;  %v4004_v39 = vmax.f32 %v4002_v8, %v4003_v28  ;;  %v3996_v58 = vrot.slane %v3995_v35, 1  ;;  %v4016_v2 = vmax.f32 %v4014_v53, %v4015_v44 }
 0x9a7   :  { %v9829_v50 = vpop.eup %8432  ;;  %v4103_v1 = vrot.slane %v4102_v0, 4  ;;  %8444 = vpow2.f32 %v4075_v21  ;;  %v4008_v47 = vrot.slane %v4007_v17, 2  ;;  %v4028_v3 = vmax.f32 %v4026_v20, %v4027_v51 }
 0x9a8   :  { %v4095_v55 = vsel %vm174_vm3, %v9829_v50, 0.0  ;;  %v4056_v5 = vsub.f32 %v9793_v57, %v4004_v39  ;;  %v3997_v52 = vmax.f32 %v3995_v35, %v3996_v58  ;;  %v4017_v59 = vrot.slane %v4016_v2, 1 }
 0x9a9   :  { %v9834_v10 = vpop.eup %8434  ;;  %v4104_v11 = vadd.f32 %v4103_v1, %v4102_v0  ;;  %v4096_v49 = vrot.slane %v4095_v55, 4  ;;  %v4009_v62 = vmax.f32 %v4007_v17, %v4008_v47  ;;  %v4029_v12 = vrot.slane %v4028_v3, 2 }
 0x9aa   :  { %v4116_v45 = vsel %vm174_vm3, %v9834_v10, 0.0  ;;  %v4081_v56 = vmul.f32 1.442695, %v4056_v5  ;;  %v4055_v19 = vsub.f32 %v9796_v26, %v3997_v52  ;;  %v4018_v27 = vmax.f32 %v4016_v2, %v4017_v59 }
 0x9ab   :  { %v9839_v42 = vpop.eup %8436  ;;  %v4105_v22 = vrot.slane %v4104_v11, 2  ;;  %v4097_v24 = vadd.f32 %v4096_v49, %v4095_v55  ;;  %v4117_v57 = vrot.slane %v4116_v45, 4  ;;  %v4010_v25 = vrot.slane %v4009_v62, 1 }
 0x9ac   :  { %v4109_v7 = vsel %vm174_vm3, %v9839_v42, 0.0  ;;  %8446 = vpow2.f32 %v4081_v56  ;;  %v4079_v23 = vmul.f32 1.442695, %v4055_v19  ;;  %v4058_v34 = vsub.f32 %v9801_v63, %v4018_v27 }
 0x9ad   :  { %v4106_v4 = vadd.f32 %v4105_v22, %v4104_v11  ;;  %v4098_v36 = vrot.slane %v4097_v24, 2  ;;  %v4118_v32 = vadd.f32 %v4117_v57, %v4116_v45  ;;  %v4110_v38 = vrot.slane %v4109_v7, 4 }
 0x9ae   :  { %v9844_v8 = vpop.eup %8438  ;;  %8448 = vpow2.f32 %v4079_v23  ;;  %v4085_v26 = vmul.f32 1.442695, %v4058_v34  ;;  %v4011_v43 = vmax.f32 %v4009_v62, %v4010_v25  ;;  %v4030_v53 = vmax.f32 %v4028_v3, %v4029_v12 }
 0x9af   :  { %v4107_v6 = vrot.slane %v4106_v4, 1  ;;  %v4099_v15 = vadd.f32 %v4098_v36, %v4097_v24  ;;  %v4119_v61 = vrot.slane %v4118_v32, 2  ;;  %v4111_v20 = vadd.f32 %v4110_v38, %v4109_v7 }
 0x9b0   :  { %v9846_v28 = vpop.eup %8440  ;;  %v4130_v35 = vsel %vm174_vm3, %v9844_v8, 0.0  ;;  %8450 = vpow2.f32 %v4085_v26  ;;  %v4057_v63 = vsub.f32 %v9805_v9, %v4011_v43  ;;  %v4031_v44 = vrot.slane %v4030_v53, 1 }
 0x9b1   :  { %v4108_v17 = vadd.f32 %v4107_v6, %v4106_v4  ;;  %v4100_v21 = vrot.slane %v4099_v15, 1  ;;  %v4120_v51 = vadd.f32 %v4119_v61, %v4118_v32  ;;  %v4112_v0 = vrot.slane %v4111_v20, 2 }
 0x9b2   :  { %v9851_v39 = vpop.eup %8442  ;;  %v4131_v58 = vrot.slane %v4130_v35, 4  ;;  %v4123_v2 = vsel %vm174_vm3, %v9846_v28, 0.0  ;;  %v4083_v1 = vmul.f32 1.442695, %v4057_v63  ;;  %v4032_v47 = vmax.f32 %v4030_v53, %v4031_v44 }
 0x9b3   :  { %8452 = vrcp.f32 %v4108_v17  ;;  %v4101_v3 = vadd.f32 %v4100_v21, %v4099_v15  ;;  %v4121_v55 = vrot.slane %v4120_v51, 1  ;;  %v4113_v5 = vadd.f32 %v4112_v0, %v4111_v20 }
 0x9b4   :  { %v9855_v52 = vpop.eup %8444  ;;  %v4132_v9 = vadd.f32 %v4131_v58, %v4130_v35  ;;  %v4124_v59 = vrot.slane %v4123_v2, 4  ;;  %v4144_v11 = vsel %vm174_vm3, %v9851_v39, 0.0  ;;  %8454 = vpow2.f32 %v4083_v1  ;;  %v9874_v58 = vpop.f32.mrf.mxu1 }
 0x9b5   :  { %8456 = vrcp.f32 %v4101_v3  ;;  %v4122_v49 = vadd.f32 %v4121_v55, %v4120_v51  ;;  %v4114_v62 = vrot.slane %v4113_v5, 1  ;;  %v4145_v12 = vrot.slane %v4144_v11, 4 }
 0x9b6   :  { %v4133_v45 = vrot.slane %v4132_v9, 2  ;;  %v4125_v56 = vadd.f32 %v4124_v59, %v4123_v2  ;;  %v4137_v19 = vsel %vm174_vm3, %v9855_v52, 0.0  ;;  %v4060_v27 = vsub.f32 %v9810_v29, %v4032_v47 }
 0x9b7   :  { %8458 = vrcp.f32 %v4122_v49  ;;  %v4115_v22 = vadd.f32 %v4114_v62, %v4113_v5  ;;  %v4146_v24 = vadd.f32 %v4145_v12, %v4144_v11  ;;  %v4138_v57 = vrot.slane %v4137_v19, 4 }
 0x9b8   :  { %v4134_v25 = vadd.f32 %v4133_v45, %v4132_v9  ;;  %v4126_v7 = vrot.slane %v4125_v56, 2  ;;  %v4020_v23 = vrot.slane %v9825_v46, 4  ;;  %v4089_v36 = vmul.f32 1.442695, %v4060_v27 }
 0x9b9   :  { %v9863_v34 = vpop.eup %8446  ;;  %8460 = vrcp.f32 %v4115_v22  ;;  %v4139_v4 = vadd.f32 %v4138_v57, %v4137_v19  ;;  %v4147_v29 = vrot.slane %v4146_v24, 2  ;;  %v4040_v9 = vsel %vm174_vm3, %v9874_v58, -inf }
 0x9ba   :  { %v4135_v32 = vrot.slane %v4134_v25, 1  ;;  %v4127_v38 = vadd.f32 %v4126_v7, %v4125_v56  ;;  %v4158_v26 = vsel %vm174_vm3, %v9863_v34, 0.0  ;;  %v4021_v6 = vmax.f32 %v9825_v46, %v4020_v23 }
 0x9bb   :  { %v9867_v43 = vpop.eup %8448  ;;  %v4140_v53 = vrot.slane %v4139_v4, 2  ;;  %v4159_v61 = vrot.slane %v4158_v26, 4  ;;  %8462 = vpow2.f32 %v4089_v36  ;;  %v4148_v51 = vadd.f32 %v4147_v29, %v4146_v24 }
 0x9bc   :  { %v4128_v15 = vrot.slane %v4127_v38, 1  ;;  %v4136_v35 = vadd.f32 %v4135_v32, %v4134_v25  ;;  %v4151_v17 = vsel %vm174_vm3, %v9867_v43, 0.0  ;;  %v4022_v21 = vrot.slane %v4021_v6, 2 }
 0x9bd   :  { %v9870_v20 = vpop.eup %8450  ;;  %v4141_v63 = vadd.f32 %v4140_v53, %v4139_v4  ;;  %v4160_v1 = vadd.f32 %v4159_v61, %v4158_v26  ;;  %v4152_v55 = vrot.slane %v4151_v17, 4  ;;  %v4149_v59 = vrot.slane %v4148_v51, 1  ;;  %v9888_v4 = vpop.permute.xlu1 %4239 }
 0x9be   :  { %v4129_v44 = vadd.f32 %v4128_v15, %v4127_v38  ;;  %v4023_v46 = vmax.f32 %v4021_v6, %v4022_v21  ;;  %v4172_v62 = vsel %vm174_vm3, %v9870_v20, 0.0  ;;  %v4041_v27 = vrot.slane %v4040_v9, 4 }
 0x9bf   :  { %v4142_v0 = vrot.slane %v4141_v63, 1  ;;  %v4161_v49 = vrot.slane %v4160_v1, 2  ;;  %v4153_v19 = vadd.f32 %v4152_v55, %v4151_v17  ;;  %v4173_v7 = vrot.slane %v4172_v62, 4 }
 0x9c0   :  { %v8453_v2 = vpop.eup %8452  ;;  %8464 = vrcp.f32 %v4129_v44  ;;  %v4024_v45 = vrot.slane %v4023_v46, 1  ;;  %v4150_v36 = vadd.f32 %v4149_v59, %v4148_v51 }
 0x9c1   :  { %v9876_v47 = vpop.eup %8454  ;;  %8466 = vrcp.f32 %v4136_v35  ;;  %v4143_v3 = vadd.f32 %v4142_v0, %v4141_v63  ;;  %v4224_v24 = vmul.f32 %v8453_v2, %v9821_v16  ;;  %v4162_v32 = vadd.f32 %v4161_v49, %v4160_v1  ;;  %v9900_v0 = vpop.f32.mrf.mxu1 }
 0x9c2   :  { %v8457_v5 = vpop.eup %8456  ;;  %v4165_v12 = vsel %vm174_vm3, %v9876_v47, 0.0  ;;  %v4025_v38 = vmax.f32 %v4023_v46, %v4024_v45  ;;  %v4154_v29 = vrot.slane %v4153_v19, 2 }
 0x9c3   :  { %8468 = vrcp.f32 %v4143_v3  ;;  %v4223_v56 = vmul.f32 %v8457_v5, %v9829_v50  ;;  %v4166_v23 = vrot.slane %v4165_v12, 4  ;;  %v4042_v50 = vmax.f32 %v4040_v9, %v4041_v27 }
 0x9c4   :  { %v8459_v11 = vpop.eup %8458  ;;  %v4246_v6 = vmul.f32 %v9888_v4, %v4224_v24  ;;  %8470 = vrcp.f32 %v4150_v36  ;;  %v4163_v61 = vrot.slane %v4162_v32, 1  ;;  %v4059_v35 = vsub.f32 %v9816_v33, %v4025_v38 }
 0x9c5   :  { %v4226_v57 = vmul.f32 %v8459_v11, %v9834_v10  ;;  %v4245_v26 = vmul.f32 %v9888_v4, %v4223_v56  ;;  %v4167_v15 = vadd.f32 %v4166_v23, %v4165_v12  ;;  %v4155_v17 = vadd.f32 %v4154_v29, %v4153_v19 }
 0x9c6   :  { %v8461_v22 = vpop.eup %8460  ;;  %v4043_v51 = vrot.slane %v4042_v50, 2  ;;  %v4268_v1 = vsel %vm174_vm3, %v4246_v6, 0.0  ;;  %v4087_v55 = vmul.f32 1.442695, %v4059_v35  ;;  %v4033_v12 = vsel %vm174_vm3, %v9900_v0, -inf }
 0x9c7   :  { %v4225_v25 = vmul.f32 %v8461_v22, %v9839_v42  ;;  %v4248_v10 = vmul.f32 %v9888_v4, %v4226_v57  ;;  %v4174_v42 = vadd.f32 %v4173_v7, %v4172_v62  ;;  %v4261_v44 = vsel %vm174_vm3, %v4245_v26, 0.0 }
 0x9c8   :  { %v9891_v53 = vpop.eup %8462  ;;  %v4168_v9 = vrot.slane %v4167_v15, 2  ;;  %v4044_v59 = vmax.f32 %v4042_v50, %v4043_v51  ;;  %v4262_v49 = vrot.slane %v4261_v44, 4  ;;  %8472 = vpow2.f32 %v4087_v55 }
 0x9c9   :  { %v4247_v16 = vmul.f32 %v9888_v4, %v4225_v25  ;;  %v4186_v21 = vsel %vm174_vm3, %v9891_v53, 0.0  ;;  %v4282_v33 = vsel %vm174_vm3, %v4248_v10, 0.0  ;;  %v4175_v5 = vrot.slane %v4174_v42, 2 }
 0x9ca   :  { %v4187_v62 = vrot.slane %v4186_v21, 4  ;;  %v4269_v45 = vrot.slane %v4268_v1, 4  ;;  %v4045_v27 = vrot.slane %v4044_v59, 1  ;;  %v4283_v22 = vrot.slane %v4282_v33, 4 }
 0x9cb   :  { %v4275_v46 = vsel %vm174_vm3, %v4247_v16, 0.0  ;;  %v4156_v24 = vrot.slane %v4155_v17, 1  ;;  %v4034_v57 = vrot.slane %v4033_v12, 4  ;;  %v4164_v7 = vadd.f32 %v4163_v61, %v4162_v32 }
 0x9cc   :  { %v4276_v56 = vrot.slane %v4275_v46, 4  ;;  %v4169_v23 = vadd.f32 %v4168_v9, %v4167_v15  ;;  %v4046_v36 = vmax.f32 %v4044_v59, %v4045_v27  ;;  %v4263_v38 = vadd.f32 %v4262_v49, %v4261_v44 }
 0x9cd   :  { %v8465_v63 = vpop.eup %8464  ;;  %v4176_v26 = vadd.f32 %v4175_v5, %v4174_v42  ;;  %v4188_v29 = vadd.f32 %v4187_v62, %v4186_v21  ;;  %v4035_v50 = vmax.f32 %v4033_v12, %v4034_v57  ;;  %v4270_v6 = vadd.f32 %v4269_v45, %v4268_v1 }
 0x9ce   :  { %v8467_v2 = vpop.eup %8466  ;;  %v4227_v3 = vmul.f32 %v8465_v63, %v9846_v28  ;;  %v4277_v16 = vadd.f32 %v4276_v56, %v4275_v46  ;;  %v4157_v35 = vadd.f32 %v4156_v24, %v4155_v17  ;;  %v4284_v51 = vadd.f32 %v4283_v22, %v4282_v33 }
 0x9cf   :  { %v4228_v19 = vmul.f32 %v8467_v2, %v9844_v8  ;;  %v4062_v8 = vsub.f32 %v9874_v58, %v4046_v36  ;;  %v4036_v63 = vrot.slane %v4035_v50, 2  ;;  %8474 = vrcp.f32 %v4164_v7 }
 0x9d0   :  { %v8469_v11 = vpop.eup %8468  ;;  %v4249_v28 = vmul.f32 %v9888_v4, %v4227_v3  ;;  %v4264_v61 = vrot.slane %v4263_v38, 2  ;;  %v4189_v42 = vrot.slane %v4188_v29, 2  ;;  %v4271_v46 = vrot.slane %v4270_v6, 2 }
 0x9d1   :  { %v4229_v25 = vmul.f32 %v8469_v11, %v9855_v52  ;;  %v4250_v10 = vmul.f32 %v9888_v4, %v4228_v19  ;;  %v4170_v52 = vrot.slane %v4169_v23, 1  ;;  %v4093_v32 = vmul.f32 1.442695, %v4062_v8  ;;  %v8471_v1 = vpop.eup %8470 }
 0x9d2   :  { %v4289_v2 = vsel %vm174_vm3, %v4249_v28, 0.0  ;;  %v4037_v44 = vmax.f32 %v4035_v50, %v4036_v63  ;;  %v4278_v3 = vrot.slane %v4277_v16, 2  ;;  %v4177_v17 = vrot.slane %v4176_v26, 1 }
 0x9d3   :  { %v4251_v15 = vmul.f32 %v9888_v4, %v4229_v25  ;;  %v4290_v21 = vrot.slane %v4289_v2, 4  ;;  %8476 = vpow2.f32 %v4093_v32  ;;  %v4296_v58 = vsel %vm174_vm3, %v4250_v10, 0.0 }
 0x9d4   :  { %8478 = vrcp.f32 %v4157_v35  ;;  %v4038_v55 = vrot.slane %v4037_v44, 1  ;;  %v4285_v33 = vrot.slane %v4284_v51, 2  ;;  %v4171_v5 = vadd.f32 %v4170_v52, %v4169_v23 }
 0x9d5   :  { %v4291_v9 = vadd.f32 %v4290_v21, %v4289_v2  ;;  %v4297_v59 = vrot.slane %v4296_v58, 4  ;;  %v4303_v11 = vsel %vm174_vm3, %v4251_v15, 0.0  ;;  %v4230_v49 = vmul.f32 %v8471_v1, %v9851_v39  ;;  %v9918_v56 = vpop.eup %8472 }
 0x9d6   :  { %v4190_v62 = vadd.f32 %v4189_v42, %v4188_v29  ;;  %v4039_v12 = vmax.f32 %v4037_v44, %v4038_v55  ;;  %v4265_v45 = vadd.f32 %v4264_v61, %v4263_v38  ;;  %v4272_v19 = vadd.f32 %v4271_v46, %v4270_v6 }
 0x9d7   :  { %v4279_v27 = vadd.f32 %v4278_v3, %v4277_v16  ;;  %v4292_v22 = vrot.slane %v4291_v9, 2  ;;  %v4298_v28 = vadd.f32 %v4297_v59, %v4296_v58  ;;  %v4179_v24 = vsel %vm174_vm3, %v9918_v56, 0.0 }
 0x9d8   :  { %v4061_v57 = vsub.f32 %v9900_v0, %v4039_v12  ;;  %v4286_v25 = vadd.f32 %v4285_v33, %v4284_v51  ;;  %v4304_v7 = vrot.slane %v4303_v11, 4  ;;  %v4178_v23 = vadd.f32 %v4177_v17, %v4176_v26 }
 0x9d9   :  { %8480 = vrcp.f32 %v4171_v5  ;;  %v4180_v36 = vrot.slane %v4179_v24, 4  ;;  %v4252_v29 = vmul.f32 %v9888_v4, %v4230_v49  ;;  %v4266_v38 = vrot.slane %v4265_v45, 1 }
 0x9da   :  { %v4091_v39 = vmul.f32 1.442695, %v4061_v57  ;;  %v4293_v50 = vadd.f32 %v4292_v22, %v4291_v9  ;;  %v4191_v10 = vrot.slane %v4190_v62, 1  ;;  %v4280_v16 = vrot.slane %v4279_v27, 1 }
 0x9db   :  { %v4181_v6 = vadd.f32 %v4180_v36, %v4179_v24  ;;  %v4299_v8 = vrot.slane %v4298_v28, 2  ;;  %v4273_v35 = vrot.slane %v4272_v19, 1  ;;  %v4287_v63 = vrot.slane %v4286_v25, 1 }
 0x9dc   :  { %8482 = vpow2.f32 %v4091_v39  ;;  %v4305_v2 = vadd.f32 %v4304_v7, %v4303_v11  ;;  %v4294_v0 = vrot.slane %v4293_v50, 1  ;;  %v8475_v32 = vpop.eup %8474  ;;  %v4267_v26 = vadd.f32 %v4266_v38, %v4265_v45 }
 0x9dd   :  { %v4182_v52 = vrot.slane %v4181_v6, 2  ;;  %v4300_v51 = vadd.f32 %v4299_v8, %v4298_v28  ;;  %v4310_v61 = vsel %vm174_vm3, %v4252_v29, 0.0  ;;  %8484 = vrcp.f32 %v4178_v23 }
 0x9de   :  { %v4306_v15 = vrot.slane %v4305_v2, 2  ;;  %v4281_v42 = vadd.f32 %v4280_v16, %v4279_v27  ;;  %v4311_v44 = vrot.slane %v4310_v61, 4  ;;  %v4192_v1 = vadd.f32 %v4191_v10, %v4190_v62 }
 0x9df   :  { %v4183_v4 = vadd.f32 %v4182_v52, %v4181_v6  ;;  %v4274_v46 = vadd.f32 %v4273_v35, %v4272_v19  ;;  %v4288_v3 = vadd.f32 %v4287_v63, %v4286_v25  ;;  %v4295_v5 = vadd.f32 %v4294_v0, %v4293_v50 }
 0x9e0   :  { %v9925_v21 = vpop.eup %8476  ;;  %v4307_v58 = vadd.f32 %v4306_v15, %v4305_v2  ;;  %v4301_v9 = vrot.slane %v4300_v51, 1  ;;  %v4312_v49 = vadd.f32 %v4311_v44, %v4310_v61  ;;  %8486 = vrcp.f32 %v4192_v1 }
 0x9e1   :  { %v8479_v17 = vpop.eup %8478  ;;  %v4184_v55 = vrot.slane %v4183_v4, 1  ;;  %v4200_v33 = vsel %vm174_vm3, %v9925_v21, 0.0  ;;  %v4400_v12 = vsel %vm1122_vm4, %v4274_v46, %v4267_v26  ;;  %v4232_v52 = vmul.f32 %v8475_v32, %v9863_v34  ;;  %v4242_v26 = vpop.permute.xlu1 %4241 }
 0x9e2   :  { %v4201_v59 = vrot.slane %v4200_v33, 4  ;;  %v4308_v11 = vrot.slane %v4307_v58, 1  ;;  %v4401_v27 = vsel %vm1124_vm5, %v4281_v42, %v4400_v12  ;;  %v4313_v19 = vrot.slane %v4312_v49, 2 }
 0x9e3   :  { %v4185_v45 = vadd.f32 %v4184_v55, %v4183_v4  ;;  %v4402_v22 = vsel %vm1126_vm6, %v4288_v3, %v4401_v27  ;;  %v4302_v7 = vadd.f32 %v4301_v9, %v4300_v51  ;;  %v4231_v10 = vmul.f32 %v8479_v17, %v9867_v43 }
 0x9e4   :  { %v4202_v62 = vadd.f32 %v4201_v59, %v4200_v33  ;;  %v4309_v28 = vadd.f32 %v4308_v11, %v4307_v58  ;;  %v4403_v24 = vsel %vm1128_vm7, %v4295_v5, %v4402_v22  ;;  %v4314_v23 = vadd.f32 %v4313_v19, %v4312_v49 }
 0x9e5   :  { %8488 = vrcp.f32 %v4185_v45  ;;  %v4404_v29 = vsel %vm1130_vm8, %v4302_v7, %v4403_v24  ;;  %v4253_v61 = vmul.f32 %v4242_v26, %v4231_v10  ;;  %v4254_v42 = vmul.f32 %v4242_v26, %v4232_v52 }
 0x9e6   :  { %v8481_v57 = vpop.eup %8480  ;;  %v4203_v25 = vrot.slane %v4202_v62, 2  ;;  %v4315_v39 = vrot.slane %v4314_v23, 1  ;;  %v4405_v50 = vsel %vm1132_vm9, %v4309_v28, %v4404_v29 }
 0x9e7   :  { %v4233_v35 = vmul.f32 %v8481_v57, %v9876_v47  ;;  %v4317_v3 = vsel %vm174_vm3, %v4253_v61, 0.0  ;;  %v4324_v17 = vsel %vm174_vm3, %v4254_v42, 0.0 }
 0x9e8   :  { %v4204_v36 = vadd.f32 %v4203_v25, %v4202_v62  ;;  %v4316_v8 = vadd.f32 %v4315_v39, %v4314_v23  ;;  %v4318_v5 = vrot.slane %v4317_v3, 4 }
 0x9e9   :  { %v9934_v38 = vpop.eup %8482  ;;  %v4255_v43 = vmul.f32 %v4242_v26, %v4233_v35 }
 0x9ea   :  { %v4205_v6 = vrot.slane %v4204_v36, 1  ;;  %v4193_v16 = vsel %vm174_vm3, %v9934_v38, 0.0  ;;  %v8485_v2 = vpop.eup %8484  ;;  %v4406_v51 = vsel %vm1134_vm10, %v4316_v8, %v4405_v50  ;;  %v4319_v27 = vadd.f32 %v4318_v5, %v4317_v3 }
 0x9eb   :  { %v4194_v63 = vrot.slane %v4193_v16, 4  ;;  %8058 = vmatprep.mubr.msk.f32.mxu0 %vm174_vm3, %v4406_v51  ;;  %v4234_v44 = vmul.f32 %v8485_v2, %v9870_v20  ;;  %v4331_v34 = vsel %vm174_vm3, %v4255_v43, 0.0  ;;  %v4325_v20 = vrot.slane %v4324_v17, 4 }
 0x9ec   :  { %v4206_v0 = vadd.f32 %v4205_v6, %v4204_v36  ;;  %v4332_v11 = vrot.slane %v4331_v34, 4  ;;  %v4320_v57 = vrot.slane %v4319_v27, 2 }
 0x9ed   :  { %v4195_v15 = vadd.f32 %v4194_v63, %v4193_v16  ;;  %v8487_v1 = vpop.eup %8486  ;;  %v4256_v55 = vmul.f32 %v4242_v26, %v4234_v44  ;;  %v4326_v22 = vadd.f32 %v4325_v20, %v4324_v17 }
 0x9ee   :  { %8490 = vrcp.f32 %v4206_v0  ;;  %v4236_v33 = vmul.f32 %v8487_v1, %v9891_v53  ;;  %v4333_v62 = vadd.f32 %v4332_v11, %v4331_v34  ;;  %v4321_v10 = vadd.f32 %v4320_v57, %v4319_v27  ;;  %v7012_v57 = vld [vmem:[%s10651_s8 + $0x1] ss:$0 sm:$0xff] }
 0x9ef   :  { %v4196_v4 = vrot.slane %v4195_v15, 2  ;;  %v4338_v12 = vsel %vm174_vm3, %v4256_v55, 0.0  ;;  %v4327_v36 = vrot.slane %v4326_v22, 2 }
 0x9f0   :  { %v4258_v45 = vmul.f32 %v4242_v26, %v4236_v33  ;;  %v4339_v28 = vrot.slane %v4338_v12, 4  ;;  %v4334_v25 = vrot.slane %v4333_v62, 2  ;;  %v4322_v0 = vrot.slane %v4321_v10, 1 }
 0x9f1   :  { %v4197_v47 = vadd.f32 %v4196_v4, %v4195_v15  ;;  %v4328_v35 = vadd.f32 %v4327_v36, %v4326_v22 }
 0x9f2   :  { %v8489_v46 = vpop.eup %8488  ;;  %v4352_v53 = vsel %vm174_vm3, %v4258_v45, 0.0  ;;  %v4340_v39 = vadd.f32 %v4339_v28, %v4338_v12  ;;  %v4335_v16 = vadd.f32 %v4334_v25, %v4333_v62  ;;  %v4323_v1 = vadd.f32 %v4322_v0, %v4321_v10 }
 0x9f3   :  { %v4235_v32 = vmul.f32 %v8489_v46, %v9918_v56  ;;  %v4198_v58 = vrot.slane %v4197_v47, 1  ;;  %v4353_v29 = vrot.slane %v4352_v53, 4  ;;  %v4329_v4 = vrot.slane %v4328_v35, 1 }
 0x9f4   :  { %v4341_v63 = vrot.slane %v4340_v39, 2  ;;  %v4336_v15 = vrot.slane %v4335_v16, 1 }
 0x9f5   :  { %v4257_v9 = vmul.f32 %v4242_v26, %v4235_v32  ;;  %v4199_v59 = vadd.f32 %v4198_v58, %v4197_v47  ;;  %v4354_v2 = vadd.f32 %v4353_v29, %v4352_v53  ;;  %v4330_v58 = vadd.f32 %v4329_v4, %v4328_v35  ;;  %v7052_v35 = vld [vmem:[%s10654_s11 + $0x250] sm:$0x33] }
 0x9f6   :  { %v4342_v42 = vadd.f32 %v4341_v63, %v4340_v39  ;;  %v4337_v3 = vadd.f32 %v4336_v15, %v4335_v16  ;;  %v7034_v15 = vld [vmem:[%s10654_s11 + $0x1c0] sm:$0xff] }
 0x9f7   :  { %v4345_v49 = vsel %vm174_vm3, %v4257_v9, 0.0  ;;  %8492 = vrcp.f32 %v4199_v59  ;;  %v4355_v44 = vrot.slane %v4354_v2, 2  ;;  %v4407_v5 = vsel %vm1122_vm4, %v4330_v58, %v4323_v1  ;;  %v7028_v58 = vld [vmem:[%s10654_s11 + $0x190] sm:$0xff] }
 0x9f8   :  { %v4346_v56 = vrot.slane %v4345_v49, 4  ;;  %v4343_v17 = vrot.slane %v4342_v42, 1 }
 0x9f9   :  { %v4356_v55 = vadd.f32 %v4355_v44, %v4354_v2  ;;  %v7097_v2 = vcombine.high %v7052_v35, %v7052_v35 }
 0x9fa   :  { %v4347_v23 = vadd.f32 %v4346_v56, %v4345_v49  ;;  %v4344_v11 = vadd.f32 %v4343_v17, %v4342_v42  ;;  %v7044_v42 = vld [vmem:[%s10654_s11 + $0x210] sm:$0xff] }
 0x9fb   :  { %v8491_v19 = vpop.eup %8490  ;;  %v4357_v20 = vrot.slane %v4356_v55, 1  ;;  %7112 = vmatprep.subr.msk.bf16.mxu1 %vm1601_vm11, %v7097_v2 }
 0x9fc   :  { %v4238_v24 = vmul.f32 %v8491_v19, %v9925_v21  ;;  %v4348_v8 = vrot.slane %v4347_v23, 2 }
 0x9fd   :  { %v4358_v56 = vadd.f32 %v4357_v20, %v4356_v55 }
 0x9fe   :  { %v4260_v7 = vmul.f32 %v4242_v26, %v4238_v24  ;;  %v4349_v61 = vadd.f32 %v4348_v8, %v4347_v23  ;;  %v7050_v8 = vld [vmem:[%s10654_s11 + $0x240] sm:$0x33] }
 0x9ff   :  { %v7093_v63 = vcombine.high %v7050_v8, %v7050_v8 }
 0xa00   :  { %v4366_v50 = vsel %vm174_vm3, %v4260_v7, 0.0  ;;  %v4350_v34 = vrot.slane %v4349_v61, 1 }
 0xa01   :  { %v4367_v6 = vrot.slane %v4366_v50, 4  ;;  %7108 = vmatprep.subr.msk.bf16.mxu0 %vm1601_vm11, %v7093_v63  ;;  %v7046_v63 = vld [vmem:[%s10654_s11 + $0x220] sm:$0xff] }
 0xa02   :  { %v4351_v9 = vadd.f32 %v4350_v34, %v4349_v61  ;;  %v7042_v61 = vld [vmem:[%s10654_s11 + $0x200] sm:$0xff]  ;;  %v7020_v34 = vld [vmem:[%s10654_s11 + $0x150] sm:$0xff] }
 0xa03   :  { %v4368_v51 = vadd.f32 %v4367_v6, %v4366_v50  ;;  %v7077_v4 = vcombine.high %v7034_v15, %v7042_v61  ;;  %v7076_v44 = vcombine.low %v7034_v15, %v7042_v61  ;;  %v7064_v55 = vcombine.low %v7020_v34, %v7028_v58 }
 0xa04   :  { %v8493_v52 = vpop.eup %8492 }
 0xa05   :  { %v4237_v21 = vmul.f32 %v8493_v52, %v9934_v38  ;;  %v4369_v46 = vrot.slane %v4368_v51, 2  ;;  %v7092_v52 = vcombine.low %v7050_v8, %v7050_v8 }
 0xa07   :  { %v4259_v43 = vmul.f32 %v4242_v26, %v4237_v21  ;;  %v4370_v38 = vadd.f32 %v4369_v46, %v4368_v51  ;;  %v4408_v26 = vsel %vm1124_vm5, %v4337_v3, %v4407_v5  ;;  %v7096_v21 = vcombine.low %v7052_v35, %v7052_v35  ;;  %v7018_v46 = vld [vmem:[%s10654_s11 + $0x140] sm:$0xff]  ;;  %v7043_v35 = vld [vmem:[%s10654_s11 + $0x208] sm:$0xff] }
 0xa08   :  { %v4409_v45 = vsel %vm1126_vm6, %v4344_v11, %v4408_v26  ;;  %v4874_v0 = vsel %vm1601_vm11, %v7092_v52, 0  ;;  %v7026_v3 = vld [vmem:[%s10654_s11 + $0x180] sm:$0xff] }
 0xa09   :  { %v4359_v47 = vsel %vm174_vm3, %v4259_v43, 0.0  ;;  %v4371_v12 = vrot.slane %v4370_v38, 1  ;;  %v4410_v62 = vsel %vm1128_vm7, %v4351_v9, %v4409_v45  ;;  %v4886_v51 = vsel %vm1601_vm11, %v7096_v21, 0  ;;  %v7036_v43 = vld [vmem:[%s10654_s11 + $0x1d0] sm:$0xff]  ;;  %v7054_v5 = vld [vmem:[%s10654_s11 + $0x260] sm:$0x33] }
 0xa0a   :  { %v4360_v32 = vrot.slane %v4359_v47, 4  ;;  %v4411_v28 = vsel %vm1130_vm8, %v4358_v56, %v4410_v62  ;;  %5018 = vmatpush1.bf16.msra.mxu1 %v4886_v51  ;;  %v7080_v1 = vcombine.low %v7036_v43, %v7044_v42  ;;  %v7060_v17 = vcombine.low %v7018_v46, %v7026_v3 }
 0xa0b   :  { %v4372_v22 = vadd.f32 %v4371_v12, %v4370_v38  ;;  %v7051_v38 = vld [vmem:[%s10654_s11 + $0x248] sm:$0x33]  ;;  %v7100_v8 = vcombine.low %v7054_v5, %v7054_v5 }
 0xa0c   :  { %v4361_v33 = vadd.f32 %v4360_v32, %v4359_v47  ;;  %v7081_v47 = vcombine.high %v7036_v43, %v7044_v42  ;;  %v7061_v32 = vcombine.high %v7018_v46, %v7026_v3  ;;  %v7095_v9 = vcombine.high %v7051_v38, %v7051_v38  ;;  %v7019_v43 = vld [vmem:[%s10654_s11 + $0x148] sm:$0xff]  ;;  %v7022_v42 = vld [vmem:[%s10654_s11 + $0x160] sm:$0xff] }
 0xa0d   :  { %v4898_v51 = vsel %vm1601_vm11, %v7100_v8, 0  ;;  %v7023_v8 = vld [vmem:[%s10654_s11 + $0x168] sm:$0xff] }
 0xa0e   :  { %v4362_v59 = vrot.slane %v4361_v33, 2  ;;  %5019 = vmatprep.subr.bf16.mxu1 %v7081_v47 }
 0xa0f   :  { %5020 = vmatpush1.bf16.msra.mxu1 %v7080_v1 }
 0xa10   :  { %v4363_v49 = vadd.f32 %v4362_v59, %v4361_v33  ;;  %v7065_v33 = vcombine.high %v7020_v34, %v7028_v58  ;;  %v7101_v59 = vcombine.high %v7054_v5, %v7054_v5  ;;  %v7053_v34 = vld [vmem:[%s10654_s11 + $0x258] sm:$0x33] }
 0xa12   :  { %v4364_v27 = vrot.slane %v4363_v49, 1  ;;  %5021 = vmatprep.subr.bf16.mxu1 %v7065_v33 }
 0xa13   :  { %5022 = vmatpush1.bf16.msra.mxu1 %v7064_v55  ;;  %v7099_v55 = vcombine.high %v7053_v34, %v7053_v34 }
 0xa14   :  { %v4365_v19 = vadd.f32 %v4364_v27, %v4363_v49  ;;  %7116 = vmatprep.subr.msk.bf16.mxu1 %vm1601_vm11, %v7101_v59  ;;  %v7045_v59 = vld [vmem:[%s10654_s11 + $0x218] sm:$0xff] }
 0xa16   :  { %v4412_v24 = vsel %vm1132_vm9, %v4365_v19, %v4411_v28 }
 0xa17   :  { %v4413_v53 = vsel %vm1134_vm10, %v4372_v22, %v4412_v24 }
 0xa18   :  { %8059 = vmatmul.mubr.msk.f32.vlgmr.msra.gmra.mxu0 %vm174_vm3, %v4413_v53 }
 0xa19   :  { %4953 = vmatprep.mubr.bf16.mxu0 %v8532_v54  ;;  %4932 = vmatpush1.bf16.msra.mxu0 %v4874_v0 }
 0xa1a   :  { %4933 = vmatprep.subr.bf16.mxu0 %v7077_v4  ;;  %v7027_v4 = vld [vmem:[%s10654_s11 + $0x188] sm:$0xff] }
 0xa1b   :  { %v7063_v46 = vcombine.high %v7019_v43, %v7027_v4  ;;  %v7062_v58 = vcombine.low %v7019_v43, %v7027_v4 }
 0xa1d   :  { %4934 = vmatpush1.bf16.msra.mxu0 %v7076_v44  ;;  %v7030_v44 = vld [vmem:[%s10654_s11 + $0x1a0] sm:$0xff] }
 0xa1e   :  { %4935 = vmatprep.subr.bf16.mxu0 %v7061_v32  ;;  %v7069_v3 = vcombine.high %v7022_v42, %v7030_v44  ;;  %v7056_v32 = vld [vmem:[%s10654_s11 + $0x270] sm:$0x33] }
 0xa1f   :  { %v7105_v33 = vcombine.high %v7056_v32, %v7056_v32  ;;  %v7104_v5 = vcombine.low %v7056_v32, %v7056_v32  ;;  %v7025_v32 = vld [vmem:[%s10654_s11 + $0x178] sm:$0xff] }
 0xa21   :  { %4936 = vmatpush1.bf16.msra.mxu0 %v7060_v17  ;;  %v7068_v17 = vcombine.low %v7022_v42, %v7030_v44  ;;  %v8231_v42 = vld [vmem:[%s10656_s13 + $0x428] sm:$0xff]   ;;  %v7041_v44 = vld [vmem:[%s10654_s11 + $0x1f8] sm:$0xff] }
 0xa22   :  { %7110 = vmatprep.subr.msk.bf16.mxu0 %vm1601_vm11, %v7095_v9  ;;  %v7037_v9 = vld [vmem:[%s10654_s11 + $0x1d8] sm:$0xff] }
 0xad8   :  { %v8060_v25 = vpop.f32.mrf.mxu0 }
 0xad9   :  { %v4493_v7 = vadd.f32 %v8060_v25, %v7012_v57 }
 0xada   :  { %v4487_v23 = vpop.f32.mrf.mxu0 }
 0xadb   :  { %v9970_v36 = vadd.f32 %v4493_v7, %v9677_v41  ;;  %v4488_v39 = vadd.f32 %v7012_v57, %v4487_v23  ;;  %v7016_v23 = vld [vmem:[%s10652_s9 + $0x1] ss:$0 sm:$0xff] }
 0xadd   :  { %v9973_v29 = vadd.f32 %v4488_v39, %v9673_v14  ;;  %v4503_v50 = vsel %vm174_vm3, %v9970_v36, 0.0  ;;  %v4509_v41 = vmul.f32 %v9970_v36, %v9970_v36 }
 0xade   :  { %4504 = vadd.xlane.f32.xlu1 %v4503_v50 }
 0xadf   :  { %v4500_v10 = vsel %vm174_vm3, %v9973_v29, 0.0  ;;  %v4508_v6 = vmul.f32 %v9973_v29, %v9973_v29  ;;  %v4513_v14 = vsel %vm174_vm3, %v4509_v41, 0.0  ;;  %v7094_v41 = vcombine.low %v7051_v38, %v7051_v38 }
 0xae0   :  { %4501 = vadd.xlane.f32.xlu0 %v4500_v10  ;;  %v7098_v38 = vcombine.low %v7053_v34, %v7053_v34  ;;  %v8235_v34 = vld [vmem:[%s10656_s13 + $0x420] sm:$0xff]  }
 0xae1   :  { %v4510_v16 = vsel %vm174_vm3, %v4508_v6, 0.0  ;;  %v4880_v21 = vsel %vm1601_vm11, %v7094_v41, 0 }
 0xae4   :  { %4511 = vadd.xlane.f32.xlu0 %v4510_v16  ;;  %v7017_v16 = vld [vmem:[%s10653_s10 + $0x1] ss:$0 sm:$0xff] }
 0xae8   :  { %4514 = vadd.xlane.f32.xlu0 %v4513_v14 }
 0xb67   :  { %v4505_v20 = vpop.xlane.xlu1 %4504 }
 0xb68   :  { %v4507_v12 = vmul.f32 0.027777778, %v4505_v20  ;;  %v4892_v20 = vsel %vm1601_vm11, %v7098_v38, 0  ;;  %v8239_v38 = vld [vmem:[%s10656_s13 + $0x418] sm:$0xff]  }
 0xb69   :  { %v4502_v26 = vpop.xlane.xlu0 %4501 }
 0xb6a   :  { %v4506_v11 = vmul.f32 0.027777778, %v4502_v26  ;;  %v4519_v19 = vmul.f32 %v4507_v12, %v4507_v12  ;;  %v4523_v39 = vsub.f32 %v9970_v36, %v4507_v12  ;;  %v7038_v36 = vld [vmem:[%s10654_s11 + $0x1e0] sm:$0xff]  ;;  %v7040_v26 = vld [vmem:[%s10654_s11 + $0x1f0] sm:$0xff]  ;;  %v7083_v12 = vcombine.high %v7037_v9, %v7045_v59 }
 0xb6b   :  { %v7085_v61 = vcombine.high %v7038_v36, %v7046_v63  ;;  %v7084_v47 = vcombine.low %v7038_v36, %v7046_v63 }
 0xb6c   :  { %v4518_v45 = vmul.f32 %v4506_v11, %v4506_v11  ;;  %v4522_v57 = vsub.f32 %v9973_v29, %v4506_v11  ;;  %v7035_v29 = vld [vmem:[%s10654_s11 + $0x1c8] sm:$0xff]  ;;  %v7048_v11 = vld [vmem:[%s10654_s11 + $0x230] sm:$0xff] }
 0xb6d   :  { %v4512_v49 = vpop.xlane.xlu0 %4511  ;;  %v7079_v15 = vcombine.high %v7035_v29, %v7043_v35  ;;  %v7078_v1 = vcombine.low %v7035_v29, %v7043_v35  ;;  %v7031_v29 = vld [vmem:[%s10654_s11 + $0x1a8] sm:$0xff]  ;;  %v8228_v35 = vld [vmem:[%s10656_s13 + $0x470] sm:$0xff]  }
 0xb6e   :  { %v4516_v27 = vmul.f32 0.027777778, %v4512_v49  ;;  %v4910_v49 = vsel %vm1601_vm11, %v7104_v5, 0  ;;  %v7071_v63 = vcombine.high %v7023_v8, %v7031_v29 }
 0xb70   :  { %v4520_v62 = vsub.f32 %v4516_v27, %v4518_v45  ;;  %v7089_v45 = vcombine.high %v7040_v26, %v7048_v11  ;;  %v7021_v27 = vld [vmem:[%s10654_s11 + $0x158] sm:$0xff] }
 0xb71   :  { %v4515_v56 = vpop.xlane.xlu0 %4514 }
 0xb72   :  { %v4524_v22 = vadd.f32 1e-05, %v4520_v62  ;;  %v4517_v28 = vmul.f32 0.027777778, %v4515_v56  ;;  %v7029_v62 = vld [vmem:[%s10654_s11 + $0x198] sm:$0xff]  ;;  %v7024_v56 = vld [vmem:[%s10654_s11 + $0x170] sm:$0xff] }
 0xb74   :  { %8494 = vrsqrt.f32 %v4524_v22  ;;  %v4521_v24 = vsub.f32 %v4517_v28, %v4519_v19  ;;  %v7032_v19 = vld [vmem:[%s10654_s11 + $0x1b0] sm:$0xff]  ;;  %v7082_v22 = vcombine.low %v7037_v9, %v7045_v59  ;;  %v7088_v28 = vcombine.low %v7040_v26, %v7048_v11  ;;  %v8232_v9 = vld [vmem:[%s10656_s13 + $0x4f8] sm:$0xff]   ;;  %v8240_v11 = vld [vmem:[%s10656_s13 + $0x4e8] sm:$0xff]  }
 0xb75   :  { %v8236_v59 = vld [vmem:[%s10656_s13 + $0x4f0] sm:$0xff]  }
 0xb76   :  { %v4525_v53 = vadd.f32 1e-05, %v4521_v24  ;;  %v7067_v24 = vcombine.high %v7021_v27, %v7029_v62  ;;  %v8238_v26 = vld [vmem:[%s10656_s13 + $0x4b0] sm:$0xff]  }
 0xb78   :  { %8496 = vrsqrt.f32 %v4525_v53  ;;  %v7073_v53 = vcombine.high %v7024_v56, %v7032_v19 }
 0xb81   :  { %v8495_v25 = vpop.eup %8494 }
 0xb82   :  { %v4528_v7 = vmul.f32 %v8495_v25, %v4522_v57  ;;  %v7055_v57 = vld [vmem:[%s10654_s11 + $0x268] sm:$0x33]  ;;  %v7066_v25 = vcombine.low %v7021_v27, %v7029_v62  ;;  %v8246_v27 = vld [vmem:[%s10656_s13 + $0x4a0] sm:$0xff]  }
 0xb83   :  { %v8247_v62 = vld [vmem:[%s10656_s13 + $0x408] sm:$0xff]  }
 0xb84   :  { %v4534_v10 = vmul.f32 %v7016_v23, %v4528_v7  ;;  %v7072_v7 = vcombine.low %v7024_v56, %v7032_v19  ;;  %v8248_v56 = vld [vmem:[%s10656_s13 + $0x4d8] sm:$0xff]   ;;  %v8249_v19 = vld [vmem:[%s10656_s13 + $0x440] sm:$0xff]  }
 0xb85   :  { %v8497_v50 = vpop.eup %8496 }
 0xb86   :  { %v4529_v6 = vmul.f32 %v8497_v50, %v4523_v39  ;;  %v10047_v2 = vadd.f32 %v7017_v16, %v4534_v10  ;;  %v7102_v39 = vcombine.low %v7055_v57, %v7055_v57  ;;  %v8226_v50 = vld [vmem:[%s10656_s13 + $0x478] sm:$0xff]   ;;  %v7039_v10 = vld [vmem:[%s10654_s11 + $0x1e8] sm:$0xff] }
 0xb88   :  { %v4535_v14 = vmul.f32 %v7016_v23, %v4529_v6  ;;  %v7103_v23 = vcombine.high %v7055_v57, %v7055_v57  ;;  %v7047_v6 = vld [vmem:[%s10654_s11 + $0x228] sm:$0xff]  ;;  %v8254_v57 = vld [vmem:[%s10656_s13 + $0x578] sm:$0xff]  }
 0xb89   :  { %v7087_v41 = vcombine.high %v7039_v10, %v7047_v6  ;;  %v7086_v36 = vcombine.low %v7039_v10, %v7047_v6  ;;  %v10264_v10 = vld [vmem:[%s10655_s12 + $0x1] ss:$2 sm:$0xff] }
 0xb8a   :  { %v10049_v52 = vadd.f32 %v7017_v16, %v4535_v14  ;;  %v4904_v16 = vsel %vm1601_vm11, %v7102_v39, 0  ;;  %v8227_v14 = vld [vmem:[%s10656_s13 + $0x438] sm:$0xff]   ;;  %v8261_v39 = vld [vmem:[%s10656_s13 + $0x480] sm:$0xff]  }
 0xb8c   :  { %v10054_v0 = vpack.c.bf16 %v10049_v52, %v10047_v2 }
 0xb8e   :  { %7109 = vmatmul.mubr.msk.bf16.vlgmr.msra.gmra.mxu0 %vm174_vm3, %v10054_v0  ;;  %7113 = vmatmul.mubr.msk.bf16.vlgmr.msra.gmra.mxu1 %vm174_vm3, %v10054_v0 }
 0xb8f   :  { %4975 = vmatpush1.bf16.msra.mxu0 %v4880_v21  ;;  %5104 = vmatpush1.bf16.msra.mxu1 %v4898_v51  ;;  %v8229_v21 = vld [vmem:[%s10656_s13 + $0x430] sm:$0xff]   ;;  %v7057_v51 = vld [vmem:[%s10654_s11 + $0x278] sm:$0x33] }
 0xb90   :  { %4976 = vmatprep.subr.bf16.mxu0 %v7079_v15  ;;  %5105 = vmatprep.subr.bf16.mxu1 %v7085_v61  ;;  %v8230_v15 = vld [vmem:[%s10656_s13 + $0x468] sm:$0xff]   ;;  %v7070_v61 = vcombine.low %v7023_v8, %v7031_v29  ;;  %v7107_v43 = vcombine.high %v7057_v51, %v7057_v51  ;;  %v7106_v4 = vcombine.low %v7057_v51, %v7057_v51 }
 0xb91   :  { %4996 = vmatprep.mubr.bf16.mxu0 %v8532_v54  ;;  %5125 = vmatprep.mubr.bf16.mxu1 %v8532_v54 }
 0xb93   :  { %4977 = vmatpush1.bf16.msra.mxu0 %v7078_v1  ;;  %5106 = vmatpush1.bf16.msra.mxu1 %v7084_v47  ;;  %v7049_v1 = vld [vmem:[%s10654_s11 + $0x238] sm:$0xff]  ;;  %v8233_v47 = vld [vmem:[%s10656_s13 + $0x460] sm:$0xff]  }
 0xb94   :  { %4978 = vmatprep.subr.bf16.mxu0 %v7063_v46  ;;  %5107 = vmatprep.subr.bf16.mxu1 %v7069_v3  ;;  %v4916_v46 = vsel %vm1601_vm11, %v7106_v4, 0  ;;  %v7091_v3 = vcombine.high %v7041_v44, %v7049_v1 }
 0xb97   :  { %4979 = vmatpush1.bf16.msra.mxu0 %v7062_v58  ;;  %5108 = vmatpush1.bf16.msra.mxu1 %v7068_v17  ;;  %v7033_v58 = vld [vmem:[%s10654_s11 + $0x1b8] sm:$0xff] }
 0xb98   :  { %7114 = vmatprep.subr.msk.bf16.mxu0 %vm1601_vm11, %v7099_v55  ;;  %7120 = vmatprep.subr.msk.bf16.mxu1 %vm1601_vm11, %v7105_v33  ;;  %v8237_v17 = vld [vmem:[%s10656_s13 + $0x458] sm:$0xff]   ;;  %v7090_v55 = vcombine.low %v7041_v44, %v7049_v1  ;;  %v7075_v33 = vcombine.high %v7025_v32, %v7033_v58  ;;  %v7074_v5 = vcombine.low %v7025_v32, %v7033_v58 }
 0xb9a   :  { %7111 = vmatmul.mubr.msk.bf16.vlgmr.msra.gmra.mxu0 %vm174_vm3, %v10054_v0  ;;  %7117 = vmatmul.mubr.msk.bf16.vlgmr.msra.gmra.mxu1 %vm174_vm3, %v10054_v0 }
 0xb9b   :  { %5061 = vmatpush1.bf16.msra.mxu0 %v4892_v20  ;;  %5190 = vmatpush1.bf16.msra.mxu1 %v4910_v49  ;;  %v8241_v20 = vld [vmem:[%s10656_s13 + $0x450] sm:$0xff]   ;;  %v8242_v49 = vld [vmem:[%s10656_s13 + $0x4a8] sm:$0xff]  }
 0xb9c   :  { %5062 = vmatprep.subr.bf16.mxu0 %v7083_v12  ;;  %5191 = vmatprep.subr.bf16.mxu1 %v7089_v45  ;;  %v8244_v12 = vld [vmem:[%s10656_s13 + $0x4e0] sm:$0xff]   ;;  %v8245_v45 = vld [vmem:[%s10656_s13 + $0x448] sm:$0xff]  }
 0xb9d   :  { %5082 = vmatprep.mubr.bf16.mxu0 %v8532_v54  ;;  %5211 = vmatprep.mubr.bf16.mxu1 %v8532_v54 }
 0xb9f   :  { %5063 = vmatpush1.bf16.msra.mxu0 %v7082_v22  ;;  %5192 = vmatpush1.bf16.msra.mxu1 %v7088_v28  ;;  %v8250_v22 = vld [vmem:[%s10656_s13 + $0x498] sm:$0xff]   ;;  %v8251_v28 = vld [vmem:[%s10656_s13 + $0x400] sm:$0xff]  }
 0xba0   :  { %5064 = vmatprep.subr.bf16.mxu0 %v7067_v24  ;;  %5193 = vmatprep.subr.bf16.mxu1 %v7073_v53  ;;  %v8252_v24 = vld [vmem:[%s10656_s13 + $0x4d0] sm:$0xff]  }
 0xba1   :  { %v8253_v53 = vld [vmem:[%s10656_s13 + $0x490] sm:$0xff]  }
 0xba3   :  { %5065 = vmatpush1.bf16.msra.mxu0 %v7066_v25  ;;  %5194 = vmatpush1.bf16.msra.mxu1 %v7072_v7  ;;  %v8256_v25 = vld [vmem:[%s10656_s13 + $0x4c8] sm:$0xff]  }
 0xba4   :  { %7118 = vmatprep.subr.msk.bf16.mxu0 %vm1601_vm11, %v7103_v23  ;;  %7760 = vmatprep.subr.bf16.mxu1 %v8226_v50  ;;  %v8257_v7 = vld [vmem:[%s10656_s13 + $0x488] sm:$0xff]   ;;  %v8260_v23 = vld [vmem:[%s10656_s13 + $0x4c0] sm:$0xff]   ;;  %v8264_v50 = vld [vmem:[%s10656_s13 + $0x5f8] sm:$0xff]  }
 0xba6   :  { %7115 = vmatmul.mubr.msk.bf16.vlgmr.msra.gmra.mxu0 %vm174_vm3, %v10054_v0  ;;  %7121 = vmatmul.mubr.msk.bf16.vlgmr.msra.gmra.mxu1 %vm174_vm3, %v10054_v0 }
 0xba7   :  { %5147 = vmatpush1.bf16.msra.mxu0 %v4904_v16  ;;  %5168 = vmatprep.mubr.bf16.mxu0 %v8532_v54 }
 0xba8   :  { %5148 = vmatprep.subr.bf16.mxu0 %v7087_v41  ;;  %7761 = vmatpush3.bf16.msra.mxu1 %v8227_v14  ;;  %v4597_v41 = vrot.slane %v10264_v10, %v9257_v48  ;;  %v4593_v14 = vrot.slane %v10264_v10, %v8698_v40 }
 0xba9   :  { %7762 = vmatprep.subr.bf16.mxu1 %v8228_v35  ;;  %v4613_v35 = vrot.slane %v10264_v10, %v9279_v30 }
 0xbab   :  { %5149 = vmatpush1.bf16.msra.mxu0 %v7086_v36 }
 0xbac   :  { %5150 = vmatprep.subr.bf16.mxu0 %v7071_v63  ;;  %7763 = vmatpush3.bf16.msra.mxu1 %v8229_v21 }
 0xbad   :  { %7764 = vmatprep.subr.bf16.mxu1 %v8230_v15 }
 0xbaf   :  { %5151 = vmatpush1.bf16.msra.mxu0 %v7070_v61 }
 0xbb0   :  { %7122 = vmatprep.subr.msk.bf16.mxu0 %vm1601_vm11, %v7107_v43  ;;  %7765 = vmatpush3.bf16.msra.mxu1 %v8231_v42 }
 0xbb1   :  { %7766 = vmatprep.subr.bf16.mxu1 %v8233_v47 }
 0xbb2   :  { %7119 = vmatmul.mubr.msk.bf16.vlgmr.msra.gmra.mxu0 %vm174_vm3, %v10054_v0 }
 0xbb3   :  { %5233 = vmatpush1.bf16.msra.mxu0 %v4916_v46  ;;  %5254 = vmatprep.mubr.bf16.mxu0 %v8532_v54  ;;  %v8234_v54 = vld [vmem:[%s10656_s13 + $0x4b8] sm:$0xff]  }
 0xbb4   :  { %5234 = vmatprep.subr.bf16.mxu0 %v7091_v3  ;;  %7767 = vmatpush3.bf16.msra.mxu1 %v8235_v34 }
 0xbb5   :  { %7768 = vmatprep.subr.bf16.mxu1 %v8237_v17  ;;  %v8255_v17 = vld [vmem:[%s10656_s13 + $0x538] sm:$0xff]  }
 0xbb7   :  { %5235 = vmatpush1.bf16.msra.mxu0 %v7090_v55 }
 0xbb8   :  { %5236 = vmatprep.subr.bf16.mxu0 %v7075_v33  ;;  %7769 = vmatpush3.bf16.msra.mxu1 %v8239_v38  ;;  %v8258_v38 = vld [vmem:[%s10656_s13 + $0x570] sm:$0xff]  }
 0xbb9   :  { %7770 = vmatprep.subr.bf16.mxu1 %v8241_v20  ;;  %v8262_v20 = vld [vmem:[%s10656_s13 + $0x568] sm:$0xff]  }
 0xbbb   :  { %5237 = vmatpush1.bf16.msra.mxu0 %v7074_v5 }
 0xbbc   :  { %7782 = vmatprep.subr.bf16.mxu0 %v8232_v9  ;;  %v4605_v9 = vrot.slane %v10264_v10, %v9260_v60 }
 0xbbe   :  { %7123 = vmatmul.mubr.msk.bf16.vlgmr.msra.gmra.mxu0 %vm174_vm3, %v10054_v0  ;;  %v8243_v0 = vld [vmem:[%s10656_s13 + $0x410] sm:$0xff]  }
 0xbbf   :  { %7783 = vmatpush3.bf16.msra.mxu0 %v8234_v54  ;;  %7771 = vmatpush3.bf16.msra.mxu1 %v8243_v0  ;;  %v4601_v54 = vrot.slane %v10264_v10, %v9263_v37 }
 0xbc0   :  { %7784 = vmatprep.subr.bf16.mxu0 %v8236_v59  ;;  %7772 = vmatprep.subr.bf16.mxu1 %v8245_v45 }
 0xbc3   :  { %7785 = vmatpush3.bf16.msra.mxu0 %v8238_v26  ;;  %7773 = vmatpush3.bf16.msra.mxu1 %v8247_v62  ;;  %v8259_v26 = vld [vmem:[%s10656_s13 + $0x530] sm:$0xff]   ;;  %v8263_v62 = vld [vmem:[%s10656_s13 + $0x528] sm:$0xff]  }
 0xbc4   :  { %7786 = vmatprep.subr.bf16.mxu0 %v8240_v11  ;;  %7774 = vmatprep.subr.bf16.mxu1 %v8249_v19  ;;  %v8265_v19 = vld [vmem:[%s10656_s13 + $0x560] sm:$0xff]  }
 0xbc7   :  { %7787 = vmatpush3.bf16.msra.mxu0 %v8242_v49  ;;  %7775 = vmatpush3.bf16.msra.mxu1 %v8251_v28 }
 0xbc8   :  { %7788 = vmatprep.subr.bf16.mxu0 %v8244_v12  ;;  %7804 = vmatprep.subr.bf16.mxu1 %v8254_v57 }
 0xbcb   :  { %7789 = vmatpush3.bf16.msra.mxu0 %v8246_v27 }
 0xbcc   :  { %7790 = vmatprep.subr.bf16.mxu0 %v8248_v56 }
 0xbcf   :  { %7791 = vmatpush3.bf16.msra.mxu0 %v8250_v22 }
 0xbd0   :  { %7792 = vmatprep.subr.bf16.mxu0 %v8252_v24 }
 0xbd3   :  { %7793 = vmatpush3.bf16.msra.mxu0 %v8253_v53 }
 0xbd4   :  { %7794 = vmatprep.subr.bf16.mxu0 %v8256_v25  ;;  %v8266_v25 = vld [vmem:[%s10656_s13 + $0x5b8] sm:$0xff]  }
 0xbd7   :  { %7795 = vmatpush3.bf16.msra.mxu0 %v8257_v7  ;;  %v8267_v7 = vld [vmem:[%s10656_s13 + $0x520] sm:$0xff]  }
 0xbd8   :  { %7796 = vmatprep.subr.bf16.mxu0 %v8260_v23 }
 0xbdb   :  { %7797 = vmatpush3.bf16.msra.mxu0 %v8261_v39 }
 0xbdc   :  { %7826 = vmatprep.subr.bf16.mxu0 %v8264_v50  ;;  %v8268_v50 = vld [vmem:[%s10656_s13 + $0x5f0] sm:$0xff]  }
 0xc4e   :  { %v4955_v6 = vpop.f32.mrf.mxu0  ;;  %v10266_v16 = vpop.f32.mrf.mxu1 }
 0xc4f   :  { %v4956_v15 = vadd.f32 %v4955_v6, %v4593_v14  ;;  %v8269_v6 = vld [vmem:[%s10656_s13 + $0x558] sm:$0xff]  }
 0xc50   :  { %v4957_v8 = vpop.f32.mrf.mxu0  ;;  %v5043_v29 = vpop.f32.mrf.mxu1 }
 0xc51   :  { %v4958_v21 = vadd.f32 %v4957_v8, %v4597_v41  ;;  %v5044_v4 = vadd.f32 %v5043_v29, %v4613_v35  ;;  %v5265_v34 = vmax.f32 %v4956_v15, 0.0  ;;  %v8270_v29 = vld [vmem:[%s10656_s13 + $0x5b0] sm:$0xff]  }
 0xc52   :  { %v4959_v36 = vpop.f32.mrf.mxu0  ;;  %v10274_v63 = vpop.f32.mrf.mxu1 }
 0xc53   :  { %v4960_v51 = vadd.f32 %v4959_v36, %v4593_v14  ;;  %v5266_v47 = vmax.f32 %v4958_v21, 0.0  ;;  %v5270_v32 = vmax.f32 %v5044_v4, 0.0  ;;  %v8272_v21 = vld [vmem:[%s10656_s13 + $0x5e8] sm:$0xff]  }
 0xc54   :  { %v4961_v61 = vpop.f32.mrf.mxu0  ;;  %v5047_v43 = vpop.f32.mrf.mxu1 }
 0xc55   :  { %v4962_v42 = vadd.f32 %v4961_v61, %v4597_v41  ;;  %v5048_v44 = vadd.f32 %v5047_v43, %v4613_v35  ;;  %v5281_v1 = vmax.f32 %v4960_v51, 0.0  ;;  %v4621_v41 = vrot.slane %v10264_v10, %v9282_v18  ;;  %v8271_v35 = vld [vmem:[%s10656_s13 + $0x518] sm:$0xff]   ;;  %v8273_v51 = vld [vmem:[%s10656_s13 + $0x550] sm:$0xff]  }
 0xc57   :  { %v5282_v46 = vmax.f32 %v4962_v42, 0.0  ;;  %v5286_v3 = vmax.f32 %v5048_v44, 0.0  ;;  %v5297_v55 = vpack.c.bf16 %v5281_v1, %v5265_v34  ;;  %v8274_v42 = vld [vmem:[%s10656_s13 + $0x5a8] sm:$0xff]   ;;  %v8275_v44 = vld [vmem:[%s10656_s13 + $0x510] sm:$0xff]   ;;  %v8276_v1 = vld [vmem:[%s10656_s13 + $0x5e0] sm:$0xff]   ;;  %v4609_v34 = vrot.slane %v10264_v10, %v9361_v13 }
 0xc59   :  { %v5298_v58 = vpack.c.bf16 %v5282_v46, %v5266_v47  ;;  %v5302_v5 = vpack.c.bf16 %v5286_v3, %v5270_v32  ;;  %v8277_v47 = vld [vmem:[%s10656_s13 + $0x548] sm:$0xff]   ;;  %v10349_v32 = vld [vmem:[%s10655_s12 + $0x11] ss:$2 sm:$0xff] }
 0xc5a   :  { %v4998_v33 = vpop.f32.mrf.mxu0  ;;  %v10298_v53 = vpop.f32.mrf.mxu1 }
 0xc5b   :  { %6375 = vmatprep.mubr.bf16.mxu1 %v5298_v58  ;;  %v4999_v12 = vadd.f32 %v4998_v33, %v4601_v54  ;;  %v8279_v33 = vld [vmem:[%s10656_s13 + $0x508] sm:$0xff]  }
 0xc5c   :  { %v5000_v59 = vpop.f32.mrf.mxu0  ;;  %6376 = vmatmul.mubr.bf16.vlgmr.msra.gmra.mxu1 %v5297_v55  ;;  %v5129_v8 = vpop.f32.mrf.mxu1  ;;  %v8278_v55 = vld [vmem:[%s10656_s13 + $0x5a0] sm:$0xff]  }
 0xc5d   :  { %7805 = vmatpush3.bf16.msra.mxu1 %v8255_v17  ;;  %6457 = vmatprep.mubr.bf16.mxu1 %v5302_v5  ;;  %v5001_v49 = vadd.f32 %v5000_v59, %v4605_v9  ;;  %v5267_v24 = vmax.f32 %v4999_v12, 0.0  ;;  %v4629_v5 = vrot.slane %v10349_v32, %v9257_v48  ;;  %v8281_v59 = vld [vmem:[%s10656_s13 + $0x540] sm:$0xff]   ;;  %v8282_v48 = vld [vmem:[%s10656_s13 + $0x598] sm:$0xff]  }
 0xc5e   :  { %v5002_v11 = vpop.f32.mrf.mxu0  ;;  %7806 = vmatprep.subr.bf16.mxu1 %v8258_v38  ;;  %v10330_v43 = vpop.f32.mrf.mxu1  ;;  %v5046_v38 = vadd.f32 %v10274_v63, %v4609_v34  ;;  %v8286_v12 = vld [vmem:[%s10656_s13 + $0x678] sm:$0xff]  }
 0xc5f   :  { %v5003_v0 = vadd.f32 %v5002_v11, %v4601_v54  ;;  %v5268_v22 = vmax.f32 %v5001_v49, 0.0  ;;  %v8280_v54 = vld [vmem:[%s10656_s13 + $0x5d8] sm:$0xff]  }
 0xc60   :  { %v5004_v45 = vpop.f32.mrf.mxu0  ;;  %v5133_v58 = vpop.f32.mrf.mxu1  ;;  %v5285_v49 = vmax.f32 %v5046_v38, 0.0  ;;  %v8304_v38 = vld [vmem:[%s10656_s13 + $0x6e8] sm:$0xff]  }
 0xc61   :  { %v5005_v27 = vadd.f32 %v5004_v45, %v4605_v9  ;;  %7807 = vmatpush3.bf16.msra.mxu1 %v8259_v26  ;;  %v5283_v56 = vmax.f32 %v5003_v0, 0.0  ;;  %v5042_v26 = vadd.f32 %v10266_v16, %v4609_v34  ;;  %v5134_v11 = vadd.f32 %v5133_v58, %v4629_v5  ;;  %v8284_v16 = vld [vmem:[%s10656_s13 + $0x5d0] sm:$0xff]   ;;  %v8301_v58 = vld [vmem:[%s10656_s13 + $0x658] sm:$0xff]  }
 0xc62   :  { %7808 = vmatprep.subr.bf16.mxu1 %v8262_v20  ;;  %v8283_v20 = vld [vmem:[%s10656_s13 + $0x500] sm:$0xff]   ;;  %v5130_v0 = vadd.f32 %v5129_v8, %v4629_v5  ;;  %v8305_v5 = vld [vmem:[%s10656_s13 + $0x650] sm:$0xff]  }
 0xc63   :  { %v5284_v28 = vmax.f32 %v5005_v27, 0.0  ;;  %v5299_v23 = vpack.c.bf16 %v5283_v56, %v5267_v24  ;;  %v5269_v45 = vmax.f32 %v5042_v26, 0.0  ;;  %v5290_v27 = vmax.f32 %v5134_v11, 0.0  ;;  %v8285_v56 = vld [vmem:[%s10656_s13 + $0x590] sm:$0xff]   ;;  %v8288_v24 = vld [vmem:[%s10656_s13 + $0x5c8] sm:$0xff]   ;;  %v8308_v11 = vld [vmem:[%s10656_s13 + $0x6e0] sm:$0xff]  }
 0xc64   :  { %v8307_v26 = vld [vmem:[%s10656_s13 + $0x610] sm:$0xff]  }
 0xc65   :  { %v5300_v57 = vpack.c.bf16 %v5284_v28, %v5268_v22  ;;  %7809 = vmatpush3.bf16.msra.mxu1 %v8263_v62  ;;  %v5301_v22 = vpack.c.bf16 %v5285_v49, %v5269_v45  ;;  %v5274_v28 = vmax.f32 %v5130_v0, 0.0  ;;  %v8310_v0 = vld [vmem:[%s10656_s13 + $0x6a0] sm:$0xff]   ;;  %v8312_v45 = vld [vmem:[%s10656_s13 + $0x6d8] sm:$0xff]  }
 0xc66   :  { %v10306_v39 = vpop.f32.mrf.mxu0  ;;  %7810 = vmatprep.subr.bf16.mxu1 %v8265_v19  ;;  %v8287_v19 = vld [vmem:[%s10656_s13 + $0x638] sm:$0xff]  }
 0xc67   :  { %6416 = vmatprep.mubr.bf16.mxu0 %v5300_v57  ;;  %v8290_v57 = vld [vmem:[%s10656_s13 + $0x670] sm:$0xff]  }
 0xc68   :  { %v5086_v14 = vpop.f32.mrf.mxu0  ;;  %6417 = vmatmul.mubr.bf16.vlgmr.msra.gmra.mxu0 %v5299_v23 }
 0xc69   :  { %7827 = vmatpush3.bf16.msra.mxu0 %v8266_v25  ;;  %7811 = vmatpush3.bf16.msra.mxu1 %v8267_v7  ;;  %v5087_v15 = vadd.f32 %v5086_v14, %v4621_v41  ;;  %v5306_v25 = vpack.c.bf16 %v5290_v27, %v5274_v28  ;;  %v4617_v7 = vrot.slane %v10264_v10, %v9364_v31  ;;  %v8292_v10 = vld [vmem:[%s10656_s13 + $0x5c0] sm:$0xff]  }
 0xc6a   :  { %v10322_v36 = vpop.f32.mrf.mxu0  ;;  %7828 = vmatprep.subr.bf16.mxu0 %v8268_v50  ;;  %7812 = vmatprep.subr.bf16.mxu1 %v8269_v6  ;;  %v4637_v50 = vrot.slane %v10349_v32, %v9260_v60  ;;  %v8289_v6 = vld [vmem:[%s10656_s13 + $0x588] sm:$0xff]   ;;  %v8313_v27 = vld [vmem:[%s10656_s13 + $0x640] sm:$0xff]  }
 0xc6b   :  { %v5272_v46 = vmax.f32 %v5087_v15, 0.0  ;;  %v5089_v14 = vadd.f32 %v10322_v36, %v4617_v7  ;;  %v8294_v60 = vld [vmem:[%s10656_s13 + $0x668] sm:$0xff]   ;;  %v8293_v36 = vld [vmem:[%s10656_s13 + $0x580] sm:$0xff]   ;;  %v8296_v15 = vld [vmem:[%s10656_s13 + $0x6f8] sm:$0xff]  }
 0xc6c   :  { %v5090_v61 = vpop.f32.mrf.mxu0 }
 0xc6d   :  { %v5091_v4 = vadd.f32 %v5090_v61, %v4621_v41  ;;  %7829 = vmatpush3.bf16.msra.mxu0 %v8270_v29  ;;  %7813 = vmatpush3.bf16.msra.mxu1 %v8271_v35  ;;  %v8291_v41 = vld [vmem:[%s10656_s13 + $0x630] sm:$0xff]   ;;  %v5085_v29 = vadd.f32 %v10306_v39, %v4617_v7  ;;  %v8297_v39 = vld [vmem:[%s10656_s13 + $0x660] sm:$0xff]  }
 0xc6e   :  { %7830 = vmatprep.subr.bf16.mxu0 %v8272_v21  ;;  %7814 = vmatprep.subr.bf16.mxu1 %v8273_v51  ;;  %v8295_v21 = vld [vmem:[%s10656_s13 + $0x628] sm:$0xff]   ;;  %v5287_v51 = vmax.f32 %v5089_v14, 0.0 }
 0xc6f   :  { %v5288_v3 = vmax.f32 %v5091_v4, 0.0  ;;  %v5271_v4 = vmax.f32 %v5085_v29, 0.0  ;;  %v4633_v29 = vrot.slane %v10349_v32, %v9263_v37  ;;  %v8324_v37 = vld [vmem:[%s10656_s13 + $0x6c0] sm:$0xff]  }
 0xc71   :  { %v5304_v17 = vpack.c.bf16 %v5288_v3, %v5272_v46  ;;  %7831 = vmatpush3.bf16.msra.mxu0 %v8274_v42  ;;  %7815 = vmatpush3.bf16.msra.mxu1 %v8275_v44  ;;  %v10425_v42 = vpop.f32.mrf.mxu1  ;;  %v8299_v46 = vld [vmem:[%s10656_s13 + $0x620] sm:$0xff]   ;;  %v8300_v3 = vld [vmem:[%s10656_s13 + $0x6f0] sm:$0xff]  }
 0xc72   :  { %v10360_v9 = vpop.f32.mrf.mxu0  ;;  %7832 = vmatprep.subr.bf16.mxu0 %v8276_v1  ;;  %7816 = vmatprep.subr.bf16.mxu1 %v8277_v47  ;;  %v8298_v1 = vld [vmem:[%s10656_s13 + $0x6b8] sm:$0xff]   ;;  %v5303_v47 = vpack.c.bf16 %v5287_v51, %v5271_v4  ;;  %v8325_v4 = vld [vmem:[%s10656_s13 + $0x680] sm:$0xff]  }
 0xc73   :  { %6498 = vmatprep.mubr.bf16.mxu0 %v5304_v17  ;;  %v5215_v17 = vpop.f32.mrf.mxu1 }
 0xc74   :  { %v5172_v63 = vpop.f32.mrf.mxu0 }
 0xc75   :  { %7833 = vmatpush3.bf16.msra.mxu0 %v8278_v55  ;;  %7817 = vmatpush3.bf16.msra.mxu1 %v8279_v33  ;;  %v5173_v35 = vadd.f32 %v5172_v63, %v4637_v50  ;;  %v8302_v55 = vld [vmem:[%s10656_s13 + $0x6b0] sm:$0xff]   ;;  %v8303_v33 = vld [vmem:[%s10656_s13 + $0x618] sm:$0xff]   ;;  %v8309_v63 = vld [vmem:[%s10656_s13 + $0x648] sm:$0xff]  }
 0xc76   :  { %7834 = vmatprep.subr.bf16.mxu0 %v8280_v54  ;;  %7818 = vmatprep.subr.bf16.mxu1 %v8281_v59  ;;  %v10381_v62 = vpop.f32.mrf.mxu0  ;;  %v10451_v54 = vpop.f32.mrf.mxu1  ;;  %v8306_v59 = vld [vmem:[%s10656_s13 + $0x6a8] sm:$0xff]  }
 0xc77   :  { %v5276_v44 = vmax.f32 %v5173_v35, 0.0  ;;  %v5175_v51 = vadd.f32 %v10381_v62, %v4633_v29 }
 0xc78   :  { %v5176_v23 = vpop.f32.mrf.mxu0  ;;  %v5219_v49 = vpop.f32.mrf.mxu1 }
 0xc79   :  { %7835 = vmatpush3.bf16.msra.mxu0 %v8282_v48  ;;  %7819 = vmatpush3.bf16.msra.mxu1 %v8283_v20  ;;  %v5177_v8 = vadd.f32 %v5176_v23, %v4637_v50  ;;  %v4625_v20 = vrot.slane %v10349_v32, %v8698_v40  ;;  %v8317_v50 = vld [vmem:[%s10656_s13 + $0x690] sm:$0xff]  }
 0xc7a   :  { %7836 = vmatprep.subr.bf16.mxu0 %v8284_v16  ;;  %7848 = vmatprep.subr.bf16.mxu1 %v8286_v12  ;;  %v4645_v16 = vrot.slane %v10349_v32, %v9279_v30  ;;  %v8311_v12 = vld [vmem:[%s10656_s13 + $0x608] sm:$0xff]  }
 0xc7b   :  { %v5292_v61 = vmax.f32 %v5177_v8, 0.0  ;;  %v5132_v40 = vadd.f32 %v10330_v43, %v4625_v20  ;;  %v5128_v30 = vadd.f32 %v10298_v53, %v4625_v20  ;;  %v8315_v43 = vld [vmem:[%s10656_s13 + $0x600] sm:$0xff]   ;;  %v8318_v53 = vld [vmem:[%s10656_s13 + $0x778] sm:$0xff]   ;;  %v8338_v20 = vld [vmem:[%s10656_s13 + $0x7a8] sm:$0xff]  }
 0xc7c   :  { %6458 = vmatmul.mubr.bf16.vlgmr.msra.gmra.mxu1 %v5301_v22  ;;  %v8314_v22 = vld [vmem:[%s10656_s13 + $0x698] sm:$0xff]   ;;  %v5216_v28 = vadd.f32 %v5215_v17, %v4645_v16 }
 0xc7d   :  { %7837 = vmatpush3.bf16.msra.mxu0 %v8285_v56  ;;  %7849 = vmatpush3.bf16.msra.mxu1 %v8287_v19  ;;  %v5308_v34 = vpack.c.bf16 %v5292_v61, %v5276_v44  ;;  %v5220_v56 = vadd.f32 %v5219_v49, %v4645_v16  ;;  %v5273_v23 = vmax.f32 %v5128_v30, 0.0  ;;  %v5171_v61 = vadd.f32 %v10360_v9, %v4633_v29  ;;  %v8329_v9 = vld [vmem:[%s10656_s13 + $0x760] sm:$0xff]   ;;  %v8339_v49 = vld [vmem:[%s10656_s13 + $0x710] sm:$0xff]   ;;  %v8341_v16 = vld [vmem:[%s10656_s13 + $0x748] sm:$0xff]  }
 0xc7e   :  { %6539 = vmatprep.mubr.bf16.mxu1 %v5306_v25  ;;  %7838 = vmatprep.subr.bf16.mxu0 %v8288_v24  ;;  %v10465_v48 = vpop.f32.mrf.mxu0  ;;  %v8316_v24 = vld [vmem:[%s10656_s13 + $0x6d0] sm:$0xff]   ;;  %v5291_v44 = vmax.f32 %v5175_v51, 0.0  ;;  %v8346_v30 = vld [vmem:[%s10656_s13 + $0x798] sm:$0xff]  }
 0xc7f   :  { %7850 = vmatprep.subr.bf16.mxu1 %v8290_v57  ;;  %v5289_v57 = vmax.f32 %v5132_v40, 0.0  ;;  %v5294_v25 = vmax.f32 %v5220_v56, 0.0  ;;  %v8343_v40 = vld [vmem:[%s10656_s13 + $0x708] sm:$0xff]  }
 0xc80   :  { %v5258_v19 = vpop.f32.mrf.mxu0 }
 0xc81   :  { %7839 = vmatpush3.bf16.msra.mxu0 %v8289_v6  ;;  %7851 = vmatpush3.bf16.msra.mxu1 %v8291_v41  ;;  %v5278_v6 = vmax.f32 %v5216_v28, 0.0  ;;  %v8319_v41 = vld [vmem:[%s10656_s13 + $0x738] sm:$0xff]   ;;  %v5305_v14 = vpack.c.bf16 %v5289_v57, %v5273_v23 }
 0xc82   :  { %7840 = vmatprep.subr.bf16.mxu0 %v8292_v10  ;;  %7852 = vmatprep.subr.bf16.mxu1 %v8294_v60  ;;  %v10497_v7 = vpop.f32.mrf.mxu0  ;;  %v8320_v10 = vld [vmem:[%s10656_s13 + $0x6c8] sm:$0xff]   ;;  %v8322_v60 = vld [vmem:[%s10656_s13 + $0x770] sm:$0xff]  }
 0xc83   :  { %v5310_v8 = vpack.c.bf16 %v5294_v25, %v5278_v6  ;;  %v8351_v25 = vld [vmem:[%s10656_s13 + $0x788] sm:$0xff]  }
 0xc84   :  { %v5262_v35 = vpop.f32.mrf.mxu0 }
 0xc85   :  { %7841 = vmatpush3.bf16.msra.mxu0 %v8293_v36  ;;  %7853 = vmatpush3.bf16.msra.mxu1 %v8295_v21  ;;  %v4653_v36 = vrot.slane %v10349_v32, %v9282_v18  ;;  %v8321_v21 = vld [vmem:[%s10656_s13 + $0x688] sm:$0xff]  }
 0xc86   :  { %7870 = vmatprep.subr.bf16.mxu0 %v8296_v15  ;;  %7854 = vmatprep.subr.bf16.mxu1 %v8297_v39  ;;  %v8323_v15 = vld [vmem:[%s10656_s13 + $0x730] sm:$0xff]   ;;  %v8326_v18 = vld [vmem:[%s10656_s13 + $0x768] sm:$0xff]  }
 0xc87   :  { %v5263_v39 = vadd.f32 %v5262_v35, %v4653_v36  ;;  %v5259_v62 = vadd.f32 %v5258_v19, %v4653_v36 }
 0xc88   :  { %6499 = vmatmul.mubr.bf16.vlgmr.msra.gmra.mxu0 %v5303_v47  ;;  %v8328_v47 = vld [vmem:[%s10656_s13 + $0x7f8] sm:$0xff]  }
 0xc89   :  { %7871 = vmatpush3.bf16.msra.mxu0 %v8298_v1  ;;  %6580 = vmatprep.mubr.bf16.mxu0 %v5308_v34  ;;  %v8327_v1 = vld [vmem:[%s10656_s13 + $0x728] sm:$0xff]   ;;  %v5280_v34 = vmax.f32 %v5259_v62, 0.0 }
 0xc8a   :  { %7855 = vmatpush3.bf16.msra.mxu1 %v8299_v46  ;;  %7872 = vmatprep.subr.bf16.mxu0 %v8300_v3  ;;  %v5296_v46 = vmax.f32 %v5263_v39, 0.0  ;;  %v5275_v3 = vmax.f32 %v5171_v61, 0.0 }
 0xc8b   :  { %7856 = vmatprep.subr.bf16.mxu1 %v8301_v58  ;;  %v8330_v58 = vld [vmem:[%s10656_s13 + $0x7b8] sm:$0xff]  }
 0xc8c   :  { %v5307_v17 = vpack.c.bf16 %v5291_v44, %v5275_v3  ;;  %v7380_v3 = vld [vmem:[%s10657_s14 + $0x1] ss:$0 sm:$0xff] }
 0xc8d   :  { %7873 = vmatpush3.bf16.msra.mxu0 %v8302_v55  ;;  %v8331_v55 = vld [vmem:[%s10656_s13 + $0x720] sm:$0xff]  }
 0xc8e   :  { %7857 = vmatpush3.bf16.msra.mxu1 %v8303_v33  ;;  %7874 = vmatprep.subr.bf16.mxu0 %v8304_v38  ;;  %v8332_v33 = vld [vmem:[%s10656_s13 + $0x7f0] sm:$0xff]   ;;  %v5312_v38 = vpack.c.bf16 %v5296_v46, %v5280_v34 }
 0xc8f   :  { %7858 = vmatprep.subr.bf16.mxu1 %v8305_v5  ;;  %v8333_v5 = vld [vmem:[%s10656_s13 + $0x758] sm:$0xff]  }
 0xc91   :  { %7875 = vmatpush3.bf16.msra.mxu0 %v8306_v59  ;;  %v8334_v59 = vld [vmem:[%s10656_s13 + $0x7b0] sm:$0xff]  }
 0xc92   :  { %7859 = vmatpush3.bf16.msra.mxu1 %v8307_v26  ;;  %7876 = vmatprep.subr.bf16.mxu0 %v8308_v11  ;;  %v8335_v26 = vld [vmem:[%s10656_s13 + $0x718] sm:$0xff]   ;;  %v8336_v11 = vld [vmem:[%s10656_s13 + $0x7e8] sm:$0xff]  }
 0xc93   :  { %7860 = vmatprep.subr.bf16.mxu1 %v8309_v63  ;;  %v8337_v63 = vld [vmem:[%s10656_s13 + $0x750] sm:$0xff]  }
 0xc95   :  { %7877 = vmatpush3.bf16.msra.mxu0 %v8310_v0  ;;  %v8340_v0 = vld [vmem:[%s10656_s13 + $0x7e0] sm:$0xff]  }
 0xc96   :  { %7861 = vmatpush3.bf16.msra.mxu1 %v8311_v12  ;;  %7878 = vmatprep.subr.bf16.mxu0 %v8312_v45  ;;  %v4641_v12 = vrot.slane %v10349_v32, %v9361_v13  ;;  %v8342_v45 = vld [vmem:[%s10656_s13 + $0x7a0] sm:$0xff]  }
 0xc97   :  { %7862 = vmatprep.subr.bf16.mxu1 %v8313_v27  ;;  %v8344_v27 = vld [vmem:[%s10656_s13 + $0x7d8] sm:$0xff]   ;;  %v8345_v13 = vld [vmem:[%s10656_s13 + $0x740] sm:$0xff]  }
 0xc98   :  { %v5218_v56 = vadd.f32 %v10451_v54, %v4641_v12  ;;  %v5214_v19 = vadd.f32 %v10425_v42, %v4641_v12  ;;  %v8348_v54 = vld [vmem:[%s10656_s13 + $0x7d0] sm:$0xff]  }
 0xc99   :  { %7879 = vmatpush3.bf16.msra.mxu0 %v8314_v22  ;;  %v8347_v22 = vld [vmem:[%s10656_s13 + $0x700] sm:$0xff]   ;;  %v8349_v42 = vld [vmem:[%s10656_s13 + $0x790] sm:$0xff]  }
 0xc9a   :  { %7863 = vmatpush3.bf16.msra.mxu1 %v8315_v43  ;;  %7880 = vmatprep.subr.bf16.mxu0 %v8316_v24  ;;  %v5293_v28 = vmax.f32 %v5218_v56, 0.0  ;;  %v5277_v43 = vmax.f32 %v5214_v19, 0.0  ;;  %v8350_v24 = vld [vmem:[%s10656_s13 + $0x7c8] sm:$0xff]  }
 0xc9b   :  { %7892 = vmatprep.subr.bf16.mxu1 %v8318_v53  ;;  %v4649_v53 = vrot.slane %v10349_v32, %v9364_v31  ;;  %v8353_v31 = vld [vmem:[%s10656_s13 + $0x780] sm:$0xff]  }
 0xc9c   :  { %v5309_v57 = vpack.c.bf16 %v5293_v28, %v5277_v43 }
 0xc9d   :  { %6540 = vmatmul.mubr.bf16.vlgmr.msra.gmra.mxu1 %v5305_v14  ;;  %7881 = vmatpush3.bf16.msra.mxu0 %v8317_v50  ;;  %v5261_v23 = vadd.f32 %v10497_v7, %v4649_v53  ;;  %v8352_v50 = vld [vmem:[%s10656_s13 + $0x7c0] sm:$0xff]   ;;  %v5257_v6 = vadd.f32 %v10465_v48, %v4649_v53 }
 0xc9e   :  { %7893 = vmatpush3.bf16.msra.mxu1 %v8319_v41  ;;  %6621 = vmatprep.mubr.bf16.mxu1 %v5310_v8 }
 0xc9f   :  { %7882 = vmatprep.subr.bf16.mxu0 %v8320_v10  ;;  %7894 = vmatprep.subr.bf16.mxu1 %v8322_v60  ;;  %v5295_v32 = vmax.f32 %v5261_v23, 0.0  ;;  %v5279_v41 = vmax.f32 %v5257_v6, 0.0 }
 0xca1   :  { %7883 = vmatpush3.bf16.msra.mxu0 %v8321_v21  ;;  %v5311_v14 = vpack.c.bf16 %v5295_v32, %v5279_v41 }
 0xca2   :  { %7895 = vmatpush3.bf16.msra.mxu1 %v8323_v15  ;;  %7884 = vmatprep.subr.bf16.mxu0 %v8324_v37 }
 0xca3   :  { %7896 = vmatprep.subr.bf16.mxu1 %v8326_v18 }
 0xca5   :  { %7885 = vmatpush3.bf16.msra.mxu0 %v8325_v4 }
 0xca6   :  { %7897 = vmatpush3.bf16.msra.mxu1 %v8327_v1  ;;  %7914 = vmatprep.subr.bf16.mxu0 %v8328_v47 }
 0xca7   :  { %7898 = vmatprep.subr.bf16.mxu1 %v8329_v9 }
 0xca8   :  { %6581 = vmatmul.mubr.bf16.vlgmr.msra.gmra.mxu0 %v5307_v17 }
 0xca9   :  { %7915 = vmatpush3.bf16.msra.mxu0 %v8330_v58  ;;  %6662 = vmatprep.mubr.bf16.mxu0 %v5312_v38 }
 0xcaa   :  { %7899 = vmatpush3.bf16.msra.mxu1 %v8331_v55  ;;  %7916 = vmatprep.subr.bf16.mxu0 %v8332_v33 }
 0xcab   :  { %7900 = vmatprep.subr.bf16.mxu1 %v8333_v5 }
 0xcad   :  { %7917 = vmatpush3.bf16.msra.mxu0 %v8334_v59 }
 0xcae   :  { %7901 = vmatpush3.bf16.msra.mxu1 %v8335_v26  ;;  %7918 = vmatprep.subr.bf16.mxu0 %v8336_v11 }
 0xcaf   :  { %7902 = vmatprep.subr.bf16.mxu1 %v8337_v63 }
 0xcb1   :  { %7919 = vmatpush3.bf16.msra.mxu0 %v8338_v20 }
 0xcb2   :  { %7903 = vmatpush3.bf16.msra.mxu1 %v8339_v49  ;;  %7920 = vmatprep.subr.bf16.mxu0 %v8340_v0 }
 0xcb3   :  { %7904 = vmatprep.subr.bf16.mxu1 %v8341_v16 }
 0xcb5   :  { %7921 = vmatpush3.bf16.msra.mxu0 %v8342_v45 }
 0xcb6   :  { %7905 = vmatpush3.bf16.msra.mxu1 %v8343_v40  ;;  %7922 = vmatprep.subr.bf16.mxu0 %v8344_v27 }
 0xcb7   :  { %7906 = vmatprep.subr.bf16.mxu1 %v8345_v13 }
 0xcb9   :  { %7923 = vmatpush3.bf16.msra.mxu0 %v8346_v30 }
 0xcba   :  { %7907 = vmatpush3.bf16.msra.mxu1 %v8347_v22  ;;  %7924 = vmatprep.subr.bf16.mxu0 %v8348_v54 }
 0xcbd   :  { %6622 = vmatmul.mubr.bf16.vlgmr.msra.gmra.mxu1 %v5309_v57  ;;  %7925 = vmatpush3.bf16.msra.mxu0 %v8349_v42 }
 0xcbe   :  { %7926 = vmatprep.subr.bf16.mxu0 %v8350_v24 }
 0xcc1   :  { %7927 = vmatpush3.bf16.msra.mxu0 %v8351_v25 }
 0xcc2   :  { %7928 = vmatprep.subr.bf16.mxu0 %v8352_v50 }
 0xcc5   :  { %7929 = vmatpush3.bf16.msra.mxu0 %v8353_v31 }
 0xcc8   :  { %6663 = vmatmul.mubr.bf16.vlgmr.msra.gmra.mxu0 %v5311_v14 }
 0xd1c   :  { %v7776_v10 = vpop.f32.mrf.mxu1 }
 0xd1e   :  { %v7777_v7 = vpop.f32.mrf.mxu1 }
 0xd1f   :  { %v7778_v46 = vadd.f32 %v7777_v7, %v7776_v10 }
 0xd20   :  { %v7779_v60 = vpop.f32.mrf.mxu1 }
 0xd21   :  { %v6378_v55 = vadd.f32 %v7778_v46, %v7380_v3 }
 0xd22   :  { %v7780_v29 = vpop.f32.mrf.mxu1 }
 0xd23   :  { %v7781_v33 = vadd.f32 %v7780_v29, %v7779_v60 }
 0xd25   :  { %v6381_v20 = vadd.f32 %v7781_v33, %v7380_v3  ;;  %v7510_v33 = vld [vmem:[%s10659_s16 + $0x1] ss:$0 sm:$0xff] }
 0xd28   :  { %v7798_v8 = vpop.f32.mrf.mxu0 }
 0xd2a   :  { %v7799_v36 = vpop.f32.mrf.mxu0 }
 0xd2b   :  { %v7800_v34 = vadd.f32 %v7799_v36, %v7798_v8 }
 0xd2c   :  { %v7801_v48 = vpop.f32.mrf.mxu0 }
 0xd2d   :  { %v6419_v59 = vadd.f32 %v7800_v34, %v6378_v55 }
 0xd2e   :  { %v7802_v15 = vpop.f32.mrf.mxu0 }
 0xd2f   :  { %v7803_v26 = vadd.f32 %v7802_v15, %v7801_v48 }
 0xd31   :  { %v6422_v45 = vadd.f32 %v7803_v26, %v6381_v20 }
 0xd3c   :  { %v7820_v35 = vpop.f32.mrf.mxu1 }
 0xd3e   :  { %v7821_v21 = vpop.f32.mrf.mxu1 }
 0xd3f   :  { %v7822_v38 = vadd.f32 %v7821_v21, %v7820_v35 }
 0xd40   :  { %v7823_v51 = vpop.f32.mrf.mxu1 }
 0xd41   :  { %v6460_v49 = vadd.f32 %v7822_v38, %v6419_v59 }
 0xd42   :  { %v7824_v39 = vpop.f32.mrf.mxu1 }
 0xd43   :  { %v7825_v0 = vadd.f32 %v7824_v39, %v7823_v51 }
 0xd45   :  { %v6463_v19 = vadd.f32 %v7825_v0, %v6422_v45 }
 0xd48   :  { %v7842_v37 = vpop.f32.mrf.mxu0 }
 0xd4a   :  { %v7843_v61 = vpop.f32.mrf.mxu0 }
 0xd4b   :  { %v7844_v11 = vadd.f32 %v7843_v61, %v7842_v37 }
 0xd4c   :  { %v7845_v4 = vpop.f32.mrf.mxu0 }
 0xd4d   :  { %v6501_v40 = vadd.f32 %v7844_v11, %v6460_v49 }
 0xd4e   :  { %v7846_v1 = vpop.f32.mrf.mxu0 }
 0xd4f   :  { %v7847_v27 = vadd.f32 %v7846_v1, %v7845_v4 }
 0xd51   :  { %v6504_v42 = vadd.f32 %v7847_v27, %v6463_v19 }
 0xd5d   :  { %v7864_v18 = vpop.f32.mrf.mxu1 }
 0xd5f   :  { %v7865_v62 = vpop.f32.mrf.mxu1 }
 0xd60   :  { %v7866_v16 = vadd.f32 %v7865_v62, %v7864_v18 }
 0xd61   :  { %v7867_v44 = vpop.f32.mrf.mxu1 }
 0xd62   :  { %v6542_v30 = vadd.f32 %v7866_v16, %v6501_v40 }
 0xd63   :  { %v7868_v9 = vpop.f32.mrf.mxu1 }
 0xd64   :  { %v7869_v22 = vadd.f32 %v7868_v9, %v7867_v44 }
 0xd66   :  { %v6545_v25 = vadd.f32 %v7869_v22, %v6504_v42 }
 0xd68   :  { %v7886_v47 = vpop.f32.mrf.mxu0 }
 0xd6a   :  { %v7887_v17 = vpop.f32.mrf.mxu0 }
 0xd6b   :  { %v7888_v56 = vadd.f32 %v7887_v17, %v7886_v47  ;;  %v7509_v17 = vld [vmem:[%s10658_s15 + $0x1] ss:$0 sm:$0xff]  ;;  %s8533_s15 = smov [#allocation2]  }
 0xd6c   :  { %v7889_v63 = vpop.f32.mrf.mxu0  ;;  %s6746_s16 = sshll.u32 %s8533_s15, 4  ;;  %s6747_s16 = int_to_ptr.vmem [resolvable:$true] %s6746_s16 }
 0xd6d   :  { %v6583_v24 = vadd.f32 %v7888_v56, %v6542_v30  ;;  %s8507_s7 = scalar_lea.vmem %s6747_s16, 32  ;;  %p8512_p1 = scmp.lt.s32.totalorder %s6747_s16, %s6747_s16 }
 0xd6e   :  { %v7890_v13 = vpop.f32.mrf.mxu0  ;;  %p8508_p0 = scmp.ne.s32.totalorder %s6747_s16, %s8507_s7  ;;  %p8513_p2 = scmp.lt.s32.totalorder %s8507_s7, %s8507_s7 }
 0xd6f   :  { %v7891_v57 = vadd.f32 %v7890_v13, %v7889_v63 }
 0xd70   :  { %p8514_p3 = por %p8513_p2, %p8512_p1 }
 0xd71   :  { %v6586_v32 = vadd.f32 %v7891_v57, %v6545_v25 }
 0xd72   :  { %p8515_p4 = pnand %p8514_p3, %p8508_p0 }
 0xd7d   :  { %v7908_v58 = vpop.f32.mrf.mxu1 }
 0xd7f   :  { %v7909_v5 = vpop.f32.mrf.mxu1 }
 0xd80   :  { %v7910_v54 = vadd.f32 %v7909_v5, %v7908_v58 }
 0xd81   :  { %v7911_v12 = vpop.f32.mrf.mxu1 }
 0xd82   :  { %v6624_v23 = vadd.f32 %v7910_v54, %v6583_v24 }
 0xd83   :  { %v7912_v28 = vpop.f32.mrf.mxu1 }
 0xd84   :  { %v7913_v50 = vadd.f32 %v7912_v28, %v7911_v12 }
 0xd86   :  { %v6627_v10 = vadd.f32 %v7913_v50, %v6586_v32 }
 0xd88   :  { %v7930_v43 = vpop.f32.mrf.mxu0 }
 0xd8a   :  { %v7931_v53 = vpop.f32.mrf.mxu0 }
 0xd8b   :  { %v7932_v6 = vadd.f32 %v7931_v53, %v7930_v43 }
 0xd8c   :  { %v7933_v31 = vpop.f32.mrf.mxu0 }
 0xd8d   :  { %v6665_v41 = vadd.f32 %v7932_v6, %v6624_v23 }
 0xd8e   :  { %v7934_v14 = vpop.f32.mrf.mxu0 }
 0xd8f   :  { %v6671_v7 = vadd.f32 %v6665_v41, %v10047_v2  ;;  %v7935_v60 = vadd.f32 %v7934_v14, %v7933_v31 }
 0xd91   :  { %v6668_v8 = vadd.f32 %v7935_v60, %v6627_v10  ;;  %v6675_v29 = vsel %vm174_vm3, %v6671_v7, 0.0  ;;  %v6683_v35 = vmul.f32 %v6671_v7, %v6671_v7 }
 0xd92   :  { %6676 = vadd.xlane.f32.xlu1 %v6675_v29 }
 0xd93   :  { %v6672_v36 = vadd.f32 %v6668_v8, %v10049_v52  ;;  %v6685_v48 = vsel %vm174_vm3, %v6683_v35, 0.0 }
 0xd95   :  { %v6678_v21 = vsel %vm174_vm3, %v6672_v36, 0.0  ;;  %v6684_v51 = vmul.f32 %v6672_v36, %v6672_v36 }
 0xd96   :  { %6679 = vadd.xlane.f32.xlu0 %v6678_v21  ;;  %6686 = vadd.xlane.f32.xlu1 %v6685_v48 }
 0xd97   :  { %v6688_v15 = vsel %vm174_vm3, %v6684_v51, 0.0 }
 0xd9a   :  { %6689 = vadd.xlane.f32.xlu0 %v6688_v15 }
 0xe1b   :  { %v6677_v37 = vpop.xlane.xlu1 %6676 }
 0xe1c   :  { %v6681_v2 = vmul.f32 0.027777778, %v6677_v37 }
 0xe1e   :  { %v6693_v61 = vmul.f32 %v6681_v2, %v6681_v2  ;;  %v6697_v34 = vsub.f32 %v6671_v7, %v6681_v2 }
 0xe1f   :  { %v6680_v39 = vpop.xlane.xlu0 %6679  ;;  %v6687_v18 = vpop.xlane.xlu1 %6686 }
 0xe20   :  { %v6682_v62 = vmul.f32 0.027777778, %v6680_v39  ;;  %v6691_v4 = vmul.f32 0.027777778, %v6687_v18 }
 0xe22   :  { %v6695_v44 = vsub.f32 %v6691_v4, %v6693_v61  ;;  %v6694_v52 = vmul.f32 %v6682_v62, %v6682_v62  ;;  %v6698_v38 = vsub.f32 %v6672_v36, %v6682_v62 }
 0xe23   :  { %v6690_v1 = vpop.xlane.xlu0 %6689 }
 0xe24   :  { %v6699_v47 = vadd.f32 1e-05, %v6695_v44  ;;  %v6692_v46 = vmul.f32 0.027777778, %v6690_v1 }
 0xe26   :  { %8498 = vrsqrt.f32 %v6699_v47  ;;  %v6696_v9 = vsub.f32 %v6692_v46, %v6694_v52 }
 0xe28   :  { %v6700_v3 = vadd.f32 1e-05, %v6696_v9 }
 0xe2a   :  { %8500 = vrsqrt.f32 %v6700_v3 }
 0xe33   :  { %v8499_v58 = vpop.eup %8498 }
 0xe34   :  { %v6703_v55 = vmul.f32 %v8499_v58, %v6697_v34 }
 0xe36   :  { %v6709_v5 = vmul.f32 %v7509_v17, %v6703_v55 }
 0xe37   :  { %v8501_v59 = vpop.eup %8500 }
 0xe38   :  { %v6704_v26 = vmul.f32 %v8501_v59, %v6698_v38  ;;  %v6715_v11 = vadd.f32 %v7510_v33, %v6709_v5 }
 0xe3a   :  { %v6710_v63 = vmul.f32 %v7509_v17, %v6704_v26  ;;  %v6717_v20 = vsel %vm174_vm3, %v6715_v11, 0.0 }
 0xe3b   :  { %v6718_v49 = vrot.slane %v6717_v20, 4 }
 0xe3c   :  { %v6716_v0 = vadd.f32 %v7510_v33, %v6710_v63 }
 0xe3d   :  { %v6719_v16 = vadd.f32 %v6718_v49, %v6717_v20 }
 0xe3e   :  { %v6724_v12 = vsel %vm174_vm3, %v6716_v0, 0.0 }
 0xe3f   :  { %v6720_v45 = vrot.slane %v6719_v16, 2  ;;  %v6725_v40 = vrot.slane %v6724_v12, 4 }
 0xe41   :  { %v6721_v27 = vadd.f32 %v6720_v45, %v6719_v16  ;;  %v6726_v56 = vadd.f32 %v6725_v40, %v6724_v12 }
 0xe43   :  { %v6722_v13 = vrot.slane %v6721_v27, 1  ;;  %v6727_v19 = vrot.slane %v6726_v56, 2 }
 0xe45   :  { %v6728_v30 = vadd.f32 %v6727_v19, %v6726_v56  ;;  %v6723_v22 = vadd.f32 %v6722_v13, %v6721_v27 }
 0xe47   :  { %v6729_v54 = vrot.slane %v6728_v30, 1  ;;  %v6732_v43 = vmul.f32 0.125, %v6723_v22 }
 0xe49   :  { %v6730_v28 = vadd.f32 %v6729_v54, %v6728_v30 }
 0xe4b   :  { %v6733_v42 = vmul.f32 0.125, %v6730_v28 }
 0xe4d   :  { %v6736_v24 = vsel %vm1122_vm4, %v6733_v42, %v6732_v43 }
 0xe4e   :  { %v6738_v57 = vsel %vm174_vm3, %v6736_v24, 0.0 }
 0xe4f   :  { %6739 = vst [vmem:[#allocation2] sm:$0x3] %v6738_v57 }
 0xe50   :  { %8518 = shalt.err (!%p8515_p4)
}
 0xe51   :  { %6749 = dma.vmem_to_hbm [thread:$0]  %s6747_s16, 32, %s10660_s17, [#allocation3]  }
 0xe52   :  { %8527 = dma.done.wait [#allocation3], 32  }
 0xe53   :  { %8528 = vsyncadd [#allocation3], 4294967264 }
 0xe54   :  { %6753 = vsyncpa [#allocation3], 1 }

</bundles_post_ra>
